<compile_context>
chip_gen: v7x
topology: tpu7x:2x2x1
jax: 0.10.0
libtpu: 0.0.40
codegen_flags: <defaults>
</compile_context>

<pallas_src>
import functools

import numpy as np
import jax
import jax.numpy as jnp
from jax import lax
from jax.experimental import pallas as pl
from jax.experimental.pallas import tpu as pltpu

LEAKY_SLOPE = 0.2
BN_EPS = 1e-5


# ============================================================================
# In-kernel helpers
# ============================================================================
def _lrelu(x):
    return jnp.where(x >= 0.0, x, LEAKY_SLOPE * x)


def _sigmoid(x):
    # Numerically stable: never produces inf intermediates.
    e = jnp.exp(-jnp.abs(x))
    return jnp.where(x >= 0.0, 1.0 / (1.0 + e), e / (1.0 + e))


def _silu(x):
    return x * _sigmoid(x)


def _dot_bf16(a, b):
    # bf16 MXU operands, f32 accumulation.
    return jnp.dot(a.astype(jnp.bfloat16), b.astype(jnp.bfloat16),
                   preferred_element_type=jnp.float32)


def _gather_k4s2_scan(src_ref, nbatch, h_in, wc):
    """Row gather for a k=4, s=2, p=1 conv from an (unpadded) scanline ref
    [nbatch*h_in, wc].  Output row (b, oh) needs input rows h = 2*oh + i - 1
    (i = kernel row).  Returns [nbatch*(h_in//2), 4*wc] with kernel-row blocks
    i = 0..3 along the lane axis (matches the K-stacked weight matrices)."""
    oh = h_in // 2
    zrow = jnp.zeros((1, wc), jnp.float32)
    blocks = []
    for b in range(nbatch):
        base = b * h_in
        ev = src_ref[pl.ds(base, oh, stride=2), :]             # h = 2*oh      (i = 1)
        od = src_ref[pl.ds(base + 1, oh, stride=2), :]         # h = 2*oh + 1  (i = 2)
        p0 = jnp.concatenate([zrow, od[:oh - 1, :]], axis=0)   # h = 2*oh - 1  (i = 0)
        p3 = jnp.concatenate([ev[1:, :], zrow], axis=0)        # h = 2*oh + 2  (i = 3)
        blocks.append(jnp.concatenate([p0, ev, od, p3], axis=1))
    return jnp.concatenate(blocks, axis=0)


def _gather_k4s2_planar(img_ref, nbatch, chans, h_in, w_in):
    """Same as above, but straight from the NCHW image reshaped to [B*C*H, W]
    (no host-side transpose).  Lane order of the K blocks is (c, i, w)."""
    oh = h_in // 2
    zrow = jnp.zeros((1, w_in), jnp.float32)
    blocks = []
    for b in range(nbatch):
        per_chan = []
        for c in range(chans):
            base = (b * chans + c) * h_in
            ev = img_ref[pl.ds(base, oh, stride=2), :]
            od = img_ref[pl.ds(base + 1, oh, stride=2), :]
            p0 = jnp.concatenate([zrow, od[:oh - 1, :]], axis=0)
            p3 = jnp.concatenate([ev[1:, :], zrow], axis=0)
            per_chan.append(jnp.concatenate([p0, ev, od, p3], axis=1))
        blocks.append(jnp.concatenate(per_chan, axis=1))
    return jnp.concatenate(blocks, axis=0)


def _feature_flat(img_ref, wa_ref, s1, s2, s3, s4, cfg):
    """feature_net (4 x [spectral conv k4 s2 p1 -> BN -> LeakyReLU]) followed by
    a per-batch flatten.  Each layer is exactly ONE bf16 MXU matmul."""
    B, C, H, wc = cfg["batch"], cfg["img_chans"], cfg["img_hw"], cfg["wc"]
    off, ln = cfg["wa_off"], cfg["wa_len"]

    x = _gather_k4s2_planar(img_ref, B, C, H, H)                    # [B*H/2, C*4*W]
    s1[...] = _lrelu(_dot_bf16(x, wa_ref[pl.ds(off[0], ln[0]), :]))

    x = _gather_k4s2_scan(s1, B, H // 2, wc)                        # [B*H/4, 4*wc]
    s2[...] = _lrelu(_dot_bf16(x, wa_ref[pl.ds(off[1], ln[1]), :]))

    x = _gather_k4s2_scan(s2, B, H // 4, wc)
    s3[...] = _lrelu(_dot_bf16(x, wa_ref[pl.ds(off[2], ln[2]), :]))

    x = _gather_k4s2_scan(s3, B, H // 8, wc)
    s4[...] = _lrelu(_dot_bf16(x, wa_ref[pl.ds(off[3], ln[3]), :]))

    # flatten the [B*fh, fh*c8] feature map to per-batch rows [B, fh*fh*c8]
    fh = cfg["feat_hw"]
    rows = []
    for b in range(B):
        rows.append(jnp.concatenate(
            [s4[pl.ds(b * fh + r, 1), :] for r in range(fh)], axis=1))
    return jnp.concatenate(rows, axis=0)                            # [B, flat_dim]


# ============================================================================
# Pallas kernels (single grid-less invocation; whole-array VMEM blocks)
# ============================================================================
def _disc_cond_kernel(img_ref, cond_ref, wa_ref, wb_ref, bias_ref, out_ref,
                      s1, s2, s3, s4, *, cfg):
    xf = _feature_flat(img_ref, wa_ref, s1, s2, s3, s4, cfg)        # [B, 512] f32

    nf, ncond = cfg["flat_dim"], cfg["cond_dim"]
    # cond[0] + align[0] fused: conv-as-matrix over the flattened 4x4 map; the
    # torch.cat((x, cond)) and the conv zero-padding validity are folded into wb.
    y = (_dot_bf16(xf, wb_ref[pl.ds(0, nf), :])
         + _dot_bf16(cond_ref[...], wb_ref[pl.ds(nf, ncond), :])
         + bias_ref[pl.ds(0, 1), :])                                # [B, 1024]
    half = cfg["mid_dim"] // 2
    yc = _lrelu(y[:, :half])            # cond branch (LeakyReLU)
    za = _silu(y[:, half:])             # align branch (SiLU)

    # cond[1] + align[1] + uncond fused -> one lane-dense packed [B, 128] output
    z = jnp.concatenate([yc, za, xf], axis=1)                       # [B, 3*512]
    logits = (_dot_bf16(z, wa_ref[pl.ds(cfg["wa_off"][4], cfg["wa_len"][4]), :])
              + bias_ref[pl.ds(1, 1), pl.ds(0, cfg["out_width"])])  # [B, 128]

    col = lax.broadcasted_iota(jnp.int32, logits.shape, 1)
    oc = cfg["out_chans"]
    sig_cols = (((col >= cfg["col_out"]) & (col < cfg["col_out"] + oc)) |
                ((col >= cfg["col_uncond"]) & (col < cfg["col_uncond"] + oc)))
    out_ref[...] = jnp.where(sig_cols, _sigmoid(logits), logits)


def _disc_uncond_kernel(img_ref, wa_ref, bias_ref, out_ref,
                        s1, s2, s3, s4, *, cfg):
    xf = _feature_flat(img_ref, wa_ref, s1, s2, s3, s4, cfg)
    off = cfg["wa_off"][4] + 2 * cfg["flat_dim"]    # uncond block of the head matrix
    logits = (_dot_bf16(xf, wa_ref[pl.ds(off, cfg["flat_dim"]), :])
              + bias_ref[pl.ds(1, 1), pl.ds(0, cfg["out_width"])])
    col = lax.broadcasted_iota(jnp.int32, logits.shape, 1)
    oc = cfg["out_chans"]
    sig_cols = (col >= cfg["col_uncond"]) & (col < cfg["col_uncond"] + oc)
    out_ref[...] = jnp.where(sig_cols, _sigmoid(logits), logits)


# ============================================================================
# Deterministic parameter construction (no checkpoint loading)
# ============================================================================
def init_discriminator_params(img_chans, in_chans, out_chans, cond_dim,
                              txt_emb_dim, curr_stage, batch, img_hw):
    assert curr_stage == 0, "aec_net (EncBlock/DecBlock) not defined in reference"
    rng = np.random.default_rng(0)
    B, C, H = batch, img_chans, img_hw
    c8 = in_chans * 8
    fh = H // 16                       # feature spatial size after 4 stride-2 convs
    wc = (H // 2) * in_chans           # common scanline row width of every feature map
    assert fh == 4, "heads (k4 s4) and attention bypass assume a 4x4 feature map"
    assert wc % 128 == 0
    bn_scale = float(1.0 / np.sqrt(1.0 + BN_EPS))   # eval-mode BN with init stats

    def conv_w(cout, cin, k, spectral=False):
        w = rng.normal(0.0, 0.02, size=(cout, cin, k, k)).astype(np.float32)
        if spectral:
            # TODO(synk): PyTorch spectral_norm uses power iteration; exact SVD here.
            w = w / np.linalg.svd(w.reshape(cout, -1), compute_uv=False)[0]
        return w

    def conv_b(cout):
        return rng.normal(0.0, 0.02, size=(cout,)).astype(np.float32)

    # ----- feature_net: K-stacked per-layer weight matrices (the row gather is
    #       done in-kernel; only column/padding/BN folding lives here).
    def m_stack_planar(w, w_in):                    # layer 1, planar (c, i, w) K order
        cout, cin, kh, kw = w.shape
        own = w_in // 2
        m = np.zeros((cin * kh * w_in, own * cout), np.float32)
        for c in range(cin):
            for i in range(kh):
                for ow in range(own):
                    for j in range(kw):
                        wi = 2 * ow + j - 1
                        if 0 <= wi < w_in:
                            m[(c * kh + i) * w_in + wi,
                              ow * cout:(ow + 1) * cout] += w[:, c, i, j]
        return m

    def m_stack_scan(w, w_in, scale):               # layers 2-4, scanline (i, w, c) order
        cout, cin, kh, kw = w.shape
        own = w_in // 2
        wf = (w * scale).astype(np.float32)
        m = np.zeros((kh * w_in * cin, own * cout), np.float32)
        for i in range(kh):
            for ow in range(own):
                for j in range(kw):
                    wi = 2 * ow + j - 1
                    if 0 <= wi < w_in:
                        m[i * w_in * cin + wi * cin:i * w_in * cin + (wi + 1) * cin,
                          ow * cout:(ow + 1) * cout] += wf[:, :, i, j].T
        return m

    feat_raw, m_blocks = [], []
    ci, co, h = C, in_chans, H
    for li in range(4):
        w = conv_w(co, ci, 4, spectral=True)
        scale = bn_scale if li > 0 else 1.0          # BN only for i > 0 (gamma=1, beta=0)
        m_blocks.append(m_stack_planar(w, h) if li == 0 else m_stack_scan(w, h, scale))
        feat_raw.append((w, scale))
        ci, co, h = co, co * 2, h // 2
    assert ci == c8 and h == fh
    assert all(m.shape[1] == wc for m in m_blocks)

    # ----- cond[0] + align[0]: CBR2d(c8+cond -> c8, k3 s1 p1, BN, act) as one
    #       per-batch flat matmul over the 4x4 map (concat + padding folded).
    flat_dim = fh * fh * c8
    w_c0, b_c0 = conv_w(c8, c8 + cond_dim, 3), conv_b(c8)
    w_a0, b_a0 = conv_w(c8, c8 + cond_dim, 3), conv_b(c8)

    def mid_flat(wb):
        cout = wb.shape[0]
        mx = np.zeros((flat_dim, fh * fh * cout), np.float32)
        ac = np.zeros((cond_dim, fh * fh * cout), np.float32)
        for oh in range(fh):
            for ow in range(fh):
                nb = (oh * fh + ow) * cout
                for i in range(3):
                    for j in range(3):
                        hh, ww = oh + i - 1, ow + j - 1
                        if 0 <= hh < fh and 0 <= ww < fh:
                            kb = (hh * fh + ww) * c8
                            mx[kb:kb + c8, nb:nb + cout] += wb[:, :c8, i, j].T
                            ac[:, nb:nb + cout] += wb[:, c8:, i, j].T
        return mx * bn_scale, ac * bn_scale

    mx_c, ac_c = mid_flat(w_c0)
    mx_a, ac_a = mid_flat(w_a0)
    m_mid = np.concatenate([mx_c, mx_a], axis=1)          # [flat_dim, 2*flat_dim]
    a_cond = np.concatenate([ac_c, ac_a], axis=1)         # [cond_dim, 2*flat_dim]
    b_mid = (np.concatenate([np.tile(b_c0, fh * fh),
                             np.tile(b_a0, fh * fh)]) * bn_scale).astype(np.float32)
    mid_dim = m_mid.shape[1]

    # ----- heads: cond[1] (k4 s4 p0), align[1] (k4 s4 p1 = CBR2d default),
    #       uncond (k4 s4 p0) fused into one matrix with a lane-dense packed
    #       output: col 0 = cond logit, cols 1..32 = align, col 33 = uncond.
    out_width = wc
    col_out, col_align, col_uncond = 0, out_chans, out_chans + txt_emb_dim
    assert col_uncond + out_chans <= out_width
    w_c1, b_c1 = conv_w(out_chans, c8, 4), conv_b(out_chans)
    w_a1, b_a1 = conv_w(txt_emb_dim, c8, 4), conv_b(txt_emb_dim)
    w_u, b_u = conv_w(out_chans, c8, 4), conv_b(out_chans)

    w_heads = np.zeros((3 * flat_dim, out_width), np.float32)
    for hh in range(fh):
        for ww in range(fh):
            kb = (hh * fh + ww) * c8
            w_heads[kb:kb + c8, col_out:col_out + out_chans] += w_c1[:, :, hh, ww].T
            w_heads[2 * flat_dim + kb:2 * flat_dim + kb + c8,
                    col_uncond:col_uncond + out_chans] += w_u[:, :, hh, ww].T
            if hh < fh - 1 and ww < fh - 1:     # k4 s4 p1 covers rows/cols 0..2 only
                w_heads[flat_dim + kb:flat_dim + kb + c8,
                        col_align:col_align + txt_emb_dim] += w_a1[:, :, hh + 1, ww + 1].T
    b_heads = np.zeros((out_width,), np.float32)
    b_heads[col_out:col_out + out_chans] = b_c1
    b_heads[col_align:col_align + txt_emb_dim] = b_a1
    b_heads[col_uncond:col_uncond + out_chans] = b_u

    # ----- pack constants: two bf16 arrays + one tiny f32 bias array.
    blocks = m_blocks + [w_heads]
    wa_off, wa_len, o = [], [], 0
    for blk in blocks:
        wa_off.append(o)
        wa_len.append(blk.shape[0])
        o += blk.shape[0]
    pack_a = np.concatenate(blocks, axis=0)               # [3840, 128]
    pack_b = np.concatenate([m_mid, a_cond], axis=0)      # [528, 1024]
    pack_bias = np.zeros((2, mid_dim), np.float32)
    pack_bias[0, :] = b_mid
    pack_bias[1, :out_width] = b_heads

    cfg = dict(batch=B, img_chans=C, img_hw=H, feat_hw=fh, wc=wc,
               flat_dim=flat_dim, mid_dim=mid_dim, cond_dim=cond_dim,
               txt_emb_dim=txt_emb_dim, out_chans=out_chans, out_width=out_width,
               col_out=col_out, col_align=col_align, col_uncond=col_uncond,
               wa_off=tuple(wa_off), wa_len=tuple(wa_len))

    params = {"cfg": cfg,
              "pack_a": jnp.asarray(pack_a).astype(jnp.bfloat16),
              "pack_b": jnp.asarray(pack_b).astype(jnp.bfloat16),
              "pack_bias": jnp.asarray(pack_bias)}
    raw = {"feat": feat_raw, "bn_scale": bn_scale,
           "w_c0": w_c0, "b_c0": b_c0, "w_a0": w_a0, "b_a0": b_a0,
           "w_c1": w_c1, "b_c1": b_c1, "w_a1": w_a1, "b_a1": b_a1,
           "w_u": w_u, "b_u": b_u}
    return params, raw


# ============================================================================
# Discriminator forward
# ============================================================================
def discriminator_forward(params, img, condition=None, return_uncond=False):
    cfg = params["cfg"]
    B, C, H = cfg["batch"], cfg["img_chans"], cfg["img_hw"]
    assert img.shape == (B, C, H, H)
    img_r = img.reshape(B * C * H, H).astype(jnp.float32)   # pure reshape, no transpose

    scratch = [pltpu.VMEM((B * (H // 2), cfg["wc"]), jnp.float32),
               pltpu.VMEM((B * (H // 4), cfg["wc"]), jnp.float32),
               pltpu.VMEM((B * (H // 8), cfg["wc"]), jnp.float32),
               pltpu.VMEM((B * cfg["feat_hw"], cfg["wc"]), jnp.float32)]
    oc = cfg["out_chans"]

    if condition is None:
        packed = pl.pallas_call(
            functools.partial(_disc_uncond_kernel, cfg=cfg),
            out_shape=jax.ShapeDtypeStruct((B, cfg["out_width"]), jnp.float32),
            scratch_shapes=scratch,
        )(img_r, params["pack_a"], params["pack_bias"])
        return packed[:, cfg["col_uncond"]:cfg["col_uncond"] + oc].reshape(-1), None

    cond = condition.astype(jnp.float32).reshape(B, cfg["cond_dim"])
    packed = pl.pallas_call(
        functools.partial(_disc_cond_kernel, cfg=cfg),
        out_shape=jax.ShapeDtypeStruct((B, cfg["out_width"]), jnp.float32),
        scratch_shapes=scratch,
    )(img_r, cond, params["pack_a"], params["pack_b"], params["pack_bias"])

    out = packed[:, cfg["col_out"]:cfg["col_out"] + oc].reshape(-1)
    align = packed[:, cfg["col_align"]:cfg["col_align"] + cfg["txt_emb_dim"]]
    # TODO(synk): PyTorch's align_out = x.squeeze() would also drop the batch dim
    #             when B == 1; we keep [B, txt_emb_dim].
    if return_uncond:
        uncond = packed[:, cfg["col_uncond"]:cfg["col_uncond"] + oc].reshape(-1)
        return out, align, uncond
    return out, align


# ============================================================================
# Pure-JAX/XLA reference (numerical sanity check only)
# ============================================================================
def reference_forward(raw, img, condition):
    def conv(x, w, b, s, p):
        y = lax.conv_general_dilated(
            x, jnp.asarray(w), (s, s), [(p, p), (p, p)],
            dimension_numbers=("NCHW", "OIHW", "NCHW"),
            precision=lax.Precision.HIGHEST)
        if b is not None:
            y = y + jnp.asarray(b).reshape(1, -1, 1, 1)
        return y

    lrelu = lambda v: jnp.where(v >= 0, v, LEAKY_SLOPE * v)
    sig = jax.nn.sigmoid

    x = img
    for w, sc in raw["feat"]:
        x = lrelu(conv(x, w, None, 2, 1) * sc)
    prev = x
    B, _, Hh, Ww = prev.shape
    c = jnp.broadcast_to(condition.reshape(B, -1, 1, 1),
                         (B, condition.shape[1], Hh, Ww))
    xc = jnp.concatenate([prev, c], axis=1)

    yc = lrelu(conv(xc, raw["w_c0"], raw["b_c0"], 1, 1) * raw["bn_scale"])
    out = sig(conv(yc, raw["w_c1"], raw["b_c1"], 4, 0).reshape(-1))

    za = conv(xc, raw["w_a0"], raw["b_a0"], 1, 1) * raw["bn_scale"]
    za = za * sig(za)
    align = conv(za, raw["w_a1"], raw["b_a1"], 4, 1).reshape(B, -1)

    unc = sig(conv(prev, raw["w_u"], raw["b_u"], 4, 0).reshape(-1))
    return out, align, unc


# ============================================================================
if __name__ == "__main__":
    B = 2
    IMG_CHANS, ND, OUT_CHANS = 3, 4, 1
    COND_DIM, TXT_EMB_DIM, CURR_STAGE = 16, 32, 0
    H = W = 64  # -> 4x4 feature map, matching the [8Nd, 4, 4] docstring

    params, raw = init_discriminator_params(IMG_CHANS, ND, OUT_CHANS, COND_DIM,
                                            TXT_EMB_DIM, CURR_STAGE, B, H)

    key = jax.random.PRNGKey(0)
    k_img, k_cond = jax.random.split(key)
    img = jax.random.normal(k_img, (B, IMG_CHANS, H, W), dtype=jnp.float32)
    condition = jax.random.normal(k_cond, (B, COND_DIM), dtype=jnp.float32)

    # Conditional path: ONE fused launch yields cond out, align features AND the
    # unconditional logit (shared feature_net).
    fwd_cond = jax.jit(
        lambda im, co: discriminator_forward(params, im, co, return_uncond=True))
    out, align_out, out_u_fused = jax.block_until_ready(fwd_cond(img, condition))

    # Unconditional path (condition=None), separate lean kernel.
    fwd_uncond = jax.jit(lambda im: discriminator_forward(params, im, None)[0])
    out_u = jax.block_until_ready(fwd_uncond(img))

    assert out.shape == (B,), out.shape
    assert align_out.shape == (B, TXT_EMB_DIM), align_out.shape
    assert out_u.shape == (B,), out_u.shape
    assert bool(jnp.all((out >= 0.0) & (out <= 1.0)))
    assert bool(jnp.all((out_u >= 0.0) & (out_u <= 1.0)))
    assert bool(jnp.all(jnp.isfinite(out))) and bool(jnp.all(jnp.isfinite(align_out)))

    # numerical sanity check vs a plain f32 XLA implementation of the same module
    r_out, r_align, r_unc = reference_forward(raw, img, condition)
    np.testing.assert_allclose(np.asarray(out), np.asarray(r_out),
                               rtol=5e-2, atol=5e-3)
    np.testing.assert_allclose(np.asarray(out_u), np.asarray(r_unc),
                               rtol=5e-2, atol=5e-3)
    np.testing.assert_allclose(np.asarray(out_u_fused), np.asarray(r_unc),
                               rtol=5e-2, atol=5e-3)
    np.testing.assert_allclose(np.asarray(align_out), np.asarray(r_align),
                               rtol=5e-2, atol=1e-2)

    print("KERNEL_OK")
</pallas_src>

<mosaic_0001>
module attributes {stable_mosaic.version = 11 : i64} {
  func.func @_disc_cond_kernel(%arg0: memref<384x64xf32, #tpu.memory_space<vmem>>, %arg1: memref<2x16xf32, #tpu.memory_space<vmem>>, %arg2: memref<3840x128xbf16, #tpu.memory_space<vmem>>, %arg3: memref<528x1024xbf16, #tpu.memory_space<vmem>>, %arg4: memref<2x1024xf32, #tpu.memory_space<vmem>>, %arg5: memref<2x128xf32, #tpu.memory_space<vmem>>, %arg6: memref<64x128xf32, #tpu.memory_space<vmem>>, %arg7: memref<32x128xf32, #tpu.memory_space<vmem>>, %arg8: memref<16x128xf32, #tpu.memory_space<vmem>>, %arg9: memref<8x128xf32, #tpu.memory_space<vmem>>) attributes {dimension_semantics = [], scalar_prefetch = 0 : i64, scratch_operands = 4 : i64, tpu.core_type = #tpu.core_type<tc>} {
    %cst = arith.constant 0.000000e+00 : f32
    %0 = vector.broadcast %cst : f32 to vector<1x64xf32>
    %c0 = arith.constant 0 : index
    %c0_0 = arith.constant 0 : index
    %1 = tpu.strided_load %arg0[%c0, %c0_0] {strides = array<i32: 2, 1>} : memref<384x64xf32, #tpu.memory_space<vmem>>, vector<32x64xf32>
    %c1 = arith.constant 1 : index
    %c0_1 = arith.constant 0 : index
    %2 = tpu.strided_load %arg0[%c1, %c0_1] {strides = array<i32: 2, 1>} : memref<384x64xf32, #tpu.memory_space<vmem>>, vector<32x64xf32>
    %3 = vector.extract_strided_slice %2 {offsets = [0, 0], sizes = [31, 64], strides = [1, 1]} : vector<32x64xf32> to vector<31x64xf32>
    %4 = tpu.concatenate %0, %3 in 0 : vector<1x64xf32>, vector<31x64xf32> -> vector<32x64xf32>
    %5 = vector.extract_strided_slice %1 {offsets = [1, 0], sizes = [31, 64], strides = [1, 1]} : vector<32x64xf32> to vector<31x64xf32>
    %6 = tpu.concatenate %5, %0 in 0 : vector<31x64xf32>, vector<1x64xf32> -> vector<32x64xf32>
    %7 = tpu.concatenate %4, %1, %2, %6 in 1 : vector<32x64xf32>, vector<32x64xf32>, vector<32x64xf32>, vector<32x64xf32> -> vector<32x256xf32>
    %c64 = arith.constant 64 : index
    %c0_2 = arith.constant 0 : index
    %8 = tpu.strided_load %arg0[%c64, %c0_2] {strides = array<i32: 2, 1>} : memref<384x64xf32, #tpu.memory_space<vmem>>, vector<32x64xf32>
    %c65 = arith.constant 65 : index
    %c0_3 = arith.constant 0 : index
    %9 = tpu.strided_load %arg0[%c65, %c0_3] {strides = array<i32: 2, 1>} : memref<384x64xf32, #tpu.memory_space<vmem>>, vector<32x64xf32>
    %10 = vector.extract_strided_slice %9 {offsets = [0, 0], sizes = [31, 64], strides = [1, 1]} : vector<32x64xf32> to vector<31x64xf32>
    %11 = tpu.concatenate %0, %10 in 0 : vector<1x64xf32>, vector<31x64xf32> -> vector<32x64xf32>
    %12 = vector.extract_strided_slice %8 {offsets = [1, 0], sizes = [31, 64], strides = [1, 1]} : vector<32x64xf32> to vector<31x64xf32>
    %13 = tpu.concatenate %12, %0 in 0 : vector<31x64xf32>, vector<1x64xf32> -> vector<32x64xf32>
    %14 = tpu.concatenate %11, %8, %9, %13 in 1 : vector<32x64xf32>, vector<32x64xf32>, vector<32x64xf32>, vector<32x64xf32> -> vector<32x256xf32>
    %c128 = arith.constant 128 : index
    %c0_4 = arith.constant 0 : index
    %15 = tpu.strided_load %arg0[%c128, %c0_4] {strides = array<i32: 2, 1>} : memref<384x64xf32, #tpu.memory_space<vmem>>, vector<32x64xf32>
    %c129 = arith.constant 129 : index
    %c0_5 = arith.constant 0 : index
    %16 = tpu.strided_load %arg0[%c129, %c0_5] {strides = array<i32: 2, 1>} : memref<384x64xf32, #tpu.memory_space<vmem>>, vector<32x64xf32>
    %17 = vector.extract_strided_slice %16 {offsets = [0, 0], sizes = [31, 64], strides = [1, 1]} : vector<32x64xf32> to vector<31x64xf32>
    %18 = tpu.concatenate %0, %17 in 0 : vector<1x64xf32>, vector<31x64xf32> -> vector<32x64xf32>
    %19 = vector.extract_strided_slice %15 {offsets = [1, 0], sizes = [31, 64], strides = [1, 1]} : vector<32x64xf32> to vector<31x64xf32>
    %20 = tpu.concatenate %19, %0 in 0 : vector<31x64xf32>, vector<1x64xf32> -> vector<32x64xf32>
    %21 = tpu.concatenate %18, %15, %16, %20 in 1 : vector<32x64xf32>, vector<32x64xf32>, vector<32x64xf32>, vector<32x64xf32> -> vector<32x256xf32>
    %22 = tpu.concatenate %7, %14, %21 in 1 : vector<32x256xf32>, vector<32x256xf32>, vector<32x256xf32> -> vector<32x768xf32>
    %c192 = arith.constant 192 : index
    %c0_6 = arith.constant 0 : index
    %23 = tpu.strided_load %arg0[%c192, %c0_6] {strides = array<i32: 2, 1>} : memref<384x64xf32, #tpu.memory_space<vmem>>, vector<32x64xf32>
    %c193 = arith.constant 193 : index
    %c0_7 = arith.constant 0 : index
    %24 = tpu.strided_load %arg0[%c193, %c0_7] {strides = array<i32: 2, 1>} : memref<384x64xf32, #tpu.memory_space<vmem>>, vector<32x64xf32>
    %25 = vector.extract_strided_slice %24 {offsets = [0, 0], sizes = [31, 64], strides = [1, 1]} : vector<32x64xf32> to vector<31x64xf32>
    %26 = tpu.concatenate %0, %25 in 0 : vector<1x64xf32>, vector<31x64xf32> -> vector<32x64xf32>
    %27 = vector.extract_strided_slice %23 {offsets = [1, 0], sizes = [31, 64], strides = [1, 1]} : vector<32x64xf32> to vector<31x64xf32>
    %28 = tpu.concatenate %27, %0 in 0 : vector<31x64xf32>, vector<1x64xf32> -> vector<32x64xf32>
    %29 = tpu.concatenate %26, %23, %24, %28 in 1 : vector<32x64xf32>, vector<32x64xf32>, vector<32x64xf32>, vector<32x64xf32> -> vector<32x256xf32>
    %c256 = arith.constant 256 : index
    %c0_8 = arith.constant 0 : index
    %30 = tpu.strided_load %arg0[%c256, %c0_8] {strides = array<i32: 2, 1>} : memref<384x64xf32, #tpu.memory_space<vmem>>, vector<32x64xf32>
    %c257 = arith.constant 257 : index
    %c0_9 = arith.constant 0 : index
    %31 = tpu.strided_load %arg0[%c257, %c0_9] {strides = array<i32: 2, 1>} : memref<384x64xf32, #tpu.memory_space<vmem>>, vector<32x64xf32>
    %32 = vector.extract_strided_slice %31 {offsets = [0, 0], sizes = [31, 64], strides = [1, 1]} : vector<32x64xf32> to vector<31x64xf32>
    %33 = tpu.concatenate %0, %32 in 0 : vector<1x64xf32>, vector<31x64xf32> -> vector<32x64xf32>
    %34 = vector.extract_strided_slice %30 {offsets = [1, 0], sizes = [31, 64], strides = [1, 1]} : vector<32x64xf32> to vector<31x64xf32>
    %35 = tpu.concatenate %34, %0 in 0 : vector<31x64xf32>, vector<1x64xf32> -> vector<32x64xf32>
    %36 = tpu.concatenate %33, %30, %31, %35 in 1 : vector<32x64xf32>, vector<32x64xf32>, vector<32x64xf32>, vector<32x64xf32> -> vector<32x256xf32>
    %c320 = arith.constant 320 : index
    %c0_10 = arith.constant 0 : index
    %37 = tpu.strided_load %arg0[%c320, %c0_10] {strides = array<i32: 2, 1>} : memref<384x64xf32, #tpu.memory_space<vmem>>, vector<32x64xf32>
    %c321 = arith.constant 321 : index
    %c0_11 = arith.constant 0 : index
    %38 = tpu.strided_load %arg0[%c321, %c0_11] {strides = array<i32: 2, 1>} : memref<384x64xf32, #tpu.memory_space<vmem>>, vector<32x64xf32>
    %39 = vector.extract_strided_slice %38 {offsets = [0, 0], sizes = [31, 64], strides = [1, 1]} : vector<32x64xf32> to vector<31x64xf32>
    %40 = tpu.concatenate %0, %39 in 0 : vector<1x64xf32>, vector<31x64xf32> -> vector<32x64xf32>
    %41 = vector.extract_strided_slice %37 {offsets = [1, 0], sizes = [31, 64], strides = [1, 1]} : vector<32x64xf32> to vector<31x64xf32>
    %42 = tpu.concatenate %41, %0 in 0 : vector<31x64xf32>, vector<1x64xf32> -> vector<32x64xf32>
    %43 = tpu.concatenate %40, %37, %38, %42 in 1 : vector<32x64xf32>, vector<32x64xf32>, vector<32x64xf32>, vector<32x64xf32> -> vector<32x256xf32>
    %44 = tpu.concatenate %29, %36, %43 in 1 : vector<32x256xf32>, vector<32x256xf32>, vector<32x256xf32> -> vector<32x768xf32>
    %45 = tpu.concatenate %22, %44 in 0 : vector<32x768xf32>, vector<32x768xf32> -> vector<64x768xf32>
    %c0_12 = arith.constant 0 : index
    %c0_13 = arith.constant 0 : index
    %46 = vector.load %arg2[%c0_12, %c0_13] : memref<3840x128xbf16, #tpu.memory_space<vmem>>, vector<768x128xbf16>
    %47 = arith.truncf %45 : vector<64x768xf32> to vector<64x768xbf16>
    %cst_14 = arith.constant dense<0.000000e+00> : vector<64x128xf32>
    %48 = tpu.matmul %47, %46, %cst_14 {dimension_numbers = #tpu.dot_dimension_numbers<[1], [0], [0], [1], [0, 0, 1, 1], [], []>} : vector<64x768xbf16>, vector<768x128xbf16>, vector<64x128xf32> -> vector<64x128xf32>
    %cst_15 = arith.constant 0.000000e+00 : f32
    %49 = vector.broadcast %cst_15 : f32 to vector<64x128xf32>
    %50 = arith.cmpf oge, %48, %49 : vector<64x128xf32>
    %cst_16 = arith.constant 2.000000e-01 : f32
    %51 = vector.broadcast %cst_16 : f32 to vector<64x128xf32>
    %52 = arith.mulf %51, %48 : vector<64x128xf32>
    %53 = arith.select %50, %48, %52 : vector<64x128xi1>, vector<64x128xf32>
    %c0_17 = arith.constant 0 : index
    %c0_18 = arith.constant 0 : index
    %54 = vector.load %arg6[%c0_17, %c0_18] : memref<64x128xf32, #tpu.memory_space<vmem>>, vector<64x128xf32>
    tpu.vector_store %arg6[%c0_17, %c0_18], %53 {strides = array<i32>} : memref<64x128xf32, #tpu.memory_space<vmem>>, vector<64x128xf32>,
    %cst_19 = arith.constant 0.000000e+00 : f32
    %55 = vector.broadcast %cst_19 : f32 to vector<1x128xf32>
    %c0_20 = arith.constant 0 : index
    %c0_21 = arith.constant 0 : index
    %56 = tpu.strided_load %arg6[%c0_20, %c0_21] {strides = array<i32: 2, 1>} : memref<64x128xf32, #tpu.memory_space<vmem>>, vector<16x128xf32>
    %c1_22 = arith.constant 1 : index
    %c0_23 = arith.constant 0 : index
    %57 = tpu.strided_load %arg6[%c1_22, %c0_23] {strides = array<i32: 2, 1>} : memref<64x128xf32, #tpu.memory_space<vmem>>, vector<16x128xf32>
    %58 = vector.extract_strided_slice %57 {offsets = [0, 0], sizes = [15, 128], strides = [1, 1]} : vector<16x128xf32> to vector<15x128xf32>
    %59 = tpu.concatenate %55, %58 in 0 : vector<1x128xf32>, vector<15x128xf32> -> vector<16x128xf32>
    %60 = vector.extract_strided_slice %56 {offsets = [1, 0], sizes = [15, 128], strides = [1, 1]} : vector<16x128xf32> to vector<15x128xf32>
    %61 = tpu.concatenate %60, %55 in 0 : vector<15x128xf32>, vector<1x128xf32> -> vector<16x128xf32>
    %62 = tpu.concatenate %59, %56, %57, %61 in 1 : vector<16x128xf32>, vector<16x128xf32>, vector<16x128xf32>, vector<16x128xf32> -> vector<16x512xf32>
    %c32 = arith.constant 32 : index
    %c0_24 = arith.constant 0 : index
    %63 = tpu.strided_load %arg6[%c32, %c0_24] {strides = array<i32: 2, 1>} : memref<64x128xf32, #tpu.memory_space<vmem>>, vector<16x128xf32>
    %c33 = arith.constant 33 : index
    %c0_25 = arith.constant 0 : index
    %64 = tpu.strided_load %arg6[%c33, %c0_25] {strides = array<i32: 2, 1>} : memref<64x128xf32, #tpu.memory_space<vmem>>, vector<16x128xf32>
    %65 = vector.extract_strided_slice %64 {offsets = [0, 0], sizes = [15, 128], strides = [1, 1]} : vector<16x128xf32> to vector<15x128xf32>
    %66 = tpu.concatenate %55, %65 in 0 : vector<1x128xf32>, vector<15x128xf32> -> vector<16x128xf32>
    %67 = vector.extract_strided_slice %63 {offsets = [1, 0], sizes = [15, 128], strides = [1, 1]} : vector<16x128xf32> to vector<15x128xf32>
    %68 = tpu.concatenate %67, %55 in 0 : vector<15x128xf32>, vector<1x128xf32> -> vector<16x128xf32>
    %69 = tpu.concatenate %66, %63, %64, %68 in 1 : vector<16x128xf32>, vector<16x128xf32>, vector<16x128xf32>, vector<16x128xf32> -> vector<16x512xf32>
    %70 = tpu.concatenate %62, %69 in 0 : vector<16x512xf32>, vector<16x512xf32> -> vector<32x512xf32>
    %c768 = arith.constant 768 : index
    %c0_26 = arith.constant 0 : index
    %71 = vector.load %arg2[%c768, %c0_26] : memref<3840x128xbf16, #tpu.memory_space<vmem>>, vector<512x128xbf16>
    %72 = arith.truncf %70 : vector<32x512xf32> to vector<32x512xbf16>
    %cst_27 = arith.constant dense<0.000000e+00> : vector<32x128xf32>
    %73 = tpu.matmul %72, %71, %cst_27 {dimension_numbers = #tpu.dot_dimension_numbers<[1], [0], [0], [1], [0, 0, 1, 1], [], []>} : vector<32x512xbf16>, vector<512x128xbf16>, vector<32x128xf32> -> vector<32x128xf32>
    %cst_28 = arith.constant 0.000000e+00 : f32
    %74 = vector.broadcast %cst_28 : f32 to vector<32x128xf32>
    %75 = arith.cmpf oge, %73, %74 : vector<32x128xf32>
    %cst_29 = arith.constant 2.000000e-01 : f32
    %76 = vector.broadcast %cst_29 : f32 to vector<32x128xf32>
    %77 = arith.mulf %76, %73 : vector<32x128xf32>
    %78 = arith.select %75, %73, %77 : vector<32x128xi1>, vector<32x128xf32>
    %c0_30 = arith.constant 0 : index
    %c0_31 = arith.constant 0 : index
    %79 = vector.load %arg7[%c0_30, %c0_31] : memref<32x128xf32, #tpu.memory_space<vmem>>, vector<32x128xf32>
    tpu.vector_store %arg7[%c0_30, %c0_31], %78 {strides = array<i32>} : memref<32x128xf32, #tpu.memory_space<vmem>>, vector<32x128xf32>,
    %cst_32 = arith.constant 0.000000e+00 : f32
    %80 = vector.broadcast %cst_32 : f32 to vector<1x128xf32>
    %c0_33 = arith.constant 0 : index
    %c0_34 = arith.constant 0 : index
    %81 = tpu.strided_load %arg7[%c0_33, %c0_34] {strides = array<i32: 2, 1>} : memref<32x128xf32, #tpu.memory_space<vmem>>, vector<8x128xf32>
    %c1_35 = arith.constant 1 : index
    %c0_36 = arith.constant 0 : index
    %82 = tpu.strided_load %arg7[%c1_35, %c0_36] {strides = array<i32: 2, 1>} : memref<32x128xf32, #tpu.memory_space<vmem>>, vector<8x128xf32>
    %83 = vector.extract_strided_slice %82 {offsets = [0, 0], sizes = [7, 128], strides = [1, 1]} : vector<8x128xf32> to vector<7x128xf32>
    %84 = tpu.concatenate %80, %83 in 0 : vector<1x128xf32>, vector<7x128xf32> -> vector<8x128xf32>
    %85 = vector.extract_strided_slice %81 {offsets = [1, 0], sizes = [7, 128], strides = [1, 1]} : vector<8x128xf32> to vector<7x128xf32>
    %86 = tpu.concatenate %85, %80 in 0 : vector<7x128xf32>, vector<1x128xf32> -> vector<8x128xf32>
    %87 = tpu.concatenate %84, %81, %82, %86 in 1 : vector<8x128xf32>, vector<8x128xf32>, vector<8x128xf32>, vector<8x128xf32> -> vector<8x512xf32>
    %c16 = arith.constant 16 : index
    %c0_37 = arith.constant 0 : index
    %88 = tpu.strided_load %arg7[%c16, %c0_37] {strides = array<i32: 2, 1>} : memref<32x128xf32, #tpu.memory_space<vmem>>, vector<8x128xf32>
    %c17 = arith.constant 17 : index
    %c0_38 = arith.constant 0 : index
    %89 = tpu.strided_load %arg7[%c17, %c0_38] {strides = array<i32: 2, 1>} : memref<32x128xf32, #tpu.memory_space<vmem>>, vector<8x128xf32>
    %90 = vector.extract_strided_slice %89 {offsets = [0, 0], sizes = [7, 128], strides = [1, 1]} : vector<8x128xf32> to vector<7x128xf32>
    %91 = tpu.concatenate %80, %90 in 0 : vector<1x128xf32>, vector<7x128xf32> -> vector<8x128xf32>
    %92 = vector.extract_strided_slice %88 {offsets = [1, 0], sizes = [7, 128], strides = [1, 1]} : vector<8x128xf32> to vector<7x128xf32>
    %93 = tpu.concatenate %92, %80 in 0 : vector<7x128xf32>, vector<1x128xf32> -> vector<8x128xf32>
    %94 = tpu.concatenate %91, %88, %89, %93 in 1 : vector<8x128xf32>, vector<8x128xf32>, vector<8x128xf32>, vector<8x128xf32> -> vector<8x512xf32>
    %95 = tpu.concatenate %87, %94 in 0 : vector<8x512xf32>, vector<8x512xf32> -> vector<16x512xf32>
    %c1280 = arith.constant 1280 : index
    %c0_39 = arith.constant 0 : index
    %96 = vector.load %arg2[%c1280, %c0_39] : memref<3840x128xbf16, #tpu.memory_space<vmem>>, vector<512x128xbf16>
    %97 = arith.truncf %95 : vector<16x512xf32> to vector<16x512xbf16>
    %cst_40 = arith.constant dense<0.000000e+00> : vector<16x128xf32>
    %98 = tpu.matmul %97, %96, %cst_40 {dimension_numbers = #tpu.dot_dimension_numbers<[1], [0], [0], [1], [0, 0, 1, 1], [], []>} : vector<16x512xbf16>, vector<512x128xbf16>, vector<16x128xf32> -> vector<16x128xf32>
    %cst_41 = arith.constant 0.000000e+00 : f32
    %99 = vector.broadcast %cst_41 : f32 to vector<16x128xf32>
    %100 = arith.cmpf oge, %98, %99 : vector<16x128xf32>
    %cst_42 = arith.constant 2.000000e-01 : f32
    %101 = vector.broadcast %cst_42 : f32 to vector<16x128xf32>
    %102 = arith.mulf %101, %98 : vector<16x128xf32>
    %103 = arith.select %100, %98, %102 : vector<16x128xi1>, vector<16x128xf32>
    %c0_43 = arith.constant 0 : index
    %c0_44 = arith.constant 0 : index
    %104 = vector.load %arg8[%c0_43, %c0_44] : memref<16x128xf32, #tpu.memory_space<vmem>>, vector<16x128xf32>
    tpu.vector_store %arg8[%c0_43, %c0_44], %103 {strides = array<i32>} : memref<16x128xf32, #tpu.memory_space<vmem>>, vector<16x128xf32>,
    %cst_45 = arith.constant 0.000000e+00 : f32
    %105 = vector.broadcast %cst_45 : f32 to vector<1x128xf32>
    %c0_46 = arith.constant 0 : index
    %c0_47 = arith.constant 0 : index
    %106 = tpu.strided_load %arg8[%c0_46, %c0_47] {strides = array<i32: 2, 1>} : memref<16x128xf32, #tpu.memory_space<vmem>>, vector<4x128xf32>
    %c1_48 = arith.constant 1 : index
    %c0_49 = arith.constant 0 : index
    %107 = tpu.strided_load %arg8[%c1_48, %c0_49] {strides = array<i32: 2, 1>} : memref<16x128xf32, #tpu.memory_space<vmem>>, vector<4x128xf32>
    %108 = vector.extract_strided_slice %107 {offsets = [0, 0], sizes = [3, 128], strides = [1, 1]} : vector<4x128xf32> to vector<3x128xf32>
    %109 = tpu.concatenate %105, %108 in 0 : vector<1x128xf32>, vector<3x128xf32> -> vector<4x128xf32>
    %110 = vector.extract_strided_slice %106 {offsets = [1, 0], sizes = [3, 128], strides = [1, 1]} : vector<4x128xf32> to vector<3x128xf32>
    %111 = tpu.concatenate %110, %105 in 0 : vector<3x128xf32>, vector<1x128xf32> -> vector<4x128xf32>
    %112 = tpu.concatenate %109, %106, %107, %111 in 1 : vector<4x128xf32>, vector<4x128xf32>, vector<4x128xf32>, vector<4x128xf32> -> vector<4x512xf32>
    %c8 = arith.constant 8 : index
    %c0_50 = arith.constant 0 : index
    %113 = tpu.strided_load %arg8[%c8, %c0_50] {strides = array<i32: 2, 1>} : memref<16x128xf32, #tpu.memory_space<vmem>>, vector<4x128xf32>
    %c9 = arith.constant 9 : index
    %c0_51 = arith.constant 0 : index
    %114 = tpu.strided_load %arg8[%c9, %c0_51] {strides = array<i32: 2, 1>} : memref<16x128xf32, #tpu.memory_space<vmem>>, vector<4x128xf32>
    %115 = vector.extract_strided_slice %114 {offsets = [0, 0], sizes = [3, 128], strides = [1, 1]} : vector<4x128xf32> to vector<3x128xf32>
    %116 = tpu.concatenate %105, %115 in 0 : vector<1x128xf32>, vector<3x128xf32> -> vector<4x128xf32>
    %117 = vector.extract_strided_slice %113 {offsets = [1, 0], sizes = [3, 128], strides = [1, 1]} : vector<4x128xf32> to vector<3x128xf32>
    %118 = tpu.concatenate %117, %105 in 0 : vector<3x128xf32>, vector<1x128xf32> -> vector<4x128xf32>
    %119 = tpu.concatenate %116, %113, %114, %118 in 1 : vector<4x128xf32>, vector<4x128xf32>, vector<4x128xf32>, vector<4x128xf32> -> vector<4x512xf32>
    %120 = tpu.concatenate %112, %119 in 0 : vector<4x512xf32>, vector<4x512xf32> -> vector<8x512xf32>
    %c1792 = arith.constant 1792 : index
    %c0_52 = arith.constant 0 : index
    %121 = vector.load %arg2[%c1792, %c0_52] : memref<3840x128xbf16, #tpu.memory_space<vmem>>, vector<512x128xbf16>
    %122 = arith.truncf %120 : vector<8x512xf32> to vector<8x512xbf16>
    %cst_53 = arith.constant dense<0.000000e+00> : vector<8x128xf32>
    %123 = tpu.matmul %122, %121, %cst_53 {dimension_numbers = #tpu.dot_dimension_numbers<[1], [0], [0], [1], [0, 0, 1, 1], [], []>} : vector<8x512xbf16>, vector<512x128xbf16>, vector<8x128xf32> -> vector<8x128xf32>
    %cst_54 = arith.constant 0.000000e+00 : f32
    %124 = vector.broadcast %cst_54 : f32 to vector<8x128xf32>
    %125 = arith.cmpf oge, %123, %124 : vector<8x128xf32>
    %cst_55 = arith.constant 2.000000e-01 : f32
    %126 = vector.broadcast %cst_55 : f32 to vector<8x128xf32>
    %127 = arith.mulf %126, %123 : vector<8x128xf32>
    %128 = arith.select %125, %123, %127 : vector<8x128xi1>, vector<8x128xf32>
    %c0_56 = arith.constant 0 : index
    %c0_57 = arith.constant 0 : index
    %129 = vector.load %arg9[%c0_56, %c0_57] : memref<8x128xf32, #tpu.memory_space<vmem>>, vector<8x128xf32>
    tpu.vector_store %arg9[%c0_56, %c0_57], %128 {strides = array<i32>} : memref<8x128xf32, #tpu.memory_space<vmem>>, vector<8x128xf32>,
    %c0_58 = arith.constant 0 : index
    %c0_59 = arith.constant 0 : index
    %130 = vector.load %arg9[%c0_58, %c0_59] : memref<8x128xf32, #tpu.memory_space<vmem>>, vector<1x128xf32>
    %c1_60 = arith.constant 1 : index
    %c0_61 = arith.constant 0 : index
    %131 = vector.load %arg9[%c1_60, %c0_61] : memref<8x128xf32, #tpu.memory_space<vmem>>, vector<1x128xf32>
    %c2 = arith.constant 2 : index
    %c0_62 = arith.constant 0 : index
    %132 = vector.load %arg9[%c2, %c0_62] : memref<8x128xf32, #tpu.memory_space<vmem>>, vector<1x128xf32>
    %c3 = arith.constant 3 : index
    %c0_63 = arith.constant 0 : index
    %133 = vector.load %arg9[%c3, %c0_63] : memref<8x128xf32, #tpu.memory_space<vmem>>, vector<1x128xf32>
    %134 = tpu.concatenate %130, %131, %132, %133 in 1 : vector<1x128xf32>, vector<1x128xf32>, vector<1x128xf32>, vector<1x128xf32> -> vector<1x512xf32>
    %c4 = arith.constant 4 : index
    %c0_64 = arith.constant 0 : index
    %135 = vector.load %arg9[%c4, %c0_64] : memref<8x128xf32, #tpu.memory_space<vmem>>, vector<1x128xf32>
    %c5 = arith.constant 5 : index
    %c0_65 = arith.constant 0 : index
    %136 = vector.load %arg9[%c5, %c0_65] : memref<8x128xf32, #tpu.memory_space<vmem>>, vector<1x128xf32>
    %c6 = arith.constant 6 : index
    %c0_66 = arith.constant 0 : index
    %137 = vector.load %arg9[%c6, %c0_66] : memref<8x128xf32, #tpu.memory_space<vmem>>, vector<1x128xf32>
    %c7 = arith.constant 7 : index
    %c0_67 = arith.constant 0 : index
    %138 = vector.load %arg9[%c7, %c0_67] : memref<8x128xf32, #tpu.memory_space<vmem>>, vector<1x128xf32>
    %139 = tpu.concatenate %135, %136, %137, %138 in 1 : vector<1x128xf32>, vector<1x128xf32>, vector<1x128xf32>, vector<1x128xf32> -> vector<1x512xf32>
    %140 = tpu.concatenate %134, %139 in 0 : vector<1x512xf32>, vector<1x512xf32> -> vector<2x512xf32>
    %c0_68 = arith.constant 0 : index
    %c0_69 = arith.constant 0 : index
    %141 = vector.load %arg3[%c0_68, %c0_69] : memref<528x1024xbf16, #tpu.memory_space<vmem>>, vector<512x1024xbf16>
    %142 = arith.truncf %140 : vector<2x512xf32> to vector<2x512xbf16>
    %cst_70 = arith.constant dense<0.000000e+00> : vector<2x1024xf32>
    %143 = tpu.matmul %142, %141, %cst_70 {dimension_numbers = #tpu.dot_dimension_numbers<[1], [0], [0], [1], [0, 0, 1, 1], [], []>} : vector<2x512xbf16>, vector<512x1024xbf16>, vector<2x1024xf32> -> vector<2x1024xf32>
    %c0_71 = arith.constant 0 : index
    %c0_72 = arith.constant 0 : index
    %144 = vector.load %arg1[%c0_71, %c0_72] : memref<2x16xf32, #tpu.memory_space<vmem>>, vector<2x16xf32>
    %c512 = arith.constant 512 : index
    %c0_73 = arith.constant 0 : index
    %145 = vector.load %arg3[%c512, %c0_73] : memref<528x1024xbf16, #tpu.memory_space<vmem>>, vector<16x1024xbf16>
    %146 = arith.truncf %144 : vector<2x16xf32> to vector<2x16xbf16>
    %cst_74 = arith.constant dense<0.000000e+00> : vector<2x1024xf32>
    %147 = tpu.matmul %146, %145, %cst_74 {dimension_numbers = #tpu.dot_dimension_numbers<[1], [0], [0], [1], [0, 0, 1, 1], [], []>} : vector<2x16xbf16>, vector<16x1024xbf16>, vector<2x1024xf32> -> vector<2x1024xf32>
    %148 = arith.addf %143, %147 : vector<2x1024xf32>
    %c0_75 = arith.constant 0 : index
    %c0_76 = arith.constant 0 : index
    %149 = vector.load %arg4[%c0_75, %c0_76] : memref<2x1024xf32, #tpu.memory_space<vmem>>, vector<1x1024xf32>
    %150 = vector.broadcast %149 : vector<1x1024xf32> to vector<2x1024xf32>
    %151 = arith.addf %148, %150 : vector<2x1024xf32>
    %152 = vector.extract_strided_slice %151 {offsets = [0, 0], sizes = [2, 512], strides = [1, 1]} : vector<2x1024xf32> to vector<2x512xf32>
    %cst_77 = arith.constant 0.000000e+00 : f32
    %153 = vector.broadcast %cst_77 : f32 to vector<2x512xf32>
    %154 = arith.cmpf oge, %152, %153 : vector<2x512xf32>
    %cst_78 = arith.constant 2.000000e-01 : f32
    %155 = vector.broadcast %cst_78 : f32 to vector<2x512xf32>
    %156 = arith.mulf %155, %152 : vector<2x512xf32>
    %157 = arith.select %154, %152, %156 : vector<2x512xi1>, vector<2x512xf32>
    %158 = vector.extract_strided_slice %151 {offsets = [0, 512], sizes = [2, 512], strides = [1, 1]} : vector<2x1024xf32> to vector<2x512xf32>
    %159 = math.absf %158 : vector<2x512xf32>
    %cst_79 = arith.constant 0.000000e+00 : f32
    %160 = vector.broadcast %cst_79 : f32 to vector<2x512xf32>
    %161 = arith.subf %160, %159 : vector<2x512xf32>
    %162 = math.exp %161 : vector<2x512xf32>
    %cst_80 = arith.constant 0.000000e+00 : f32
    %163 = vector.broadcast %cst_80 : f32 to vector<2x512xf32>
    %164 = arith.cmpf oge, %158, %163 : vector<2x512xf32>
    %cst_81 = arith.constant 1.000000e+00 : f32
    %165 = vector.broadcast %cst_81 : f32 to vector<2x512xf32>
    %166 = arith.addf %165, %162 : vector<2x512xf32>
    %cst_82 = arith.constant 1.000000e+00 : f32
    %167 = vector.broadcast %cst_82 : f32 to vector<2x512xf32>
    %168 = arith.divf %167, %166 : vector<2x512xf32>
    %cst_83 = arith.constant 1.000000e+00 : f32
    %169 = vector.broadcast %cst_83 : f32 to vector<2x512xf32>
    %170 = arith.addf %169, %162 : vector<2x512xf32>
    %171 = arith.divf %162, %170 : vector<2x512xf32>
    %172 = arith.select %164, %168, %171 : vector<2x512xi1>, vector<2x512xf32>
    %173 = arith.mulf %158, %172 : vector<2x512xf32>
    %174 = tpu.concatenate %157, %173, %140 in 1 : vector<2x512xf32>, vector<2x512xf32>, vector<2x512xf32> -> vector<2x1536xf32>
    %c2304 = arith.constant 2304 : index
    %c0_84 = arith.constant 0 : index
    %175 = vector.load %arg2[%c2304, %c0_84] : memref<3840x128xbf16, #tpu.memory_space<vmem>>, vector<1536x128xbf16>
    %176 = arith.truncf %174 : vector<2x1536xf32> to vector<2x1536xbf16>
    %cst_85 = arith.constant dense<0.000000e+00> : vector<2x128xf32>
    %177 = tpu.matmul %176, %175, %cst_85 {dimension_numbers = #tpu.dot_dimension_numbers<[1], [0], [0], [1], [0, 0, 1, 1], [], []>} : vector<2x1536xbf16>, vector<1536x128xbf16>, vector<2x128xf32> -> vector<2x128xf32>
    %c1_86 = arith.constant 1 : index
    %c0_87 = arith.constant 0 : index
    %178 = vector.load %arg4[%c1_86, %c0_87] : memref<2x1024xf32, #tpu.memory_space<vmem>>, vector<1x128xf32>
    %179 = vector.broadcast %178 : vector<1x128xf32> to vector<2x128xf32>
    %180 = arith.addf %177, %179 : vector<2x128xf32>
    %181 = tpu.iota {dimensions = array<i32: 1>} : vector<2x128xi32>
    %c0_i32 = arith.constant 0 : i32
    %182 = vector.broadcast %c0_i32 : i32 to vector<2x128xi32>
    %183 = arith.cmpi sge, %181, %182 : vector<2x128xi32>
    %c1_i32 = arith.constant 1 : i32
    %184 = vector.broadcast %c1_i32 : i32 to vector<2x128xi32>
    %185 = arith.cmpi slt, %181, %184 : vector<2x128xi32>
    %186 = arith.andi %183, %185 : vector<2x128xi1>
    %c33_i32 = arith.constant 33 : i32
    %187 = vector.broadcast %c33_i32 : i32 to vector<2x128xi32>
    %188 = arith.cmpi sge, %181, %187 : vector<2x128xi32>
    %c34_i32 = arith.constant 34 : i32
    %189 = vector.broadcast %c34_i32 : i32 to vector<2x128xi32>
    %190 = arith.cmpi slt, %181, %189 : vector<2x128xi32>
    %191 = arith.andi %188, %190 : vector<2x128xi1>
    %192 = arith.ori %186, %191 : vector<2x128xi1>
    %193 = math.absf %180 : vector<2x128xf32>
    %cst_88 = arith.constant 0.000000e+00 : f32
    %194 = vector.broadcast %cst_88 : f32 to vector<2x128xf32>
    %195 = arith.subf %194, %193 : vector<2x128xf32>
    %196 = math.exp %195 : vector<2x128xf32>
    %cst_89 = arith.constant 0.000000e+00 : f32
    %197 = vector.broadcast %cst_89 : f32 to vector<2x128xf32>
    %198 = arith.cmpf oge, %180, %197 : vector<2x128xf32>
    %cst_90 = arith.constant 1.000000e+00 : f32
    %199 = vector.broadcast %cst_90 : f32 to vector<2x128xf32>
    %200 = arith.addf %199, %196 : vector<2x128xf32>
    %cst_91 = arith.constant 1.000000e+00 : f32
    %201 = vector.broadcast %cst_91 : f32 to vector<2x128xf32>
    %202 = arith.divf %201, %200 : vector<2x128xf32>
    %cst_92 = arith.constant 1.000000e+00 : f32
    %203 = vector.broadcast %cst_92 : f32 to vector<2x128xf32>
    %204 = arith.addf %203, %196 : vector<2x128xf32>
    %205 = arith.divf %196, %204 : vector<2x128xf32>
    %206 = arith.select %198, %202, %205 : vector<2x128xi1>, vector<2x128xf32>
    %207 = arith.select %192, %206, %180 : vector<2x128xi1>, vector<2x128xf32>
    %c0_93 = arith.constant 0 : index
    %c0_94 = arith.constant 0 : index
    %208 = vector.load %arg5[%c0_93, %c0_94] : memref<2x128xf32, #tpu.memory_space<vmem>>, vector<2x128xf32>
    tpu.vector_store %arg5[%c0_93, %c0_94], %207 {strides = array<i32>} : memref<2x128xf32, #tpu.memory_space<vmem>>, vector<2x128xf32>,
    return
  }
}

</mosaic_0001>

<bundles_post_ra>
// kernel: _lambda_.1
= control target key start
LH: loop header
LB: loop body
LE: loop exit
PB: predicated region body
PF: predicated region fallthrough
CT: control target
= control target key end

     0   :  { %vm57_vm0 = vcmask 1046528   ;;  %s6927_s15 = smov 64   ;;  %vm40_vm1 = vcmask 1040384   ;;  %vm92_vm2 = vcmask 523264   ;;  %vm6928_vm10 = vmmov 1   ;;  %s9165_s0 = inlined_call_operand.vmem [shape: f32[384,64], index: 0, kind: input, shape index: {}]   ;;  %s9166_s2 = inlined_call_operand.vmem [shape: bf16[3840,128], index: 2, kind: input, shape index: {}]   ;;  %s9167_s3 = inlined_call_operand.vmem [shape: bf16[528,1024], index: 3, kind: input, shape index: {}]   ;;  %s9168_s1 = inlined_call_operand.vmem [shape: f32[2,16], index: 1, kind: input, shape index: {}]   ;;  %s9169_s4 = inlined_call_operand.vmem [shape: f32[2,1024], index: 4, kind: input, shape index: {}]   ;;  %s9170_s5 = inlined_call_operand.vmem [shape: f32[2,128], index: 5, kind: output, shape index: {}]  }
   0x1   :  { %v21_v0 = vld [vmem:[%s9165_s0] ss:$2 sm:$0xff]  ;;  %v5569_v1 = vld [vmem:[%s9165_s0 + $0x10] ss:$2 sm:$0xff]  ;;  %vm7725_vm9 = vmneg %vm40_vm1 }
   0x2   :  { %v5570_v2 = vld [vmem:[%s9165_s0 + $0x20] ss:$2 sm:$0xff]  ;;  %v58_v3 = vrot.slane %v21_v0, 1  ;;  %v59_v4 = vrot.slane %v5569_v1, 1  ;;  %v5571_v6 = vld [vmem:[%s9165_s0 + $0x30] ss:$2 sm:$0xff]  ;;  %v6551_v24 = vpack.i.bf16 %v5569_v1, %v21_v0  ;;  %vm7732_vm11 = vmpackc.low %vm6928_vm10, %vm7725_vm9 }
   0x3   :  { %v61_v5 = vrot.slane %v5570_v2, 1  ;;  %v6666_v7 = vld [vmem:[%s9166_s2 + $0x40] sm:$0xff]   ;;  %v63_v8 = vrot.slane %v5571_v6, 1  ;;  %v5593_v10 = vld [vmem:[%s9165_s0 + $0xd0] ss:$2 sm:$0xff]  ;;  %v6668_v23 = vld [vmem:[%s9166_s2 + $0x48] sm:$0xff]   ;;  %v6561_v25 = vpack.i.bf16 %v5571_v6, %v5570_v2 }
   0x4   :  { %v5592_v9 = vld [vmem:[%s9165_s0 + $0xc0] ss:$2 sm:$0xff]  ;;  %v60_v12 = vsel %vm57_vm0, %v58_v3, %v59_v4  ;;  %v294_v16 = vrot.slane %v5593_v10, 1  ;;  %6147 = vmatprep.subr.bf16.mxu0 %v6666_v7  ;;  %v5595_v21 = vld [vmem:[%s9165_s0 + $0xf0] ss:$2 sm:$0xff]  ;;  %vm7738_vm13 = vmpackc.low %vm57_vm0, %vm6928_vm10  ;;  %vm2641_vm10 = vcmask 130048  }
   0x5   :  { %v6667_v11 = vld [vmem:[%s9166_s2] sm:$0xff]   ;;  %v62_v13 = vsel %vm57_vm0, %v59_v4, %v61_v5  ;;  %v293_v15 = vrot.slane %v5592_v9, 1  ;;  %v64_v18 = vsel %vm57_vm0, %v61_v5, %v63_v8  ;;  %v66_v19 = vsel %vm57_vm0, %v63_v8, 0.0  ;;  %v5577_v30 = vld [vmem:[%s9165_s0 + $0x50] ss:$2 sm:$0xff]  ;;  %v6669_v32 = vld [vmem:[%s9166_s2 + $0x8] sm:$0xff]  }
   0x6   :  { %v6989_v14 = vld [vmem:[%s9165_s0 + $0xe0] ss:$2 sm:$0xff]  ;;  %v6546_v17 = vpack.i.bf16 %v62_v13, %v60_v12  ;;  %6148 = vmatpush3.bf16.msra.mxu0 %v6667_v11  ;;  %v6556_v22 = vpack.i.bf16 %v66_v19, %v64_v18  ;;  %v298_v28 = vrot.slane %v5595_v21, 1  ;;  %v6571_v34 = vpack.i.bf16 %v5593_v10, %v5592_v9  ;;  %v7027_v37 = vld [vmem:[%s9165_s0 + $0x90] ss:$2 sm:$0xff] }
   0x7   :  { %v296_v20 = vrot.slane %v6989_v14, 1  ;;  %v295_v26 = vsel %vm57_vm0, %v293_v15, %v294_v16  ;;  %v5576_v29 = vld [vmem:[%s9165_s0 + $0x40] ss:$2 sm:$0xff]  ;;  %6149 = vmatprep.subr.bf16.mxu0 %v6668_v23  ;;  %v138_v40 = vrot.slane %v5577_v30, 1  ;;  %v6670_v43 = vld [vmem:[%s9166_s2 + $0x50] sm:$0xff]   ;;  %v6672_v46 = vld [vmem:[%s9166_s2 + $0x58] sm:$0xff]   ;;  %v6581_v51 = vpack.i.bf16 %v5595_v21, %v6989_v14 }
   0x8   :  { %6547 = vrot.lane.b32.xlu0 %v6546_v17, %s6927_s15  ;;  %6557 = vrot.lane.b32.xlu1 %v6556_v22, %s6927_s15  ;;  %v7013_v31 = vld [vmem:[%s9165_s0 + $0x60] ss:$2 sm:$0xff]  ;;  %v137_v35 = vrot.slane %v5576_v29, 1  ;;  %v301_v39 = vsel %vm57_vm0, %v298_v28, 0.0  ;;  %v6671_v44 = vld [vmem:[%s9166_s2 + $0x10] sm:$0xff]   ;;  %v216_v49 = vrot.slane %v7027_v37, 1  ;;  %v6591_v61 = vpack.i.bf16 %v5577_v30, %v5576_v29 }
   0x9   :  { %v297_v27 = vsel %vm57_vm0, %v294_v16, %v296_v20  ;;  %v7022_v36 = vld [vmem:[%s9165_s0 + $0x80] ss:$2 sm:$0xff]  ;;  %v299_v38 = vsel %vm57_vm0, %v296_v20, %v298_v28  ;;  %v140_v41 = vrot.slane %v7013_v31, 1  ;;  %v7047_v45 = vld [vmem:[%s9165_s0 + $0x70] ss:$2 sm:$0xff] }
   0xa   :  { %v6566_v33 = vpack.i.bf16 %v297_v27, %v295_v26  ;;  %6150 = vmatpush3.bf16.msra.mxu0 %v6669_v32  ;;  %v7036_v42 = vld [vmem:[%s9165_s0 + $0xa0] ss:$2 sm:$0xff]  ;;  %v6576_v47 = vpack.i.bf16 %v301_v39, %v299_v38  ;;  %v215_v48 = vrot.slane %v7022_v36, 1  ;;  %v7058_v50 = vld [vmem:[%s9165_s0 + $0xb0] ss:$2 sm:$0xff]  ;;  %v139_v52 = vsel %vm57_vm0, %v137_v35, %v138_v40 }
   0xb   :  { %6151 = vmatprep.subr.bf16.mxu0 %v6670_v43  ;;  %v141_v53 = vsel %vm57_vm0, %v138_v40, %v140_v41  ;;  %v218_v54 = vrot.slane %v7036_v42, 1  ;;  %v6673_v55 = vld [vmem:[%s9166_s2 + $0x18] sm:$0xff]   ;;  %v6674_v56 = vld [vmem:[%s9166_s2 + $0xc0] sm:$0xff]   ;;  %v142_v59 = vrot.slane %v7047_v45, 1  ;;  %v220_v0 = vrot.slane %v7058_v50, 1  ;;  %v6678_v9 = vld [vmem:[%s9166_s2 + $0xc8] sm:$0xff]  }
   0xc   :  { %6552 = vrot.lane.b32.xlu0 %v6551_v24, %s6927_s15  ;;  %6562 = vrot.lane.b32.xlu1 %v6561_v25, %s6927_s15  ;;  %v6675_v57 = vld [vmem:[%s9166_s2 + $0x80] sm:$0xff]   ;;  %v6586_v58 = vpack.i.bf16 %v141_v53, %v139_v52  ;;  %v217_v62 = vsel %vm57_vm0, %v215_v48, %v216_v49  ;;  %v7094_v3 = vld [vmem:[%s9165_s0 + $0x110] ss:$2 sm:$0xff]  ;;  %v6601_v6 = vpack.i.bf16 %v7027_v37, %v7022_v36 }
   0xd   :  { %v6676_v60 = vld [vmem:[%s9166_s2 + $0x60] sm:$0xff]   ;;  %v219_v63 = vsel %vm57_vm0, %v216_v49, %v218_v54  ;;  %6187 = vmatprep.subr.bf16.mxu1 %v6674_v56  ;;  %v143_v7 = vsel %vm57_vm0, %v140_v41, %v142_v59  ;;  %v145_v8 = vsel %vm57_vm0, %v142_v59, 0.0  ;;  %v6679_v12 = vld [vmem:[%s9166_s2 + $0x88] sm:$0xff]   ;;  %v223_v13 = vsel %vm57_vm0, %v220_v0, 0.0  ;;  %v7123_v14 = vld [vmem:[%s9165_s0 + $0x150] ss:$2 sm:$0xff] }
   0xe   :  { %6152 = vmatpush3.bf16.msra.mxu0 %v6671_v44  ;;  %v7086_v1 = vld [vmem:[%s9165_s0 + $0x100] ss:$2 sm:$0xff]  ;;  %6188 = vmatpush3.bf16.msra.mxu1 %v6675_v57  ;;  %v6596_v4 = vpack.i.bf16 %v219_v63, %v217_v62  ;;  %v6606_v16 = vpack.i.bf16 %v145_v8, %v143_v7  ;;  %v372_v17 = vrot.slane %v7094_v3, 1  ;;  %v6611_v20 = vpack.i.bf16 %v7047_v45, %v7013_v31  ;;  %v6682_v23 = vld [vmem:[%s9166_s2 + $0xd0] sm:$0xff]   ;;  %v6686_v35 = vld [vmem:[%s9166_s2 + $0xd8] sm:$0xff]  }
   0xf   :  { %6153 = vmatprep.subr.bf16.mxu0 %v6672_v46  ;;  %v6677_v2 = vld [vmem:[%s9166_s2 + $0x20] sm:$0xff]   ;;  %v371_v10 = vrot.slane %v7086_v1, 1  ;;  %6189 = vmatprep.subr.bf16.mxu1 %v6678_v9  ;;  %v6680_v15 = vld [vmem:[%s9166_s2 + $0x68] sm:$0xff]   ;;  %v221_v21 = vsel %vm57_vm0, %v218_v54, %v220_v0  ;;  %v6683_v24 = vld [vmem:[%s9166_s2 + $0x90] sm:$0xff]   ;;  %v450_v28 = vrot.slane %v7123_v14, 1  ;;  %v6621_v31 = vpack.i.bf16 %v7058_v50, %v7036_v42 }
  0x10   :  { %6567 = vrot.lane.b32.xlu0 %v6566_v33, %s6927_s15  ;;  %6572 = vrot.lane.b32.xlu1 %v6571_v34, %s6927_s15  ;;  %v7100_v5 = vld [vmem:[%s9165_s0 + $0x120] ss:$2 sm:$0xff]  ;;  %v6684_v26 = vld [vmem:[%s9166_s2 + $0x70] sm:$0xff]   ;;  %v6616_v27 = vpack.i.bf16 %v223_v13, %v221_v21  ;;  %v6631_v40 = vpack.i.bf16 %v7094_v3, %v7086_v1 }
  0x11   :  { %v7114_v11 = vld [vmem:[%s9165_s0 + $0x140] ss:$2 sm:$0xff]  ;;  %v374_v22 = vrot.slane %v7100_v5, 1  ;;  %v5603_v29 = vld [vmem:[%s9165_s0 + $0x130] ss:$2 sm:$0xff]  ;;  %v373_v32 = vsel %vm57_vm0, %v371_v10, %v372_v17 }
  0x12   :  { %6154 = vmatpush3.bf16.msra.mxu0 %v6673_v55  ;;  %v7133_v18 = vld [vmem:[%s9165_s0 + $0x160] ss:$2 sm:$0xff]  ;;  %6190 = vmatpush3.bf16.msra.mxu1 %v6679_v12  ;;  %v449_v25 = vrot.slane %v7114_v11, 1  ;;  %v6685_v30 = vld [vmem:[%s9166_s2 + $0x30] sm:$0xff]   ;;  %v6687_v36 = vld [vmem:[%s9166_s2 + $0x98] sm:$0xff]   ;;  %v376_v43 = vrot.slane %v5603_v29, 1  ;;  %v6641_v49 = vpack.i.bf16 %v7123_v14, %v7114_v11  ;;  %v6651_v56 = vpack.i.bf16 %v5603_v29, %v7100_v5 }
  0x13   :  { %6155 = vmatprep.subr.bf16.mxu0 %v6676_v60  ;;  %v6681_v19 = vld [vmem:[%s9166_s2 + $0x28] sm:$0xff]   ;;  %6191 = vmatprep.subr.bf16.mxu1 %v6682_v23  ;;  %v375_v33 = vsel %vm57_vm0, %v372_v17, %v374_v22  ;;  %v452_v34 = vrot.slane %v7133_v18, 1  ;;  %v6688_v37 = vld [vmem:[%s9166_s2 + $0x78] sm:$0xff]   ;;  %v6690_v45 = vld [vmem:[%s9166_s2 + $0xe0] sm:$0xff]  }
  0x14   :  { %6577 = vrot.lane.b32.xlu0 %v6576_v47, %s6927_s15  ;;  %6582 = vrot.lane.b32.xlu1 %v6581_v51, %s6927_s15  ;;  %v6626_v38 = vpack.i.bf16 %v375_v33, %v373_v32  ;;  %v6689_v39 = vld [vmem:[%s9166_s2 + $0x38] sm:$0xff]   ;;  %v451_v41 = vsel %vm57_vm0, %v449_v25, %v450_v28  ;;  %v6691_v46 = vld [vmem:[%s9166_s2 + $0xa0] sm:$0xff]   ;;  %v377_v50 = vsel %vm57_vm0, %v374_v22, %v376_v43  ;;  %v379_v51 = vsel %vm57_vm0, %v376_v43, 0.0 }
  0x15   :  { %v453_v42 = vsel %vm57_vm0, %v450_v28, %v452_v34  ;;  %v5611_v44 = vld [vmem:[%s9165_s0 + $0x170] ss:$2 sm:$0xff]  ;;  %v6692_v48 = vld [vmem:[%s9166_s2 + $0x140] sm:$0xff]   ;;  %v6694_v53 = vld [vmem:[%s9166_s2 + $0xe8] sm:$0xff]   ;;  %v6646_v55 = vpack.i.bf16 %v379_v51, %v377_v50 }
  0x16   :  { %6156 = vmatpush3.bf16.msra.mxu0 %v6677_v2  ;;  %6192 = vmatpush3.bf16.msra.mxu1 %v6683_v24  ;;  %v6636_v47 = vpack.i.bf16 %v453_v42, %v451_v41  ;;  %v454_v52 = vrot.slane %v5611_v44, 1  ;;  %v6695_v54 = vld [vmem:[%s9166_s2 + $0xa8] sm:$0xff]   ;;  %v6698_v59 = vld [vmem:[%s9166_s2 + $0xf0] sm:$0xff]   ;;  %v6661_v62 = vpack.i.bf16 %v5611_v44, %v7133_v18  ;;  %v6702_v63 = vld [vmem:[%s9166_s2 + $0xf8] sm:$0xff]  }
  0x17   :  { %6157 = vmatprep.subr.bf16.mxu0 %v6680_v15  ;;  %6193 = vmatprep.subr.bf16.mxu1 %v6686_v35  ;;  %v7230_v0 = vld [vmem:[%s9165_s0 + $0x1] ss:$2 sm:$0xff]  ;;  %v6703_v1 = vld [vmem:[%s9166_s2 + $0xb8] sm:$0xff]  }
  0x18   :  { %6587 = vrot.lane.b32.xlu0 %v6586_v58, %s6927_s15  ;;  %6592 = vrot.lane.b32.xlu1 %v6591_v61, %s6927_s15  ;;  %v455_v57 = vsel %vm57_vm0, %v452_v34, %v454_v52  ;;  %v457_v58 = vsel %vm57_vm0, %v454_v52, 0.0  ;;  %v6699_v61 = vld [vmem:[%s9166_s2 + $0xb0] sm:$0xff]   ;;  %v7239_v2 = vld [vmem:[%s9165_s0 + $0x81] ss:$2 sm:$0xff]  ;;  %v41_v7 = vrot.slane %v7230_v0, 7 }
  0x19   :  { %v6656_v60 = vpack.i.bf16 %v457_v58, %v455_v57  ;;  %v7244_v3 = vld [vmem:[%s9165_s0 + $0x41] ss:$2 sm:$0xff]  ;;  %v7265_v8 = vld [vmem:[%s9165_s0 + $0x91] ss:$2 sm:$0xff]  ;;  %v199_v9 = vrot.slane %v7239_v2, 7 }
  0x1a   :  { %6158 = vmatpush3.bf16.msra.mxu0 %v6681_v19  ;;  %6194 = vmatpush3.bf16.msra.mxu1 %v6687_v36  ;;  %v7254_v5 = vld [vmem:[%s9165_s0 + $0x21] ss:$2 sm:$0xff]  ;;  %v7276_v11 = vld [vmem:[%s9165_s0 + $0x51] ss:$2 sm:$0xff]  ;;  %v121_v12 = vrot.slane %v7244_v3, 7  ;;  %v200_v19 = vrot.slane %v7265_v8, 7 }
  0x1b   :  { %6159 = vmatprep.subr.bf16.mxu0 %v6684_v26  ;;  %6195 = vmatprep.subr.bf16.mxu1 %v6690_v45  ;;  %v7271_v10 = vld [vmem:[%s9165_s0 + $0xc1] ss:$2 sm:$0xff]  ;;  %v7283_v14 = vld [vmem:[%s9165_s0 + $0xd1] ss:$2 sm:$0xff]  ;;  %v44_v17 = vrot.slane %v7254_v5, 7  ;;  %v122_v21 = vrot.slane %v7276_v11, 7 }
  0x1c   :  { %6597 = vrot.lane.b32.xlu0 %v6596_v4, %s6927_s15  ;;  %6602 = vrot.lane.b32.xlu1 %v6601_v6, %s6927_s15  ;;  %v7249_v4 = vld [vmem:[%s9165_s0 + $0x11] ss:$2 sm:$0xff]  ;;  %v277_v13 = vrot.slane %v7271_v10, 7  ;;  %v7301_v22 = vsel %vm40_vm1, 0.0, %v121_v12  ;;  %v278_v23 = vrot.slane %v7283_v14, 7 }
  0x1d   :  { %v7259_v6 = vld [vmem:[%s9165_s0 + $0x31] ss:$2 sm:$0xff]  ;;  %v42_v15 = vrot.slane %v7249_v4, 7  ;;  %v7312_v25 = vld [vmem:[%s9165_s0 + $0x61] ss:$2 sm:$0xff] }
  0x1e   :  { %6160 = vmatpush3.bf16.msra.mxu0 %v6685_v30  ;;  %6196 = vmatpush3.bf16.msra.mxu1 %v6691_v46  ;;  %v46_v18 = vrot.slane %v7259_v6, 7  ;;  %v7307_v24 = vsel %vm40_vm1, 0.0, %v277_v13  ;;  %v7317_v26 = vld [vmem:[%s9165_s0 + $0x71] ss:$2 sm:$0xff]  ;;  %v7332_v29 = vld [vmem:[%s9165_s0 + $0x101] ss:$2 sm:$0xff] }
  0x1f   :  { %6161 = vmatprep.subr.bf16.mxu0 %v6688_v37  ;;  %6197 = vmatprep.subr.bf16.mxu1 %v6694_v53  ;;  %v7327_v28 = vld [vmem:[%s9165_s0 + $0xf1] ss:$2 sm:$0xff]  ;;  %v355_v32 = vrot.slane %v7332_v29, 7  ;;  %v126_v33 = vrot.slane %v7317_v26, 7  ;;  %v7346_v35 = vld [vmem:[%s9165_s0 + $0x121] ss:$2 sm:$0xff]  ;;  %v43_v52 = vsel %vm40_vm1, %v41_v7, %v42_v15 }
  0x20   :  { %6607 = vrot.lane.b32.xlu0 %v6606_v16, %s6927_s15  ;;  %6612 = vrot.lane.b32.xlu1 %v6611_v20, %s6927_s15  ;;  %v7287_v16 = vsel %vm40_vm1, 0.0, %v41_v7  ;;  %v7295_v20 = vsel %vm40_vm1, 0.0, %v199_v9  ;;  %v7337_v30 = vld [vmem:[%s9165_s0 + $0x111] ss:$2 sm:$0xff]  ;;  %v282_v37 = vrot.slane %v7327_v28, 7 }
  0x21   :  { %v7351_v36 = vld [vmem:[%s9165_s0 + $0x131] ss:$2 sm:$0xff]  ;;  %v7364_v41 = vld [vmem:[%s9165_s0 + $0xa1] ss:$2 sm:$0xff] }
  0x22   :  { %6162 = vmatpush3.bf16.msra.mxu0 %v6689_v39  ;;  %6198 = vmatpush3.bf16.msra.mxu1 %v6695_v54  ;;  %v7358_v39 = vsel %vm40_vm1, 0.0, %v355_v32  ;;  %v7370_v43 = vld [vmem:[%s9165_s0 + $0xb1] ss:$2 sm:$0xff]  ;;  %v202_v44 = vrot.slane %v7364_v41, 7  ;;  %v7376_v45 = vld [vmem:[%s9165_s0 + $0x141] ss:$2 sm:$0xff] }
  0x23   :  { %6227 = vmatprep.subr.bf16.mxu0 %v6692_v48  ;;  %6199 = vmatprep.subr.bf16.mxu1 %v6698_v59  ;;  %v204_v46 = vrot.slane %v7370_v43, 7  ;;  %v9171_v48 = vrot.slane %v7376_v45, 7  ;;  %v7394_v51 = vld [vmem:[%s9165_s0 + $0x171] ss:$2 sm:$0xff] }
  0x24   :  { %6617 = vrot.lane.b32.xlu0 %v6616_v27, %s6927_s15  ;;  %6622 = vrot.lane.b32.xlu1 %v6621_v31, %s6927_s15  ;;  %v7322_v27 = vld [vmem:[%s9165_s0 + $0xe1] ss:$2 sm:$0xff]  ;;  %v124_v31 = vrot.slane %v7312_v25, 7 }
  0x25   :  { %v280_v34 = vrot.slane %v7322_v27, 7  ;;  %v7400_v53 = vsel %vm40_vm1, 0.0, %v9171_v48 }
  0x26   :  { %6200 = vmatpush3.bf16.msra.mxu1 %v6699_v61 }
  0x27   :  { %6201 = vmatprep.subr.bf16.mxu1 %v6702_v63 }
  0x28   :  { %6627 = vrot.lane.b32.xlu0 %v6626_v38, %s6927_s15  ;;  %6632 = vrot.lane.b32.xlu1 %v6631_v40, %s6927_s15  ;;  %v356_v38 = vrot.slane %v7337_v30, 7  ;;  %v358_v40 = vrot.slane %v7346_v35, 7 }
  0x2a   :  { %6202 = vmatpush3.bf16.msra.mxu1 %v6703_v1 }
  0x2c   :  { %6637 = vrot.lane.b32.xlu0 %v6636_v47, %s6927_s15  ;;  %6642 = vrot.lane.b32.xlu1 %v6641_v49, %s6927_s15  ;;  %v7382_v47 = vld [vmem:[%s9165_s0 + $0x151] ss:$2 sm:$0xff]  ;;  %v7388_v49 = vld [vmem:[%s9165_s0 + $0x161] ss:$2 sm:$0xff] }
  0x30   :  { %6647 = vrot.lane.b32.xlu0 %v6646_v55, %s6927_s15  ;;  %6652 = vrot.lane.b32.xlu1 %v6651_v56, %s6927_s15 }
  0x34   :  { %6657 = vrot.lane.b32.xlu0 %v6656_v60, %s6927_s15  ;;  %6662 = vrot.lane.b32.xlu1 %v6661_v62, %s6927_s15 }
  0x7a   :  { %v6548_v55 = vpop.permute.xlu0 %6547  ;;  %v6558_v58 = vpop.permute.xlu1 %6557 }
  0x7b   :  { %v6550_v56 = vunpack.i.h.bf16 %v6548_v55  ;;  %v6549_v57 = vunpack.i.l.bf16 %v6548_v55  ;;  %v6560_v59 = vunpack.i.h.bf16 %v6558_v58  ;;  %v6559_v60 = vunpack.i.l.bf16 %v6558_v58 }
  0x7d   :  { %v97_v61 = vsel %vm92_vm2, %v7230_v0, %v6549_v57  ;;  %v98_v62 = vsel %vm92_vm2, %v7249_v4, %v6550_v56  ;;  %v99_v54 = vsel %vm92_vm2, %v7254_v5, %v6559_v60  ;;  %v100_v55 = vsel %vm92_vm2, %v7259_v6, %v6560_v59  ;;  %v6693_v0 = vld [vmem:[%s9166_s2 + $0x100] sm:$0xff]   ;;  %v6696_v56 = vld [vmem:[%s9166_s2 + $0x148] sm:$0xff]   ;;  %v6700_v4 = vld [vmem:[%s9166_s2 + $0x150] sm:$0xff]  }
  0x7e   :  { %v6553_v63 = vpop.permute.xlu0 %6552  ;;  %v588_v1 = vpack.c.bf16 %v98_v62, %v97_v61  ;;  %v6563_v50 = vpop.permute.xlu1 %6562  ;;  %v594_v57 = vpack.c.bf16 %v100_v55, %v99_v54  ;;  %v47_v54 = vsel %vm40_vm1, %v44_v17, %v46_v18 }
  0x7f   :  { %v6555_v48 = vunpack.i.h.bf16 %v6553_v63  ;;  %v6554_v58 = vunpack.i.l.bf16 %v6553_v63  ;;  %v6565_v7 = vunpack.i.h.bf16 %v6563_v50  ;;  %v6564_v61 = vunpack.i.l.bf16 %v6563_v50 }
  0x80   :  { %931 = vmatprep.mubr.bf16.mxu0 %v588_v1  ;;  %v45_v1 = vsel %vm40_vm1, %v42_v15, %v44_v17 }
  0x81   :  { %v93_v60 = vsel %vm92_vm2, %v7287_v16, %v6554_v58  ;;  %v94_v59 = vsel %vm92_vm2, %v43_v52, %v6555_v48  ;;  %v6697_v16 = vld [vmem:[%s9166_s2 + $0x108] sm:$0xff]   ;;  %v95_v6 = vsel %vm92_vm2, %v45_v1, %v6564_v61  ;;  %v96_v5 = vsel %vm92_vm2, %v47_v54, %v6565_v7  ;;  %v6701_v52 = vld [vmem:[%s9166_s2 + $0x110] sm:$0xff]   ;;  %v6704_v7 = vld [vmem:[%s9166_s2 + $0x158] sm:$0xff]  }
  0x82   :  { %v6568_v62 = vpop.permute.xlu0 %6567  ;;  %v587_v63 = vpack.c.bf16 %v94_v59, %v93_v60  ;;  %v6573_v42 = vpop.permute.xlu1 %6572  ;;  %v279_v60 = vsel %vm40_vm1, %v277_v13, %v278_v23  ;;  %v6705_v54 = vld [vmem:[%s9166_s2 + $0x118] sm:$0xff]   ;;  %v6706_v13 = vld [vmem:[%s9166_s2 + $0x160] sm:$0xff]  }
  0x83   :  { %v6570_v50 = vunpack.i.h.bf16 %v6568_v62  ;;  %v6569_v55 = vunpack.i.l.bf16 %v6568_v62  ;;  %v6575_v58 = vunpack.i.h.bf16 %v6573_v42 }
  0x84   :  { %932 = vmatmul.mubr.bf16.vlgmr.msra.gmra.mrb[0].mxu0 %v587_v63 }
  0x85   :  { %6228 = vmatpush3.bf16.msra.mxu0 %v6693_v0  ;;  %939 = vmatprep.mubr.bf16.mxu0 %v594_v57  ;;  %v331_v17 = vsel %vm92_vm2, %v7271_v10, %v6569_v55  ;;  %v332_v18 = vsel %vm92_vm2, %v7283_v14, %v6570_v50  ;;  %v6574_v0 = vunpack.i.l.bf16 %v6573_v42  ;;  %v593_v57 = vpack.c.bf16 %v96_v5, %v95_v6 }
  0x86   :  { %v6578_v15 = vpop.permute.xlu0 %6577  ;;  %6229 = vmatprep.subr.bf16.mxu0 %v6696_v56  ;;  %v7445_v48 = vpop.permute.xlu1 %6582  ;;  %v600_v61 = vpack.c.bf16 %v332_v18, %v331_v17  ;;  %v123_v50 = vsel %vm40_vm1, %v121_v12, %v122_v21  ;;  %v125_v14 = vsel %vm40_vm1, %v122_v21, %v124_v31 }
  0x87   :  { %v6579_v56 = vunpack.i.l.bf16 %v6578_v15  ;;  %v6580_v59 = vunpack.i.h.bf16 %v6578_v15 }
  0x89   :  { %6230 = vmatpush3.bf16.msra.mxu0 %v6697_v16  ;;  %v327_v16 = vsel %vm92_vm2, %v7307_v24, %v6574_v0  ;;  %v333_v12 = vsel %vm92_vm2, %v7322_v27, %v6579_v56  ;;  %v6707_v0 = vld [vmem:[%s9166_s2 + $0x120] sm:$0xff]  }
  0x8a   :  { %v6588_v62 = vpop.permute.xlu0 %6587  ;;  %6231 = vmatprep.subr.bf16.mxu0 %v6700_v4  ;;  %v6593_v42 = vpop.permute.xlu1 %6592  ;;  %v328_v4 = vsel %vm92_vm2, %v279_v60, %v6575_v58 }
  0x8b   :  { %v6590_v63 = vunpack.i.h.bf16 %v6588_v62  ;;  %v6589_v1 = vunpack.i.l.bf16 %v6588_v62  ;;  %v6595_v55 = vunpack.i.h.bf16 %v6593_v42  ;;  %v6594_v10 = vunpack.i.l.bf16 %v6593_v42 }
  0x8c   :  { %940 = vmatmul.mubr.bf16.gmra.mrb[4].mxu0 %v593_v57  ;;  %v6585_v57 = vunpack.i.h.bf16 %v7445_v48  ;;  %v599_v56 = vpack.c.bf16 %v328_v4, %v327_v16 }
  0x8d   :  { %6232 = vmatpush3.bf16.msra.mxu0 %v6701_v52  ;;  %v175_v6 = vsel %vm92_vm2, %v7244_v3, %v6589_v1  ;;  %v176_v5 = vsel %vm92_vm2, %v7276_v11, %v6590_v63  ;;  %947 = vmatprep.mubr.bf16.mxu0 %v600_v61  ;;  %v171_v18 = vsel %vm92_vm2, %v7301_v22, %v6594_v10  ;;  %v6708_v22 = vld [vmem:[%s9166_s2 + $0x168] sm:$0xff]  }
  0x8e   :  { %v6598_v15 = vpop.permute.xlu0 %6597  ;;  %6233 = vmatprep.subr.bf16.mxu0 %v6704_v7  ;;  %v590_v17 = vpack.c.bf16 %v176_v5, %v175_v6  ;;  %v172_v24 = vsel %vm92_vm2, %v123_v50, %v6595_v55  ;;  %v334_v52 = vsel %vm92_vm2, %v7327_v28, %v6580_v59  ;;  %v7483_v58 = vpop.permute.xlu1 %6602  ;;  %v6584_v7 = vunpack.i.l.bf16 %v7445_v48  ;;  %v6709_v50 = vld [vmem:[%s9166_s2 + $0x128] sm:$0xff]  }
  0x8f   :  { %v589_v3 = vpack.c.bf16 %v172_v24, %v171_v18  ;;  %v6599_v61 = vunpack.i.l.bf16 %v6598_v15  ;;  %v606_v60 = vpack.c.bf16 %v334_v52, %v333_v12  ;;  %v281_v59 = vsel %vm40_vm1, %v278_v23, %v280_v34 }
  0x90   :  { %996 = vmatprep.mubr.bf16.mxu1 %v590_v17  ;;  %v283_v48 = vsel %vm40_vm1, %v280_v34, %v282_v37  ;;  %v6600_v62 = vunpack.i.h.bf16 %v6598_v15  ;;  %v127_v23 = vsel %vm40_vm1, %v124_v31, %v126_v33  ;;  %v6710_v34 = vld [vmem:[%s9166_s2 + $0x170] sm:$0xff]   ;;  %v329_v37 = vsel %vm92_vm2, %v281_v59, %v6584_v7  ;;  %v6712_v17 = vld [vmem:[%s9166_s2 + $0x178] sm:$0xff]  }
  0x91   :  { %6234 = vmatpush3.bf16.msra.mxu0 %v6705_v54  ;;  %997 = vmatmul.mubr.bf16.vlgmr.msra.gmra.mrb[0].mxu1 %v589_v3  ;;  %v330_v55 = vsel %vm92_vm2, %v283_v48, %v6585_v57  ;;  %v253_v31 = vsel %vm92_vm2, %v7239_v2, %v6599_v61  ;;  %v6605_v5 = vunpack.i.h.bf16 %v7483_v58  ;;  %v6604_v12 = vunpack.i.l.bf16 %v7483_v58 }
  0x92   :  { %v6608_v63 = vpop.permute.xlu0 %6607  ;;  %6235 = vmatprep.subr.bf16.mxu0 %v6706_v13  ;;  %v6613_v54 = vpop.permute.xlu1 %6612  ;;  %v254_v4 = vsel %vm92_vm2, %v7265_v8, %v6600_v62  ;;  %v605_v15 = vpack.c.bf16 %v330_v55, %v329_v37  ;;  %v201_v18 = vsel %vm40_vm1, %v199_v9, %v200_v19  ;;  %v357_v2 = vsel %vm40_vm1, %v355_v32, %v356_v38 }
  0x93   :  { %v6610_v1 = vunpack.i.h.bf16 %v6608_v63  ;;  %v6609_v42 = vunpack.i.l.bf16 %v6608_v63  ;;  %v6615_v27 = vunpack.i.h.bf16 %v6613_v54  ;;  %v6614_v28 = vunpack.i.l.bf16 %v6613_v54 }
  0x94   :  { %948 = vmatmul.mubr.bf16.gmra.mrb[8].mxu0 %v599_v56  ;;  %v592_v52 = vpack.c.bf16 %v254_v4, %v253_v31  ;;  %v6713_v56 = vld [vmem:[%s9166_s2 + $0x138] sm:$0xff]   ;;  %v250_v9 = vsel %vm92_vm2, %v201_v18, %v6605_v5  ;;  %v205_v55 = vsel %vm40_vm1, %v202_v44, %v204_v46  ;;  %v9172_v8 = vrot.slane %v7351_v36, 7 }
  0x95   :  { %6236 = vmatpush3.bf16.msra.mxu0 %v6707_v0  ;;  %v177_v11 = vsel %vm92_vm2, %v7312_v25, %v6609_v42  ;;  %v178_v21 = vsel %vm92_vm2, %v7317_v26, %v6610_v1  ;;  %955 = vmatprep.mubr.bf16.mxu0 %v606_v60  ;;  %v173_v13 = vsel %vm92_vm2, %v125_v14, %v6614_v28  ;;  %v6711_v26 = vld [vmem:[%s9166_s2 + $0x130] sm:$0xff]  }
  0x96   :  { %v6618_v33 = vpop.permute.xlu0 %6617  ;;  %6237 = vmatprep.subr.bf16.mxu0 %v6708_v22  ;;  %v596_v10 = vpack.c.bf16 %v178_v21, %v177_v11  ;;  %v174_v16 = vsel %vm92_vm2, %v127_v23, %v6615_v27  ;;  %v7531_v6 = vpop.permute.xlu1 %6622  ;;  %v249_v22 = vsel %vm92_vm2, %v7295_v20, %v6604_v12  ;;  %v9173_v12 = vrot.slane %v7382_v47, 7 }
  0x97   :  { %v595_v25 = vpack.c.bf16 %v174_v16, %v173_v13  ;;  %v6619_v24 = vunpack.i.l.bf16 %v6618_v33  ;;  %v6620_v3 = vunpack.i.h.bf16 %v6618_v33  ;;  %v6624_v14 = vunpack.i.l.bf16 %v7531_v6 }
  0x98   :  { %1004 = vmatprep.mubr.bf16.mxu1 %v596_v10  ;;  %v6625_v23 = vunpack.i.h.bf16 %v7531_v6  ;;  %v359_v33 = vsel %vm40_vm1, %v356_v38, %v358_v40 }
  0x99   :  { %6238 = vmatpush3.bf16.msra.mxu0 %v6709_v50  ;;  %1005 = vmatmul.mubr.bf16.gmra.mrb[4].mxu1 %v595_v25  ;;  %v255_v62 = vsel %vm92_vm2, %v7364_v41, %v6619_v24  ;;  %v256_v42 = vsel %vm92_vm2, %v7370_v43, %v6620_v3  ;;  %v591_v50 = vpack.c.bf16 %v250_v9, %v249_v22  ;;  %v9175_v22 = vrot.slane %v7388_v49, 7  ;;  %v6716_v49 = vld [vmem:[%s9166_s2 + $0x240] sm:$0xff]  }
  0x9a   :  { %v6628_v0 = vpop.permute.xlu0 %6627  ;;  %6239 = vmatprep.subr.bf16.mxu0 %v6710_v34  ;;  %v6633_v7 = vpop.permute.xlu1 %6632  ;;  %v598_v28 = vpack.c.bf16 %v256_v42, %v255_v62  ;;  %v6719_v42 = vld [vmem:[%s9166_s2 + $0x188] sm:$0xff]  }
  0x9b   :  { %v6630_v58 = vunpack.i.h.bf16 %v6628_v0  ;;  %v6629_v57 = vunpack.i.l.bf16 %v6628_v0  ;;  %v6635_v61 = vunpack.i.h.bf16 %v6633_v7  ;;  %v6634_v60 = vunpack.i.l.bf16 %v6633_v7 }
  0x9c   :  { %956 = vmatmul.mubr.bf16.gmra.mrb[12].mxu0 %v605_v15  ;;  %v9174_v15 = vrot.slane %v7376_v45, 7 }
  0x9d   :  { %6240 = vmatpush3.bf16.msra.mxu0 %v6711_v26  ;;  %v409_v59 = vsel %vm92_vm2, %v7332_v29, %v6629_v57  ;;  %v410_v48 = vsel %vm92_vm2, %v7337_v30, %v6630_v58  ;;  %1061 = vmatprep.mubr.bf16.mxu0 %v592_v52  ;;  %v405_v20 = vsel %vm92_vm2, %v7358_v39, %v6634_v60  ;;  %v6926_v58 = vld [vmem:[%s9165_s0 + $0x161] ss:$2 sm:$0xff]  ;;  %v9177_v60 = vrot.slane %v7394_v51, 7 }
  0x9e   :  { %v6638_v32 = vpop.permute.xlu0 %6637  ;;  %6241 = vmatprep.subr.bf16.mxu0 %v6712_v17  ;;  %v602_v63 = vpack.c.bf16 %v410_v48, %v409_v59  ;;  %v406_v1 = vsel %vm92_vm2, %v357_v2, %v6635_v61  ;;  %v6643_v54 = vpop.permute.xlu1 %6642  ;;  %v203_v39 = vsel %vm40_vm1, %v200_v19, %v202_v44  ;;  %v361_v19 = vsel %vm40_vm1, %v358_v40, %v9172_v8  ;;  %v6735_v8 = vld [vmem:[%s9166_s2 + $0x1a8] sm:$0xff]  }
  0x9f   :  { %v601_v29 = vpack.c.bf16 %v406_v1, %v405_v20  ;;  %v6639_v27 = vunpack.i.l.bf16 %v6638_v32  ;;  %v6640_v34 = vunpack.i.h.bf16 %v6638_v32  ;;  %v251_v41 = vsel %vm92_vm2, %v203_v39, %v6624_v14  ;;  %v6717_v20 = vld [vmem:[%s9166_s2 + $0x200] sm:$0xff]   ;;  %v6718_v1 = vld [vmem:[%s9166_s2 + $0x1c8] sm:$0xff]   ;;  %v6723_v14 = vld [vmem:[%s9166_s2 + $0x190] sm:$0xff]  }
  0xa0   :  { %1012 = vmatprep.mubr.bf16.mxu1 %v602_v63  ;;  %v252_v30 = vsel %vm92_vm2, %v205_v55, %v6625_v23  ;;  %v6645_v26 = vunpack.i.h.bf16 %v6643_v54  ;;  %v435_v17 = vsel %vm40_vm1, %v9174_v15, %v9173_v12  ;;  %v9178_v59 = vmov %v9175_v22  ;;  %v6724_v23 = vld [vmem:[%s9166_s2 + $0x250] sm:$0xff]   ;;  %v6727_v39 = vld [vmem:[%s9166_s2 + $0x198] sm:$0xff]   ;;  %v6730_v55 = vld [vmem:[%s9166_s2 + $0x1e0] sm:$0xff]  }
  0xa1   :  { %6242 = vmatpush3.bf16.msra.mxu0 %v6713_v56  ;;  %1013 = vmatmul.mubr.bf16.gmra.mrb[8].mxu1 %v601_v29  ;;  %v487_v38 = vsel %vm92_vm2, %v7376_v45, %v6639_v27  ;;  %v488_v4 = vsel %vm92_vm2, %v7382_v47, %v6640_v34  ;;  %v439_v48 = vsel %vm40_vm1, %v9178_v59, %v9177_v60  ;;  %v6714_v47 = vld [vmem:[%s9166_s2 + $0x1c0] sm:$0xff]   ;;  %v6721_v29 = vld [vmem:[%s9166_s2 + $0x208] sm:$0xff]   ;;  %v6725_v27 = vld [vmem:[%s9166_s2 + $0x210] sm:$0xff]  }
  0xa2   :  { %v6648_v37 = vpop.permute.xlu0 %6647  ;;  %v6653_v31 = vpop.permute.xlu1 %6652  ;;  %v604_v5 = vpack.c.bf16 %v488_v4, %v487_v38  ;;  %v484_v3 = vsel %vm92_vm2, %v435_v17, %v6645_v26  ;;  %6267 = vmatprep.subr.bf16.mxu1 %v6714_v47  ;;  %6295 = vmatprep.subr.bf16.mxu0 %v6716_v49  ;;  %v6728_v34 = vld [vmem:[%s9166_s2 + $0x258] sm:$0xff]  }
  0xa3   :  { %v6650_v11 = vunpack.i.h.bf16 %v6648_v37  ;;  %v6649_v21 = vunpack.i.l.bf16 %v6648_v37  ;;  %v6655_v43 = vunpack.i.h.bf16 %v6653_v31  ;;  %v6654_v10 = vunpack.i.l.bf16 %v6653_v31  ;;  %v6729_v37 = vld [vmem:[%s9166_s2 + $0x218] sm:$0xff]   ;;  %v6733_v31 = vld [vmem:[%s9166_s2 + $0x220] sm:$0xff]  }
  0xa4   :  { %1062 = vmatmul.mubr.bf16.vlgmr.msra.gmra.mrb[16].mxu0 %v591_v50  ;;  %v6722_v50 = vld [vmem:[%s9166_s2 + $0x1d0] sm:$0xff]   ;;  %v6743_v38 = vld [vmem:[%s9166_s2 + $0x1b8] sm:$0xff]  }
  0xa5   :  { %v411_v44 = vsel %vm92_vm2, %v7346_v35, %v6649_v21  ;;  %v412_v46 = vsel %vm92_vm2, %v7351_v36, %v6650_v11  ;;  %1069 = vmatprep.mubr.bf16.mxu0 %v598_v28  ;;  %v407_v40 = vsel %vm92_vm2, %v359_v33, %v6654_v10  ;;  %v408_v16 = vsel %vm92_vm2, %v361_v19, %v6655_v43  ;;  %v6726_v28 = vld [vmem:[%s9166_s2 + $0x1d8] sm:$0xff]   ;;  %v6731_v11 = vld [vmem:[%s9166_s2 + $0x1a0] sm:$0xff]   ;;  %v6734_v33 = vld [vmem:[%s9166_s2 + $0x1e8] sm:$0xff]  }
  0xa6   :  { %v608_v13 = vpack.c.bf16 %v412_v46, %v411_v44  ;;  %v607_v6 = vpack.c.bf16 %v408_v16, %v407_v40  ;;  %v6658_v25 = vpop.permute.xlu0 %6657  ;;  %v597_v35 = vpack.c.bf16 %v252_v30, %v251_v41  ;;  %v6644_v36 = vunpack.i.l.bf16 %v6643_v54  ;;  %v6663_v0 = vpop.permute.xlu1 %6662  ;;  %6296 = vmatpush3.bf16.msra.mxu0 %v6717_v20  ;;  %v6720_v54 = vld [vmem:[%s9166_s2 + $0x248] sm:$0xff]   ;;  %v6732_v21 = vld [vmem:[%s9166_s2 + $0x260] sm:$0xff]   ;;  %v6738_v10 = vld [vmem:[%s9166_s2 + $0x1f0] sm:$0xff]  }
  0xa7   :  { %v6660_v18 = vunpack.i.h.bf16 %v6658_v25  ;;  %v6659_v24 = vunpack.i.l.bf16 %v6658_v25  ;;  %v6665_v56 = vunpack.i.h.bf16 %v6663_v0  ;;  %v6664_v2 = vunpack.i.l.bf16 %v6663_v0  ;;  %6297 = vmatprep.subr.bf16.mxu0 %v6720_v54  ;;  %v6736_v19 = vld [vmem:[%s9166_s2 + $0x268] sm:$0xff]   ;;  %v6739_v41 = vld [vmem:[%s9166_s2 + $0x1b0] sm:$0xff]   ;;  %v6742_v30 = vld [vmem:[%s9166_s2 + $0x1f8] sm:$0xff]  }
  0xa8   :  { %1020 = vmatprep.mubr.bf16.mxu1 %v608_v13  ;;  %v483_v52 = vsel %vm92_vm2, %v7400_v53, %v6644_v36  ;;  %v9176_v53 = vmov %v9173_v12  ;;  %v6737_v43 = vld [vmem:[%s9166_s2 + $0x228] sm:$0xff]   ;;  %v6740_v44 = vld [vmem:[%s9166_s2 + $0x270] sm:$0xff]   ;;  %v6744_v13 = vld [vmem:[%s9166_s2 + $0x278] sm:$0xff]  }
  0xa9   :  { %1021 = vmatmul.mubr.bf16.gmra.mrb[12].mxu1 %v607_v6  ;;  %v489_v57 = vsel %vm92_vm2, %v6926_v58, %v6659_v24  ;;  %v490_v45 = vsel %vm92_vm2, %v7394_v51, %v6660_v18  ;;  %v603_v7 = vpack.c.bf16 %v484_v3, %v483_v52  ;;  %v437_v61 = vsel %vm40_vm1, %v9176_v53, %v9175_v22  ;;  %v6715_v51 = vld [vmem:[%s9166_s2 + $0x180] sm:$0xff]   ;;  %v6741_v46 = vld [vmem:[%s9166_s2 + $0x230] sm:$0xff]   ;;  %v6745_v40 = vld [vmem:[%s9166_s2 + $0x238] sm:$0xff]  }
  0xaa   :  { %v610_v9 = vpack.c.bf16 %v490_v45, %v489_v57  ;;  %v485_v62 = vsel %vm92_vm2, %v437_v61, %v6664_v2  ;;  %v486_v32 = vsel %vm92_vm2, %v439_v48, %v6665_v56  ;;  %6268 = vmatpush3.bf16.msra.mxu1 %v6715_v51  ;;  %6298 = vmatpush3.bf16.msra.mxu0 %v6721_v29 }
  0xab   :  { %v609_v63 = vpack.c.bf16 %v486_v32, %v485_v62  ;;  %6269 = vmatprep.subr.bf16.mxu1 %v6718_v1  ;;  %6299 = vmatprep.subr.bf16.mxu0 %v6724_v23 }
  0xac   :  { %1070 = vmatmul.mubr.bf16.gmra.mrb[20].mxu0 %v597_v35 }
  0xad   :  { %1077 = vmatprep.mubr.bf16.mxu0 %v604_v5 }
  0xae   :  { %6270 = vmatpush3.bf16.msra.mxu1 %v6719_v42  ;;  %6300 = vmatpush3.bf16.msra.mxu0 %v6725_v27 }
  0xaf   :  { %6271 = vmatprep.subr.bf16.mxu1 %v6722_v50  ;;  %6301 = vmatprep.subr.bf16.mxu0 %v6728_v34 }
  0xb2   :  { %6272 = vmatpush3.bf16.msra.mxu1 %v6723_v14  ;;  %6302 = vmatpush3.bf16.msra.mxu0 %v6729_v37 }
  0xb3   :  { %6273 = vmatprep.subr.bf16.mxu1 %v6726_v28  ;;  %6303 = vmatprep.subr.bf16.mxu0 %v6732_v21 }
  0xb4   :  { %1078 = vmatmul.mubr.bf16.gmra.mrb[24].mxu0 %v603_v7 }
  0xb5   :  { %1085 = vmatprep.mubr.bf16.mxu0 %v610_v9 }
  0xb6   :  { %6274 = vmatpush3.bf16.msra.mxu1 %v6727_v39  ;;  %6304 = vmatpush3.bf16.msra.mxu0 %v6733_v31 }
  0xb7   :  { %6275 = vmatprep.subr.bf16.mxu1 %v6730_v55  ;;  %6305 = vmatprep.subr.bf16.mxu0 %v6736_v19 }
  0xba   :  { %6276 = vmatpush3.bf16.msra.mxu1 %v6731_v11  ;;  %6306 = vmatpush3.bf16.msra.mxu0 %v6737_v43 }
  0xbb   :  { %6277 = vmatprep.subr.bf16.mxu1 %v6734_v33  ;;  %6307 = vmatprep.subr.bf16.mxu0 %v6740_v44 }
  0xbc   :  { %1086 = vmatmul.mubr.bf16.gmra.mrb[28].mxu0 %v609_v63 }
  0xbe   :  { %6278 = vmatpush3.bf16.msra.mxu1 %v6735_v8  ;;  %6308 = vmatpush3.bf16.msra.mxu0 %v6741_v46 }
  0xbf   :  { %6279 = vmatprep.subr.bf16.mxu1 %v6738_v10  ;;  %6309 = vmatprep.subr.bf16.mxu0 %v6744_v13 }
  0xc2   :  { %6280 = vmatpush3.bf16.msra.mxu1 %v6739_v41  ;;  %6310 = vmatpush3.bf16.msra.mxu0 %v6745_v40 }
  0xc3   :  { %6281 = vmatprep.subr.bf16.mxu1 %v6742_v30 }
  0xc6   :  { %6282 = vmatpush3.bf16.msra.mxu1 %v6743_v38 }
 0x157   :  { %v6163_v16 = vpop.f32.mrb[0].mxu0 }
 0x158   :  { %v6164_v4 = vpop.f32.mrb[1].mxu0 }
 0x159   :  { %v6165_v6 = vadd.f32 %v6164_v4, %v6163_v16  ;;  %v6166_v25 = vpop.f32.mrb[2].mxu0 }
 0x15a   :  { %v6167_v35 = vpop.f32.mrb[3].mxu0 }
 0x15b   :  { %v6168_v26 = vadd.f32 %v6167_v35, %v6166_v25 }
 0x15f   :  { %v6169_v36 = vpop.f32.mrb[4].mxu0 }
 0x160   :  { %v6170_v5 = vpop.f32.mrb[5].mxu0 }
 0x161   :  { %v6171_v12 = vadd.f32 %v6170_v5, %v6169_v36  ;;  %v6172_v15 = vpop.f32.mrb[6].mxu0 }
 0x162   :  { %v6173_v17 = vpop.f32.mrb[7].mxu0 }
 0x163   :  { %v6174_v18 = vadd.f32 %v6173_v17, %v6172_v15 }
 0x164   :  { %v6203_v24 = vpop.f32.mrb[0].mxu1 }
 0x165   :  { %v6204_v52 = vpop.f32.mrb[1].mxu1 }
 0x166   :  { %v6205_v3 = vadd.f32 %v6204_v52, %v6203_v24  ;;  %v6206_v0 = vpop.f32.mrb[2].mxu1 }
 0x167   :  { %v6175_v58 = vpop.f32.mrb[8].mxu0  ;;  %v6207_v57 = vpop.f32.mrb[3].mxu1 }
 0x168   :  { %v999_v45 = vadd.f32 %v6205_v3, %v6165_v6  ;;  %v6208_v7 = vadd.f32 %v6207_v57, %v6206_v0  ;;  %v6176_v56 = vpop.f32.mrb[9].mxu0 }
 0x169   :  { %v6177_v2 = vadd.f32 %v6176_v56, %v6175_v58  ;;  %v6178_v9 = vpop.f32.mrb[10].mxu0 }
 0x16a   :  { %v1002_v22 = vadd.f32 %v6208_v7, %v6168_v26  ;;  %v6179_v53 = vpop.f32.mrb[11].mxu0 }
 0x16b   :  { %v6180_v61 = vadd.f32 %v6179_v53, %v6178_v9 }
 0x16c   :  { %v6209_v60 = vpop.f32.mrb[4].mxu1 }
 0x16d   :  { %v6210_v59 = vpop.f32.mrb[5].mxu1 }
 0x16e   :  { %v6211_v48 = vadd.f32 %v6210_v59, %v6209_v60  ;;  %v6212_v62 = vpop.f32.mrb[6].mxu1 }
 0x16f   :  { %v6181_v32 = vpop.f32.mrb[12].mxu0  ;;  %v6213_v63 = vpop.f32.mrb[7].mxu1 }
 0x170   :  { %v1007_v47 = vadd.f32 %v6211_v48, %v6171_v12  ;;  %v6214_v51 = vadd.f32 %v6213_v63, %v6212_v62  ;;  %v6182_v49 = vpop.f32.mrb[13].mxu0 }
 0x171   :  { %v6183_v20 = vadd.f32 %v6182_v49, %v6181_v32  ;;  %v6184_v1 = vpop.f32.mrb[14].mxu0 }
 0x172   :  { %v1010_v42 = vadd.f32 %v6214_v51, %v6174_v18  ;;  %v6185_v54 = vpop.f32.mrb[15].mxu0 }
 0x173   :  { %v6186_v29 = vadd.f32 %v6185_v54, %v6184_v1 }
 0x174   :  { %v6215_v50 = vpop.f32.mrb[8].mxu1 }
 0x175   :  { %v6216_v14 = vpop.f32.mrb[9].mxu1 }
 0x176   :  { %v6217_v23 = vadd.f32 %v6216_v14, %v6215_v50  ;;  %v6218_v27 = vpop.f32.mrb[10].mxu1 }
 0x177   :  { %v6219_v28 = vpop.f32.mrb[11].mxu1  ;;  %v6243_v39 = vpop.f32.mrb[16].mxu0 }
 0x178   :  { %v1015_v34 = vadd.f32 %v6217_v23, %v6177_v2  ;;  %v6220_v37 = vadd.f32 %v6219_v28, %v6218_v27  ;;  %v6244_v55 = vpop.f32.mrb[17].mxu0 }
 0x179   :  { %v6245_v11 = vadd.f32 %v6244_v55, %v6243_v39  ;;  %v6246_v21 = vpop.f32.mrb[18].mxu0 }
 0x17a   :  { %v1018_v31 = vadd.f32 %v6220_v37, %v6180_v61  ;;  %v6247_v33 = vpop.f32.mrb[19].mxu0 }
 0x17b   :  { %v1064_v8 = vadd.f32 %v6245_v11, %v999_v45  ;;  %v6248_v19 = vadd.f32 %v6247_v33, %v6246_v21 }
 0x17c   :  { %v6221_v43 = vpop.f32.mrb[12].mxu1 }
 0x17d   :  { %vm1094_vm3 = vcmp.ge.f32.partialorder %v1064_v8, 0.0  ;;  %v1102_v10 = vmul.f32 0.2, %v1064_v8  ;;  %v1067_v41 = vadd.f32 %v6248_v19, %v1002_v22  ;;  %v6222_v44 = vpop.f32.mrb[13].mxu1 }
 0x17e   :  { %v6223_v46 = vadd.f32 %v6222_v44, %v6221_v43  ;;  %v6224_v30 = vpop.f32.mrb[14].mxu1 }
 0x17f   :  { %v1110_v38 = vsel %vm1094_vm3, %v1064_v8, %v1102_v10  ;;  %vm1095_vm4 = vcmp.ge.f32.partialorder %v1067_v41, 0.0  ;;  %v1103_v13 = vmul.f32 0.2, %v1067_v41  ;;  %v6225_v40 = vpop.f32.mrb[15].mxu1  ;;  %v6249_v16 = vpop.f32.mrb[20].mxu0 }
 0x180   :  { %1118 = vst [vmem:[#allocation2] sm:$0xff] %v1110_v38  ;;  %v1023_v4 = vadd.f32 %v6223_v46, %v6183_v20  ;;  %v6226_v6 = vadd.f32 %v6225_v40, %v6224_v30  ;;  %v6250_v25 = vpop.f32.mrb[21].mxu0 }
 0x181   :  { %v1111_v35 = vsel %vm1095_vm4, %v1067_v41, %v1103_v13  ;;  %v6251_v26 = vadd.f32 %v6250_v25, %v6249_v16  ;;  %v6252_v36 = vpop.f32.mrb[22].mxu0 }
 0x182   :  { %1119 = vst [vmem:[#allocation2 + $0x8] sm:$0xff] %v1111_v35  ;;  %v1026_v5 = vadd.f32 %v6226_v6, %v6186_v29  ;;  %v6253_v12 = vpop.f32.mrb[23].mxu0 }
 0x183   :  { %v1072_v15 = vadd.f32 %v6251_v26, %v1007_v47  ;;  %v6254_v17 = vadd.f32 %v6253_v12, %v6252_v36  ;;  %v6747_v12 = vld [vmem:[%s9166_s2 + $0x280] sm:$0xff]  }
 0x185   :  { %vm1096_vm5 = vcmp.ge.f32.partialorder %v1072_v15, 0.0  ;;  %v1104_v18 = vmul.f32 0.2, %v1072_v15  ;;  %v1075_v24 = vadd.f32 %v6254_v17, %v1010_v42  ;;  %v6749_v17 = vld [vmem:[%s9166_s2 + $0x300] sm:$0xff]   ;;  %v6782_v42 = vld [vmem:[%s9166_s2 + $0x3c8] sm:$0xff]  }
 0x187   :  { %v1112_v52 = vsel %vm1096_vm5, %v1072_v15, %v1104_v18  ;;  %vm1097_vm6 = vcmp.ge.f32.partialorder %v1075_v24, 0.0  ;;  %v1105_v3 = vmul.f32 0.2, %v1075_v24  ;;  %v6255_v0 = vpop.f32.mrb[24].mxu0  ;;  %v6748_v15 = vld [vmem:[%s9166_s2 + $0x340] sm:$0xff]   ;;  %v6750_v18 = vld [vmem:[%s9166_s2 + $0x2c8] sm:$0xff]   ;;  %vm5744_vm5 = vmpackc.low %vm7725_vm9, %vm7725_vm9 }
 0x188   :  { %1120 = vst [vmem:[#allocation2 + $0x10] sm:$0xff] %v1112_v52  ;;  %v6256_v58 = vpop.f32.mrb[25].mxu0  ;;  %6345 = vmatprep.subr.bf16.mxu0 %v6748_v15  ;;  %v6752_v52 = vld [vmem:[%s9166_s2 + $0x348] sm:$0xff]   ;;  %vm1934_vm9 = vcmask 1042432  }
 0x189   :  { %v1113_v57 = vsel %vm1097_vm6, %v1075_v24, %v1105_v3  ;;  %v6257_v45 = vadd.f32 %v6256_v58, %v6255_v0  ;;  %v6258_v7 = vpop.f32.mrb[26].mxu0  ;;  %v1126_v61 = vld [vmem:[#allocation2] ss:$2 sm:$0xff]  ;;  %v1130_v62 = vld [vmem:[#allocation2 + $0x1] ss:$2 sm:$0xff]  ;;  %v6754_v0 = vld [vmem:[%s9166_s2 + $0x2d0] sm:$0xff]  }
 0x18a   :  { %1121 = vst [vmem:[#allocation2 + $0x18] sm:$0xff] %v1113_v57  ;;  %v6259_v56 = vpop.f32.mrb[27].mxu0  ;;  %v1143_v20 = vrot.slane %v1126_v61, 1  ;;  %v1135_v14 = vrot.slane %v1130_v62, 7  ;;  %v6751_v24 = vld [vmem:[%s9166_s2 + $0x288] sm:$0xff]   ;;  %v6755_v58 = vld [vmem:[%s9166_s2 + $0x290] sm:$0xff]   ;;  %vm5747_vm6 = vmpackc.low %vm57_vm0, %vm57_vm0 }
 0x18b   :  { %v1080_v2 = vadd.f32 %v6257_v45, %v1015_v34  ;;  %v6260_v9 = vadd.f32 %v6259_v56, %v6258_v7  ;;  %v6753_v3 = vld [vmem:[%s9166_s2 + $0x308] sm:$0xff]   ;;  %v6756_v57 = vld [vmem:[%s9166_s2 + $0x350] sm:$0xff]   ;;  %v6758_v7 = vld [vmem:[%s9166_s2 + $0x2d8] sm:$0xff]  }
 0x18c   :  { %v6757_v45 = vld [vmem:[%s9166_s2 + $0x310] sm:$0xff]   ;;  %v6759_v56 = vld [vmem:[%s9166_s2 + $0x298] sm:$0xff]  }
 0x18d   :  { %vm1098_vm7 = vcmp.ge.f32.partialorder %v1080_v2, 0.0  ;;  %v1106_v22 = vmul.f32 0.2, %v1080_v2  ;;  %v1083_v53 = vadd.f32 %v6260_v9, %v1018_v31  ;;  %v6761_v9 = vld [vmem:[%s9166_s2 + $0x318] sm:$0xff]  }
 0x18f   :  { %v1114_v60 = vsel %vm1098_vm7, %v1080_v2, %v1106_v22  ;;  %vm1099_vm8 = vcmp.ge.f32.partialorder %v1083_v53, 0.0  ;;  %v1107_v59 = vmul.f32 0.2, %v1083_v53  ;;  %v6261_v48 = vpop.f32.mrb[28].mxu0  ;;  %v6760_v2 = vld [vmem:[%s9166_s2 + $0x358] sm:$0xff]   ;;  %v6762_v22 = vld [vmem:[%s9166_s2 + $0x2e0] sm:$0xff]  }
 0x190   :  { %1122 = vst [vmem:[#allocation2 + $0x20] sm:$0xff] %v1114_v60  ;;  %v6262_v32 = vpop.f32.mrb[29].mxu0  ;;  %v6765_v60 = vld [vmem:[%s9166_s2 + $0x320] sm:$0xff]  }
 0x191   :  { %v1115_v63 = vsel %vm1099_vm8, %v1083_v53, %v1107_v59  ;;  %v6263_v47 = vadd.f32 %v6262_v32, %v6261_v48  ;;  %v6264_v51 = vpop.f32.mrb[30].mxu0  ;;  %v1128_v49 = vld [vmem:[#allocation2 + $0x10] ss:$2 sm:$0xff]  ;;  %v1132_v1 = vld [vmem:[#allocation2 + $0x11] ss:$2 sm:$0xff]  ;;  %v6763_v53 = vld [vmem:[%s9166_s2 + $0x2a0] sm:$0xff]  }
 0x192   :  { %1123 = vst [vmem:[#allocation2 + $0x28] sm:$0xff] %v1115_v63  ;;  %v6265_v54 = vpop.f32.mrb[31].mxu0  ;;  %v1144_v29 = vrot.slane %v1128_v49, 1  ;;  %v1238_v50 = vpack.c.bf16 %v1128_v49, %v1126_v61  ;;  %v1136_v23 = vrot.slane %v1132_v1, 7  ;;  %v1239_v43 = vpack.c.bf16 %v1132_v1, %v1130_v62  ;;  %v6764_v61 = vld [vmem:[%s9166_s2 + $0x360] sm:$0xff]   ;;  %v6766_v59 = vld [vmem:[%s9166_s2 + $0x2e8] sm:$0xff]  }
 0x193   :  { %v1088_v27 = vadd.f32 %v6263_v47, %v1023_v4  ;;  %v6266_v28 = vadd.f32 %v6265_v54, %v6264_v51  ;;  %v6767_v48 = vld [vmem:[%s9166_s2 + $0x2a8] sm:$0xff]   ;;  %v6770_v63 = vld [vmem:[%s9166_s2 + $0x2f0] sm:$0xff]   ;;  %v6776_v1 = vld [vmem:[%s9166_s2 + $0x378] sm:$0xff]   ;;  %vm1958_vm8 = vcmask 1043456  }
 0x194   :  { %1469 = vmatprep.mubr.bf16.mxu1 %v1238_v50  ;;  %v1137_v39 = vsel %vm40_vm1, %v1135_v14, %v1136_v23  ;;  %v1145_v37 = vsel %vm57_vm0, %v1143_v20, %v1144_v29  ;;  %v6768_v62 = vld [vmem:[%s9166_s2 + $0x368] sm:$0xff]   ;;  %v6772_v47 = vld [vmem:[%s9166_s2 + $0x370] sm:$0xff]   ;;  %v6774_v20 = vld [vmem:[%s9166_s2 + $0x2f8] sm:$0xff]  }
 0x195   :  { %vm1100_vm12 = vcmp.ge.f32.partialorder %v1088_v27, 0.0  ;;  %v1108_v55 = vmul.f32 0.2, %v1088_v27  ;;  %v1091_v11 = vadd.f32 %v6266_v28, %v1026_v5  ;;  %v5698_v21 = vpack.c.bf16 %v1137_v39, %v1135_v14  ;;  %v6746_v5 = vld [vmem:[%s9166_s2 + $0x2c0] sm:$0xff]   ;;  %v6769_v32 = vld [vmem:[%s9166_s2 + $0x328] sm:$0xff]   ;;  %v6771_v51 = vld [vmem:[%s9166_s2 + $0x2b0] sm:$0xff]  }
 0x196   :  { %v5705_v33 = vpack.c.bf16 %v1144_v29, %v1145_v37  ;;  %6323 = vmatprep.subr.bf16.mxu1 %v6746_v5  ;;  %v6773_v49 = vld [vmem:[%s9166_s2 + $0x330] sm:$0xff]   ;;  %v6775_v54 = vld [vmem:[%s9166_s2 + $0x2b8] sm:$0xff]   ;;  %v6778_v50 = vld [vmem:[%s9166_s2 + $0x3c0] sm:$0xff]  }
 0x197   :  { %v1116_v8 = vsel %vm1100_vm12, %v1088_v27, %v1108_v55  ;;  %vm1101_vm14 = vcmp.ge.f32.partialorder %v1091_v11, 0.0  ;;  %v1109_v19 = vmul.f32 0.2, %v1091_v11  ;;  %5699 = vmatmul.mubr.msk.bf16.vlgmr.msra.gmra.mrb[16].mxu1 %vm7732_vm11, %v5698_v21  ;;  %v6777_v29 = vld [vmem:[%s9166_s2 + $0x338] sm:$0xff]   ;;  %v6780_v14 = vld [vmem:[%s9166_s2 + $0x440] sm:$0xff]  }
 0x198   :  { %1124 = vst [vmem:[#allocation2 + $0x30] sm:$0xff] %v1116_v8  ;;  %5706 = vmatprep.mubr.msk.bf16.mxu0 %vm7738_vm13, %v5705_v33  ;;  %6324 = vmatpush3.bf16.msra.mxu1 %v6747_v12 }
 0x199   :  { %v1117_v10 = vsel %vm1101_vm14, %v1091_v11, %v1109_v19  ;;  %1519 = vmatmul.mubr.bf16.vlgmr.msra.gmra.mrb[32].mxu0 %v1239_v43  ;;  %v1150_v41 = vld [vmem:[#allocation2 + $0x20] ss:$2 sm:$0xff]  ;;  %v1154_v44 = vld [vmem:[#allocation2 + $0x21] ss:$2 sm:$0xff]  ;;  %6325 = vmatprep.subr.bf16.mxu1 %v6750_v18 }
 0x19a   :  { %1125 = vst [vmem:[#allocation2 + $0x38] sm:$0xff] %v1117_v10  ;;  %v1167_v30 = vrot.slane %v1150_v41, 1  ;;  %v1159_v16 = vrot.slane %v1154_v44, 7  ;;  %6346 = vmatpush3.bf16.msra.mxu0 %v6749_v17 }
 0x19b   :  { %6347 = vmatprep.subr.bf16.mxu0 %v6752_v52 }
 0x19c   :  { %6326 = vmatpush3.bf16.msra.mxu1 %v6751_v24 }
 0x19d   :  { %6327 = vmatprep.subr.bf16.mxu1 %v6754_v0 }
 0x19e   :  { %6348 = vmatpush3.bf16.msra.mxu0 %v6753_v3 }
 0x19f   :  { %6349 = vmatprep.subr.bf16.mxu0 %v6756_v57 }
 0x1a0   :  { %6328 = vmatpush3.bf16.msra.mxu1 %v6755_v58 }
 0x1a1   :  { %v1152_v46 = vld [vmem:[#allocation2 + $0x30] ss:$2 sm:$0xff]  ;;  %v1156_v38 = vld [vmem:[#allocation2 + $0x31] ss:$2 sm:$0xff]  ;;  %6329 = vmatprep.subr.bf16.mxu1 %v6758_v7 }
 0x1a2   :  { %v1168_v13 = vrot.slane %v1152_v46, 1  ;;  %v1242_v40 = vpack.c.bf16 %v1152_v46, %v1150_v41  ;;  %v1160_v4 = vrot.slane %v1156_v38, 7  ;;  %v1243_v36 = vpack.c.bf16 %v1156_v38, %v1154_v44  ;;  %6350 = vmatpush3.bf16.msra.mxu0 %v6757_v45 }
 0x1a3   :  { %6351 = vmatprep.subr.bf16.mxu0 %v6760_v2 }
 0x1a4   :  { %1477 = vmatprep.mubr.bf16.mxu1 %v1242_v40  ;;  %v1161_v6 = vsel %vm40_vm1, %v1159_v16, %v1160_v4  ;;  %v1169_v25 = vsel %vm57_vm0, %v1167_v30, %v1168_v13  ;;  %6330 = vmatpush3.bf16.msra.mxu1 %v6759_v56 }
 0x1a5   :  { %v5702_v35 = vpack.c.bf16 %v1161_v6, %v1159_v16  ;;  %v5708_v26 = vpack.c.bf16 %v1168_v13, %v1169_v25  ;;  %6331 = vmatprep.subr.bf16.mxu1 %v6762_v22  ;;  %v6779_v22 = vld [vmem:[%s9166_s2 + $0x380] sm:$0xff]  }
 0x1a6   :  { %6352 = vmatpush3.bf16.msra.mxu0 %v6761_v9 }
 0x1a7   :  { %5703 = vmatmul.mubr.msk.bf16.gmra.mrb[20].mxu1 %vm7732_vm11, %v5702_v35  ;;  %5709 = vmatprep.mubr.msk.bf16.mxu0 %vm7738_vm13, %v5708_v26 }
 0x1a8   :  { %1527 = vmatmul.mubr.bf16.gmra.mrb[36].mxu0 %v1243_v36  ;;  %6332 = vmatpush3.bf16.msra.mxu1 %v6763_v53 }
 0x1a9   :  { %6353 = vmatprep.subr.bf16.mxu0 %v6764_v61  ;;  %6333 = vmatprep.subr.bf16.mxu1 %v6766_v59 }
 0x1aa   :  { %6354 = vmatpush3.bf16.msra.mxu0 %v6765_v60  ;;  %v6781_v60 = vld [vmem:[%s9166_s2 + $0x400] sm:$0xff]  }
 0x1ab   :  { %6355 = vmatprep.subr.bf16.mxu0 %v6768_v62  ;;  %v6784_v62 = vld [vmem:[%s9166_s2 + $0x448] sm:$0xff]  }
 0x1ac   :  { %6334 = vmatpush3.bf16.msra.mxu1 %v6767_v48  ;;  %v6783_v48 = vld [vmem:[%s9166_s2 + $0x388] sm:$0xff]  }
 0x1ad   :  { %6335 = vmatprep.subr.bf16.mxu1 %v6770_v63  ;;  %v6786_v63 = vld [vmem:[%s9166_s2 + $0x3d0] sm:$0xff]  }
 0x1ae   :  { %6356 = vmatpush3.bf16.msra.mxu0 %v6769_v32  ;;  %v6785_v32 = vld [vmem:[%s9166_s2 + $0x408] sm:$0xff]  }
 0x1af   :  { %6357 = vmatprep.subr.bf16.mxu0 %v6772_v47  ;;  %v6787_v47 = vld [vmem:[%s9166_s2 + $0x390] sm:$0xff]  }
 0x1b0   :  { %6336 = vmatpush3.bf16.msra.mxu1 %v6771_v51  ;;  %v6788_v51 = vld [vmem:[%s9166_s2 + $0x450] sm:$0xff]  }
 0x1b1   :  { %6337 = vmatprep.subr.bf16.mxu1 %v6774_v20  ;;  %v6790_v20 = vld [vmem:[%s9166_s2 + $0x3d8] sm:$0xff]  }
 0x1b2   :  { %6358 = vmatpush3.bf16.msra.mxu0 %v6773_v49  ;;  %v6789_v49 = vld [vmem:[%s9166_s2 + $0x410] sm:$0xff]  }
 0x1b3   :  { %6359 = vmatprep.subr.bf16.mxu0 %v6776_v1  ;;  %v6791_v1 = vld [vmem:[%s9166_s2 + $0x398] sm:$0xff]  }
 0x1b4   :  { %6338 = vmatpush3.bf16.msra.mxu1 %v6775_v54  ;;  %v6792_v54 = vld [vmem:[%s9166_s2 + $0x458] sm:$0xff]  }
 0x1b5   :  { %6367 = vmatprep.subr.bf16.mxu1 %v6778_v50  ;;  %v6794_v50 = vld [vmem:[%s9166_s2 + $0x3e0] sm:$0xff]  }
 0x1b6   :  { %6360 = vmatpush3.bf16.msra.mxu0 %v6777_v29  ;;  %v6793_v29 = vld [vmem:[%s9166_s2 + $0x418] sm:$0xff]  }
 0x1b7   :  { %6389 = vmatprep.subr.bf16.mxu0 %v6780_v14  ;;  %v6795_v14 = vld [vmem:[%s9166_s2 + $0x3a0] sm:$0xff]  }
 0x26a   :  { %v6283_v23 = vpop.f32.mrb[16].mxu1 }
 0x26b   :  { %v6284_v27 = vpop.f32.mrb[17].mxu1 }
 0x26c   :  { %v6285_v28 = vadd.f32 %v6284_v27, %v6283_v23  ;;  %v6311_v39 = vpop.f32.mrb[32].mxu0  ;;  %v6286_v34 = vpop.f32.mrb[18].mxu1  ;;  %v6796_v23 = vld [vmem:[%s9166_s2 + $0x460] sm:$0xff]  }
 0x26d   :  { %v6312_v37 = vpop.f32.mrb[33].mxu0  ;;  %v6287_v55 = vpop.f32.mrb[19].mxu1  ;;  %v6797_v27 = vld [vmem:[%s9166_s2 + $0x420] sm:$0xff]  }
 0x26e   :  { %v6313_v11 = vadd.f32 %v6312_v37, %v6311_v39  ;;  %v6288_v21 = vadd.f32 %v6287_v55, %v6286_v34  ;;  %v6314_v31 = vpop.f32.mrb[34].mxu0  ;;  %v6800_v39 = vld [vmem:[%s9166_s2 + $0x468] sm:$0xff]   ;;  %v6802_v55 = vld [vmem:[%s9166_s2 + $0x3f0] sm:$0xff]  }
 0x26f   :  { %v6315_v33 = vpop.f32.mrb[35].mxu0  ;;  %v6799_v34 = vld [vmem:[%s9166_s2 + $0x3a8] sm:$0xff]  }
 0x270   :  { %v1521_v8 = vadd.f32 %v6313_v11, %v6285_v28  ;;  %v6316_v19 = vadd.f32 %v6315_v33, %v6314_v31  ;;  %v6798_v28 = vld [vmem:[%s9166_s2 + $0x3e8] sm:$0xff]   ;;  %v6804_v11 = vld [vmem:[%s9166_s2 + $0x470] sm:$0xff]   ;;  %v6806_v33 = vld [vmem:[%s9166_s2 + $0x3f8] sm:$0xff]  }
 0x271   :  { %v6801_v37 = vld [vmem:[%s9166_s2 + $0x428] sm:$0xff]   ;;  %v6805_v31 = vld [vmem:[%s9166_s2 + $0x430] sm:$0xff]  }
 0x272   :  { %vm1535_vm15 = vcmp.ge.f32.partialorder %v1521_v8, 0.0  ;;  %v1539_v43 = vmul.f32 0.2, %v1521_v8  ;;  %v1524_v10 = vadd.f32 %v6316_v19, %v6288_v21  ;;  %v6803_v21 = vld [vmem:[%s9166_s2 + $0x3b0] sm:$0xff]   ;;  %v6808_v19 = vld [vmem:[%s9166_s2 + $0x478] sm:$0xff]  }
 0x274   :  { %v1543_v41 = vsel %vm1535_vm15, %v1521_v8, %v1539_v43  ;;  %vm1536_vm2 = vcmp.ge.f32.partialorder %v1524_v10, 0.0  ;;  %v1540_v44 = vmul.f32 0.2, %v1524_v10  ;;  %v6807_v8 = vld [vmem:[%s9166_s2 + $0x3b8] sm:$0xff]  }
 0x275   :  { %1547 = vst [vmem:[#allocation3] sm:$0xff] %v1543_v41  ;;  %v6809_v43 = vld [vmem:[%s9166_s2 + $0x438] sm:$0xff]   ;;  %v7957_v41 = vld [vmem:[%s9167_s3 + $0x820] sm:$0xff] }
 0x276   :  { %v1544_v46 = vsel %vm1536_vm2, %v1524_v10, %v1540_v44  ;;  %v7952_v10 = vld [vmem:[%s9167_s3 + $0x800] sm:$0xff] }
 0x277   :  { %1548 = vst [vmem:[#allocation3 + $0x8] sm:$0xff] %v1544_v46  ;;  %v5782_v44 = vcombine.low %v7952_v10, %v7957_v41  ;;  %v5783_v46 = vcombine.high %v7952_v10, %v7957_v41 }
 0x27a   :  { %v6289_v30 = vpop.f32.mrb[20].mxu1 }
 0x27b   :  { %v6290_v38 = vpop.f32.mrb[21].mxu1  ;;  %v6317_v13 = vpop.f32.mrb[36].mxu0 }
 0x27c   :  { %v6291_v40 = vadd.f32 %v6290_v38, %v6289_v30  ;;  %v6292_v16 = vpop.f32.mrb[22].mxu1  ;;  %v6318_v4 = vpop.f32.mrb[37].mxu0  ;;  %v7966_v30 = vld [vmem:[%s9167_s3] sm:$0xff] }
 0x27d   :  { %v6319_v6 = vadd.f32 %v6318_v4, %v6317_v13  ;;  %v6293_v25 = vpop.f32.mrb[23].mxu1  ;;  %v6320_v35 = vpop.f32.mrb[38].mxu0  ;;  %v7971_v38 = vld [vmem:[%s9167_s3 + $0x20] sm:$0xff] }
 0x27e   :  { %v6294_v26 = vadd.f32 %v6293_v25, %v6292_v16  ;;  %v6321_v36 = vpop.f32.mrb[39].mxu0  ;;  %v1551_v3 = vld [vmem:[#allocation3] ss:$2 sm:$0xff]  ;;  %v1553_v0 = vld [vmem:[#allocation3 + $0x1] ss:$2 sm:$0xff]  ;;  %v5794_v13 = vcombine.low %v7966_v30, %v7971_v38 }
 0x27f   :  { %v1529_v5 = vadd.f32 %v6319_v6, %v6291_v40  ;;  %v6322_v12 = vadd.f32 %v6321_v36, %v6320_v35  ;;  %v1559_v58 = vrot.slane %v1551_v3, 1  ;;  %v1555_v2 = vrot.slane %v1553_v0, 7 }
 0x280   :  { %v5795_v40 = vcombine.high %v7966_v30, %v7971_v38  ;;  %v2363_v38 = vld [vmem:[%s9167_s3 + $0x100] sm:$0xff] }
 0x281   :  { %vm1537_vm3 = vcmp.ge.f32.partialorder %v1529_v5, 0.0  ;;  %v1541_v15 = vmul.f32 0.2, %v1529_v5  ;;  %v1532_v17 = vadd.f32 %v6322_v12, %v6294_v26 }
 0x283   :  { %v1545_v18 = vsel %vm1537_vm3, %v1529_v5, %v1541_v15  ;;  %vm1538_vm4 = vcmp.ge.f32.partialorder %v1532_v17, 0.0  ;;  %v1542_v24 = vmul.f32 0.2, %v1532_v17 }
 0x284   :  { %1549 = vst [vmem:[#allocation3 + $0x10] sm:$0xff] %v1545_v18 }
 0x285   :  { %v1546_v52 = vsel %vm1538_vm4, %v1532_v17, %v1542_v24 }
 0x286   :  { %1550 = vst [vmem:[#allocation3 + $0x18] sm:$0xff] %v1546_v52 }
 0x28d   :  { %v1563_v57 = vld [vmem:[#allocation3 + $0x10] ss:$2 sm:$0xff]  ;;  %v1565_v45 = vld [vmem:[#allocation3 + $0x11] ss:$2 sm:$0xff] }
 0x28e   :  { %v1571_v7 = vrot.slane %v1563_v57, 1  ;;  %v1639_v56 = vpack.c.bf16 %v1563_v57, %v1551_v3  ;;  %v1567_v9 = vrot.slane %v1565_v45, 7  ;;  %v1640_v59 = vpack.c.bf16 %v1565_v45, %v1553_v0 }
 0x290   :  { %1866 = vmatprep.mubr.bf16.mxu1 %v1639_v56  ;;  %v5745_v53 = vpack.c.bf16 %v1567_v9, %v1555_v2  ;;  %v5748_v61 = vpack.c.bf16 %v1571_v7, %v1559_v58 }
 0x292   :  { %5746 = vmatmul.mubr.msk.bf16.vlgmr.msra.gmra.mrb[24].mxu1 %vm5744_vm5, %v5745_v53  ;;  %5749 = vmatprep.mubr.msk.bf16.mxu0 %vm5747_vm6, %v5748_v61 }
 0x293   :  { %1908 = vmatmul.mubr.bf16.vlgmr.msra.gmra.mrb[40].mxu0 %v1640_v59  ;;  %6368 = vmatpush3.bf16.msra.mxu1 %v6779_v22 }
 0x294   :  { %6390 = vmatpush3.bf16.msra.mxu0 %v6781_v60  ;;  %6369 = vmatprep.subr.bf16.mxu1 %v6782_v42 }
 0x295   :  { %6391 = vmatprep.subr.bf16.mxu0 %v6784_v62 }
 0x297   :  { %6370 = vmatpush3.bf16.msra.mxu1 %v6783_v48 }
 0x298   :  { %6392 = vmatpush3.bf16.msra.mxu0 %v6785_v32  ;;  %6371 = vmatprep.subr.bf16.mxu1 %v6786_v63 }
 0x299   :  { %6393 = vmatprep.subr.bf16.mxu0 %v6788_v51 }
 0x29b   :  { %6372 = vmatpush3.bf16.msra.mxu1 %v6787_v47 }
 0x29c   :  { %6394 = vmatpush3.bf16.msra.mxu0 %v6789_v49  ;;  %6373 = vmatprep.subr.bf16.mxu1 %v6790_v20  ;;  %v2593_v49 = vld [vmem:[%s9167_s3 + $0x808] sm:$0xff] }
 0x29d   :  { %6395 = vmatprep.subr.bf16.mxu0 %v6792_v54  ;;  %v2597_v20 = vld [vmem:[%s9167_s3 + $0x828] sm:$0xff] }
 0x29e   :  { %v5784_v41 = vcombine.low %v2593_v49, %v2597_v20 }
 0x29f   :  { %6374 = vmatpush3.bf16.msra.mxu1 %v6791_v1 }
 0x2a0   :  { %6396 = vmatpush3.bf16.msra.mxu0 %v6793_v29  ;;  %6375 = vmatprep.subr.bf16.mxu1 %v6794_v50  ;;  %v2339_v50 = vld [vmem:[%s9167_s3 + $0x40] sm:$0xff] }
 0x2a1   :  { %6397 = vmatprep.subr.bf16.mxu0 %v6796_v23 }
 0x2a3   :  { %6376 = vmatpush3.bf16.msra.mxu1 %v6795_v14  ;;  %v2343_v14 = vld [vmem:[%s9167_s3 + $0x60] sm:$0xff] }
 0x2a4   :  { %6398 = vmatpush3.bf16.msra.mxu0 %v6797_v27  ;;  %6377 = vmatprep.subr.bf16.mxu1 %v6798_v28 }
 0x2a5   :  { %6399 = vmatprep.subr.bf16.mxu0 %v6800_v39  ;;  %v5785_v39 = vcombine.high %v2593_v49, %v2597_v20 }
 0x2a7   :  { %6378 = vmatpush3.bf16.msra.mxu1 %v6799_v34 }
 0x2a8   :  { %6400 = vmatpush3.bf16.msra.mxu0 %v6801_v37  ;;  %6379 = vmatprep.subr.bf16.mxu1 %v6802_v55  ;;  %v5803_v37 = vcombine.high %v2339_v50, %v2343_v14  ;;  %v2591_v55 = vld [vmem:[%s9168_s1] sm:$0x3] }
 0x2a9   :  { %6401 = vmatprep.subr.bf16.mxu0 %v6804_v11  ;;  %v2347_v11 = vld [vmem:[%s9167_s3 + $0x80] sm:$0xff] }
 0x2ab   :  { %6380 = vmatpush3.bf16.msra.mxu1 %v6803_v21  ;;  %v2351_v21 = vld [vmem:[%s9167_s3 + $0xa0] sm:$0xff] }
 0x2ac   :  { %6402 = vmatpush3.bf16.msra.mxu0 %v6805_v31  ;;  %6381 = vmatprep.subr.bf16.mxu1 %v6806_v33  ;;  %v6929_v31 = vmov 0   ;;  %v2594_v33 = vld [vmem:[%s9167_s3 + $0x810] sm:$0xff]  ;;  %v5811_v10 = vcombine.high %v2347_v11, %v2351_v21 }
 0x2ad   :  { %6403 = vmatprep.subr.bf16.mxu0 %v6808_v19  ;;  %v5802_v19 = vcombine.low %v2339_v50, %v2343_v14  ;;  %v2483_v14 = vld [vmem:[%s9167_s3 + $0x4c0] sm:$0xff] }
 0x2af   :  { %6382 = vmatpush3.bf16.msra.mxu1 %v6807_v8  ;;  %v2598_v8 = vld [vmem:[%s9167_s3 + $0x830] sm:$0xff] }
 0x2b0   :  { %6404 = vmatpush3.bf16.msra.mxu0 %v6809_v43  ;;  %2645 = vmatprep.subr.bf16.mxu1 %v5783_v46  ;;  %v8016_v43 = vpack.c.bf16 %v2591_v55, %v2591_v55  ;;  %v2359_v46 = vld [vmem:[%s9167_s3 + $0xe0] sm:$0xff] }
 0x2b1   :  { %4089 = vmatprep.subr.bf16.mxu0 %v5795_v40  ;;  %v5787_v40 = vcombine.high %v2594_v33, %v2598_v8  ;;  %v2495_v55 = vld [vmem:[%s9167_s3 + $0x520] sm:$0xff] }
 0x365   :  { %v6339_v16 = vpop.f32.mrb[24].mxu1 }
 0x366   :  { %v6340_v4 = vpop.f32.mrb[25].mxu1  ;;  %v6361_v6 = vpop.f32.mrb[40].mxu0 }
 0x367   :  { %v6341_v25 = vadd.f32 %v6340_v4, %v6339_v16  ;;  %v6342_v35 = vpop.f32.mrb[26].mxu1  ;;  %v6362_v26 = vpop.f32.mrb[41].mxu0  ;;  %v5810_v16 = vcombine.low %v2347_v11, %v2351_v21  ;;  %v2595_v4 = vld [vmem:[%s9167_s3 + $0x818] sm:$0xff] }
 0x368   :  { %v6363_v36 = vadd.f32 %v6362_v26, %v6361_v6  ;;  %v6343_v5 = vpop.f32.mrb[27].mxu1  ;;  %v6364_v12 = vpop.f32.mrb[42].mxu0  ;;  %v2599_v6 = vld [vmem:[%s9167_s3 + $0x838] sm:$0xff]  ;;  %v5786_v26 = vcombine.low %v2594_v33, %v2598_v8  ;;  %v2499_v33 = vld [vmem:[%s9167_s3 + $0x540] sm:$0xff] }
 0x369   :  { %v6344_v15 = vadd.f32 %v6343_v5, %v6342_v35  ;;  %v6365_v17 = vpop.f32.mrb[43].mxu0  ;;  %v2375_v5 = vld [vmem:[%s9167_s3 + $0x160] sm:$0xff] }
 0x36a   :  { %v1910_v18 = vadd.f32 %v6363_v36, %v6341_v25  ;;  %v6366_v24 = vadd.f32 %v6365_v17, %v6364_v12  ;;  %v2371_v36 = vld [vmem:[%s9167_s3 + $0x140] sm:$0xff]  ;;  %v5789_v12 = vcombine.high %v2595_v4, %v2599_v6 }
 0x36b   :  { %v5835_v17 = vcombine.high %v2371_v36, %v2375_v5  ;;  %v2503_v8 = vld [vmem:[%s9167_s3 + $0x560] sm:$0xff] }
 0x36c   :  { %vm1916_vm0 = vcmp.ge.f32.partialorder %v1910_v18, 0.0  ;;  %v1918_v52 = vmul.f32 0.2, %v1910_v18  ;;  %v1913_v3 = vadd.f32 %v6366_v24, %v6344_v15  ;;  %v2383_v24 = vld [vmem:[%s9167_s3 + $0x1a0] sm:$0xff] }
 0x36e   :  { %v1920_v0 = vsel %vm1916_vm0, %v1910_v18, %v1918_v52  ;;  %vm1917_vm7 = vcmp.ge.f32.partialorder %v1913_v3, 0.0  ;;  %v1919_v58 = vmul.f32 0.2, %v1913_v3  ;;  %v2379_v18 = vld [vmem:[%s9167_s3 + $0x180] sm:$0xff] }
 0x36f   :  { %1922 = vst [vmem:[#allocation4] sm:$0xff] %v1920_v0  ;;  %v2459_v52 = vld [vmem:[%s9167_s3 + $0x400] sm:$0xff]  ;;  %v5834_v0 = vcombine.low %v2371_v36, %v2375_v5 }
 0x370   :  { %v1921_v57 = vsel %vm1917_vm7, %v1913_v3, %v1919_v58  ;;  %v2463_v3 = vld [vmem:[%s9167_s3 + $0x420] sm:$0xff]  ;;  %v5843_v58 = vcombine.high %v2379_v18, %v2383_v24 }
 0x371   :  { %1923 = vst [vmem:[#allocation4 + $0x8] sm:$0xff] %v1921_v57  ;;  %v5788_v57 = vcombine.low %v2595_v4, %v2599_v6  ;;  %v2527_v4 = vld [vmem:[%s9167_s3 + $0x620] sm:$0xff] }
 0x376   :  { %v1926_v45 = vld [vmem:[#allocation4 + $0x1] ss:$2 sm:$0xf]  ;;  %v1924_v7 = vld [vmem:[#allocation4] ss:$2 sm:$0xf] }
 0x377   :  { %v1928_v22 = vrot.slane %v1926_v45, 7  ;;  %v1932_v61 = vrot.slane %v1924_v7, 1 }
 0x378   :  { %v1937_v56 = vld [vmem:[#allocation4 + $0x8] ss:$2 sm:$0xf]  ;;  %v1939_v2 = vld [vmem:[#allocation4 + $0x9] ss:$2 sm:$0xf] }
 0x379   :  { %v1951_v9 = vrot.slane %v1937_v56, 4  ;;  %v1941_v53 = vrot.slane %v1939_v2, 7  ;;  %v1945_v60 = vrot.slane %v1937_v56, 1  ;;  %v1952_v59 = vrot.slane %v1939_v2, 4 }
 0x37a   :  { %v1930_v47 = vsel %vm40_vm1, 0.0, %v1928_v22  ;;  %v1935_v54 = vsel %vm1934_vm9, %v1932_v61, 0.0  ;;  %v5923_v56 = vcombine.high %v2459_v52, %v2463_v3  ;;  %v5842_v2 = vcombine.low %v2379_v18, %v2383_v24  ;;  %v2395_v22 = vld [vmem:[%s9167_s3 + $0x200] sm:$0xff] }
 0x37b   :  { %v1960_v42 = vsel %vm1958_vm8, %v1924_v7, %v1951_v9  ;;  %v1943_v48 = vsel %vm40_vm1, 0.0, %v1941_v53  ;;  %v1947_v63 = vsel %vm1934_vm9, %v1945_v60, 0.0  ;;  %v1961_v29 = vsel %vm1958_vm8, %v1926_v45, %v1952_v59  ;;  %v2387_v45 = vld [vmem:[%s9167_s3 + $0x1c0] sm:$0xff] }
 0x37c   :  { %v2028_v62 = vpack.c.bf16 %v1960_v42, %v1960_v42  ;;  %v1950_v32 = vrot.slane %v1943_v48, 4  ;;  %v1953_v51 = vrot.slane %v1947_v63, 4  ;;  %v2029_v34 = vpack.c.bf16 %v1961_v29, %v1961_v29  ;;  %v2391_v7 = vld [vmem:[%s9167_s3 + $0x1e0] sm:$0xff] }
 0x37d   :  { %v5851_v9 = vcombine.high %v2387_v45, %v2391_v7  ;;  %v2399_v53 = vld [vmem:[%s9167_s3 + $0x220] sm:$0xff]  ;;  %v5850_v59 = vcombine.low %v2387_v45, %v2391_v7  ;;  %v5922_v48 = vcombine.low %v2459_v52, %v2463_v3 }
 0x37e   :  { %2255 = vmatprep.mubr.bf16.mxu1 %v2028_v62  ;;  %v1959_v1 = vsel %vm1958_vm8, %v1930_v47, %v1950_v32  ;;  %v1962_v27 = vsel %vm1958_vm8, %v1935_v54, %v1953_v51  ;;  %v2467_v61 = vld [vmem:[%s9167_s3 + $0x440] sm:$0xff]  ;;  %v5859_v42 = vcombine.high %v2395_v22, %v2399_v53  ;;  %v5858_v49 = vcombine.low %v2395_v22, %v2399_v53 }
 0x37f   :  { %v2027_v23 = vpack.c.bf16 %v1959_v1, %v1959_v1  ;;  %v2030_v28 = vpack.c.bf16 %v1962_v27, %v1962_v27  ;;  %v2471_v60 = vld [vmem:[%s9167_s3 + $0x460] sm:$0xff] }
 0x380   :  { %v2403_v62 = vld [vmem:[%s9167_s3 + $0x240] sm:$0xff]  ;;  %v5931_v63 = vcombine.high %v2467_v61, %v2471_v60  ;;  %v5930_v1 = vcombine.low %v2467_v61, %v2471_v60 }
 0x381   :  { %2256 = vmatmul.mubr.bf16.vlgmr.msra.gmra.mrb[28].mxu1 %v2027_v23  ;;  %2295 = vmatprep.mubr.bf16.mxu0 %v2030_v28  ;;  %v2407_v32 = vld [vmem:[%s9167_s3 + $0x260] sm:$0xff] }
 0x382   :  { %2646 = vmatpush1.bf16.msra.mxu1 %v5782_v44  ;;  %2296 = vmatmul.mubr.bf16.vlgmr.msra.gmra.mrb[44].mxu0 %v2029_v34  ;;  %v2355_v44 = vld [vmem:[%s9167_s3 + $0xc0] sm:$0xff]  ;;  %v5867_v20 = vcombine.high %v2403_v62, %v2407_v32  ;;  %v5866_v27 = vcombine.low %v2403_v62, %v2407_v32 }
 0x383   :  { %2677 = vmatprep.mubr.bf16.mxu1 %v6929_v31  ;;  %2686 = vmatprep.subr.bf16.mxu1 %v5785_v39  ;;  %v5819_v30 = vcombine.high %v2355_v44, %v2359_v46  ;;  %v5818_v25 = vcombine.low %v2355_v44, %v2359_v46  ;;  %v2475_v47 = vld [vmem:[%s9167_s3 + $0x480] sm:$0xff]  ;;  %v5962_v44 = vcombine.low %v2499_v33, %v2503_v8 }
 0x384   :  { %4090 = vmatpush1.bf16.msra.mxu0 %v5794_v13  ;;  %v2367_v13 = vld [vmem:[%s9167_s3 + $0x120] sm:$0xff] }
 0x385   :  { %4091 = vmatprep.subr.bf16.mxu0 %v5803_v37  ;;  %v5827_v35 = vcombine.high %v2363_v38, %v2367_v13  ;;  %v5826_v15 = vcombine.low %v2363_v38, %v2367_v13  ;;  %v2479_v51 = vld [vmem:[%s9167_s3 + $0x4a0] sm:$0xff] }
 0x386   :  { %v2411_v54 = vld [vmem:[%s9167_s3 + $0x280] sm:$0xff]  ;;  %v5939_v50 = vcombine.high %v2475_v47, %v2479_v51  ;;  %v5938_v39 = vcombine.low %v2475_v47, %v2479_v51 }
 0x387   :  { %v2415_v29 = vld [vmem:[%s9167_s3 + $0x2a0] sm:$0xff] }
 0x388   :  { %4092 = vmatpush1.bf16.msra.mxu0 %v5802_v19  ;;  %v2487_v23 = vld [vmem:[%s9167_s3 + $0x4e0] sm:$0xff]  ;;  %v5875_v28 = vcombine.high %v2411_v54, %v2415_v29  ;;  %v5874_v11 = vcombine.low %v2411_v54, %v2415_v29 }
 0x389   :  { %5790 = vmatmul.mubr.msk.bf16.vlgmr.msra.gmra.mrb[32].mxu1 %vm2641_vm10, %v8016_v43  ;;  %4093 = vmatprep.subr.bf16.mxu0 %v5811_v10  ;;  %v5947_v34 = vcombine.high %v2483_v14, %v2487_v23  ;;  %v2491_v37 = vld [vmem:[%s9167_s3 + $0x500] sm:$0xff]  ;;  %v5946_v21 = vcombine.low %v2483_v14, %v2487_v23 }
 0x38a   :  { %2687 = vmatpush1.bf16.msra.mxu1 %v5784_v41  ;;  %2718 = vmatprep.mubr.bf16.mxu1 %v6929_v31  ;;  %v5954_v19 = vcombine.low %v2491_v37, %v2495_v55  ;;  %v2507_v10 = vld [vmem:[%s9167_s3 + $0x580] sm:$0xff] }
 0x38b   :  { %2727 = vmatprep.subr.bf16.mxu1 %v5787_v40  ;;  %v2511_v41 = vld [vmem:[%s9167_s3 + $0x5a0] sm:$0xff] }
 0x38c   :  { %4094 = vmatpush1.bf16.msra.mxu0 %v5810_v16  ;;  %v5971_v46 = vcombine.high %v2507_v10, %v2511_v41  ;;  %v2515_v40 = vld [vmem:[%s9167_s3 + $0x5c0] sm:$0xff] }
 0x38d   :  { %4095 = vmatprep.subr.bf16.mxu0 %v5819_v30  ;;  %v2519_v16 = vld [vmem:[%s9167_s3 + $0x5e0] sm:$0xff]  ;;  %v5970_v30 = vcombine.low %v2507_v10, %v2511_v41  ;;  %v2464_v41 = vld [vmem:[%s9167_s3 + $0x428] sm:$0xff] }
 0x38e   :  { %v5979_v38 = vcombine.high %v2515_v40, %v2519_v16  ;;  %v2523_v13 = vld [vmem:[%s9167_s3 + $0x600] sm:$0xff]  ;;  %v5978_v6 = vcombine.low %v2515_v40, %v2519_v16 }
 0x38f   :  { %v5986_v36 = vcombine.low %v2523_v13, %v2527_v4  ;;  %v2419_v52 = vld [vmem:[%s9167_s3 + $0x2c0] sm:$0xff] }
 0x390   :  { %4096 = vmatpush1.bf16.msra.mxu0 %v5818_v25  ;;  %v5987_v25 = vcombine.high %v2523_v13, %v2527_v4  ;;  %v2423_v3 = vld [vmem:[%s9167_s3 + $0x2e0] sm:$0xff] }
 0x391   :  { %5791 = vmatmul.mubr.msk.bf16.vlgmr.msra.gmra.mrb[36].mxu1 %vm2641_vm10, %v8016_v43  ;;  %4097 = vmatprep.subr.bf16.mxu0 %v5827_v35  ;;  %v2531_v35 = vld [vmem:[%s9167_s3 + $0x640] sm:$0xff]  ;;  %v5882_v45 = vcombine.low %v2419_v52, %v2423_v3 }
 0x392   :  { %2728 = vmatpush1.bf16.msra.mxu1 %v5786_v26  ;;  %2759 = vmatprep.mubr.bf16.mxu1 %v6929_v31  ;;  %v2535_v26 = vld [vmem:[%s9167_s3 + $0x660] sm:$0xff] }
 0x393   :  { %2768 = vmatprep.subr.bf16.mxu1 %v5789_v12  ;;  %v5995_v5 = vcombine.high %v2531_v35, %v2535_v26  ;;  %v2539_v12 = vld [vmem:[%s9167_s3 + $0x680] sm:$0xff] }
 0x394   :  { %4098 = vmatpush1.bf16.msra.mxu0 %v5826_v15  ;;  %v2543_v15 = vld [vmem:[%s9167_s3 + $0x6a0] sm:$0xff] }
 0x395   :  { %4099 = vmatprep.subr.bf16.mxu0 %v5835_v17  ;;  %v5994_v17 = vcombine.low %v2531_v35, %v2535_v26  ;;  %v6003_v18 = vcombine.high %v2539_v12, %v2543_v15  ;;  %v6002_v24 = vcombine.low %v2539_v12, %v2543_v15  ;;  %v2555_v22 = vld [vmem:[%s9167_s3 + $0x700] sm:$0xff] }
 0x396   :  { %v2559_v61 = vld [vmem:[%s9167_s3 + $0x720] sm:$0xff] }
 0x397   :  { %v2439_v62 = vld [vmem:[%s9167_s3 + $0x360] sm:$0xff] }
 0x398   :  { %4100 = vmatpush1.bf16.msra.mxu0 %v5834_v0  ;;  %v2547_v0 = vld [vmem:[%s9167_s3 + $0x6c0] sm:$0xff] }
 0x399   :  { %5792 = vmatmul.mubr.msk.bf16.vlgmr.msra.gmra.mrb[40].mxu1 %vm2641_vm10, %v8016_v43  ;;  %4101 = vmatprep.subr.bf16.mxu0 %v5843_v58  ;;  %v5883_v58 = vcombine.high %v2419_v52, %v2423_v3  ;;  %v2563_v32 = vld [vmem:[%s9167_s3 + $0x740] sm:$0xff] }
 0x39a   :  { %2769 = vmatpush1.bf16.msra.mxu1 %v5788_v57  ;;  %2800 = vmatprep.mubr.bf16.mxu1 %v6929_v31  ;;  %v5955_v31 = vcombine.high %v2491_v37, %v2495_v55  ;;  %v2551_v57 = vld [vmem:[%s9167_s3 + $0x6e0] sm:$0xff] }
 0x39b   :  { %4130 = vmatprep.subr.bf16.mxu1 %v5923_v56  ;;  %v6010_v7 = vcombine.low %v2547_v0, %v2551_v57  ;;  %v6011_v56 = vcombine.high %v2547_v0, %v2551_v57  ;;  %v2567_v47 = vld [vmem:[%s9167_s3 + $0x760] sm:$0xff] }
 0x39c   :  { %4102 = vmatpush1.bf16.msra.mxu0 %v5842_v2  ;;  %v2427_v2 = vld [vmem:[%s9167_s3 + $0x300] sm:$0xff] }
 0x39d   :  { %4103 = vmatprep.subr.bf16.mxu0 %v5851_v9  ;;  %v2431_v9 = vld [vmem:[%s9167_s3 + $0x320] sm:$0xff] }
 0x39e   :  { %v5891_v53 = vcombine.high %v2427_v2, %v2431_v9  ;;  %v5890_v60 = vcombine.low %v2427_v2, %v2431_v9  ;;  %v2447_v54 = vld [vmem:[%s9167_s3 + $0x3a0] sm:$0xff] }
 0x39f   :  { %v2571_v29 = vld [vmem:[%s9167_s3 + $0x780] sm:$0xff] }
 0x3a0   :  { %4104 = vmatpush1.bf16.msra.mxu0 %v5850_v59  ;;  %v6018_v59 = vcombine.low %v2555_v22, %v2559_v61  ;;  %v2575_v14 = vld [vmem:[%s9167_s3 + $0x7a0] sm:$0xff] }
 0x3a1   :  { %5793 = vmatmul.mubr.msk.bf16.vlgmr.msra.gmra.mrb[44].mxu1 %vm2641_vm10, %v8016_v43  ;;  %4105 = vmatprep.subr.bf16.mxu0 %v5859_v42  ;;  %v5963_v43 = vcombine.high %v2499_v33, %v2503_v8  ;;  %v6019_v42 = vcombine.high %v2555_v22, %v2559_v61  ;;  %v2451_v23 = vld [vmem:[%s9167_s3 + $0x3c0] sm:$0xff]  ;;  %v6034_v55 = vcombine.low %v2571_v29, %v2575_v14  ;;  %v8209_v8 = vld [vmem:[%s9167_s3 + $0x8] sm:$0xff] }
 0x3a2   :  { %4131 = vmatpush1.bf16.msra.mxu1 %v5922_v48  ;;  %v2435_v48 = vld [vmem:[%s9167_s3 + $0x340] sm:$0xff] }
 0x3a3   :  { %4132 = vmatprep.subr.bf16.mxu1 %v5931_v63  ;;  %v5899_v63 = vcombine.high %v2435_v48, %v2439_v62  ;;  %v5898_v51 = vcombine.low %v2435_v48, %v2439_v62  ;;  %v2583_v37 = vld [vmem:[%s9167_s3 + $0x7e0] sm:$0xff] }
 0x3a4   :  { %4106 = vmatpush1.bf16.msra.mxu0 %v5858_v49  ;;  %v6026_v49 = vcombine.low %v2563_v32, %v2567_v47 }
 0x3a5   :  { %4107 = vmatprep.subr.bf16.mxu0 %v5867_v20  ;;  %v6027_v20 = vcombine.high %v2563_v32, %v2567_v47  ;;  %v2472_v47 = vld [vmem:[%s9167_s3 + $0x468] sm:$0xff] }
 0x3a6   :  { %4133 = vmatpush1.bf16.msra.mxu1 %v5930_v1  ;;  %v2443_v1 = vld [vmem:[%s9167_s3 + $0x380] sm:$0xff] }
 0x3a7   :  { %4134 = vmatprep.subr.bf16.mxu1 %v5939_v50  ;;  %v5907_v50 = vcombine.high %v2443_v1, %v2447_v54 }
 0x3a8   :  { %4108 = vmatpush1.bf16.msra.mxu0 %v5866_v27  ;;  %v2455_v27 = vld [vmem:[%s9167_s3 + $0x3e0] sm:$0xff] }
 0x3a9   :  { %4109 = vmatprep.subr.bf16.mxu0 %v5875_v28  ;;  %v5906_v28 = vcombine.low %v2443_v1, %v2447_v54 }
 0x3aa   :  { %4135 = vmatpush1.bf16.msra.mxu1 %v5938_v39  ;;  %v6035_v39 = vcombine.high %v2571_v29, %v2575_v14  ;;  %v2348_v29 = vld [vmem:[%s9167_s3 + $0x88] sm:$0xff] }
 0x3ab   :  { %4136 = vmatprep.subr.bf16.mxu1 %v5947_v34  ;;  %v2579_v34 = vld [vmem:[%s9167_s3 + $0x7c0] sm:$0xff] }
 0x3ac   :  { %4110 = vmatpush1.bf16.msra.mxu0 %v5874_v11  ;;  %v5915_v11 = vcombine.high %v2451_v23, %v2455_v27  ;;  %v6042_v33 = vcombine.low %v2579_v34, %v2583_v37 }
 0x3ad   :  { %4111 = vmatprep.subr.bf16.mxu0 %v5883_v58 }
 0x3ae   :  { %4137 = vmatpush1.bf16.msra.mxu1 %v5946_v21  ;;  %v6043_v21 = vcombine.high %v2579_v34, %v2583_v37 }
 0x3af   :  { %4138 = vmatprep.subr.bf16.mxu1 %v5955_v31  ;;  %v5914_v31 = vcombine.low %v2451_v23, %v2455_v27  ;;  %v2476_v23 = vld [vmem:[%s9167_s3 + $0x488] sm:$0xff] }
 0x3b0   :  { %4112 = vmatpush1.bf16.msra.mxu0 %v5882_v45  ;;  %v2480_v27 = vld [vmem:[%s9167_s3 + $0x4a8] sm:$0xff] }
 0x3b1   :  { %4113 = vmatprep.subr.bf16.mxu0 %v5891_v53  ;;  %v5941_v37 = vcombine.high %v2476_v23, %v2480_v27 }
 0x3b2   :  { %4139 = vmatpush1.bf16.msra.mxu1 %v5954_v19  ;;  %v2336_v19 = vld [vmem:[%s9167_s3 + $0x28] sm:$0xff] }
 0x3b3   :  { %4140 = vmatprep.subr.bf16.mxu1 %v5963_v43  ;;  %v8217_v43 = vld [vmem:[%s9167_s3 + $0x408] sm:$0xff]  ;;  %v5797_v10 = vcombine.high %v8209_v8, %v2336_v19 }
 0x3b4   :  { %4114 = vmatpush1.bf16.msra.mxu0 %v5890_v60  ;;  %v5925_v40 = vcombine.high %v8217_v43, %v2464_v41  ;;  %v2340_v60 = vld [vmem:[%s9167_s3 + $0x48] sm:$0xff] }
 0x3b5   :  { %4115 = vmatprep.subr.bf16.mxu0 %v5899_v63  ;;  %v2468_v63 = vld [vmem:[%s9167_s3 + $0x448] sm:$0xff] }
 0x3b6   :  { %4141 = vmatpush1.bf16.msra.mxu1 %v5962_v44  ;;  %v5796_v44 = vcombine.low %v8209_v8, %v2336_v19  ;;  %v5933_v14 = vcombine.high %v2468_v63, %v2472_v47 }
 0x3b7   :  { %4142 = vmatprep.subr.bf16.mxu1 %v5971_v46  ;;  %v5924_v46 = vcombine.low %v8217_v43, %v2464_v41 }
 0x3b8   :  { %4116 = vmatpush1.bf16.msra.mxu0 %v5898_v51 }
 0x3b9   :  { %4117 = vmatprep.subr.bf16.mxu0 %v5907_v50  ;;  %v2352_v50 = vld [vmem:[%s9167_s3 + $0xa8] sm:$0xff] }
 0x3ba   :  { %4143 = vmatpush1.bf16.msra.mxu1 %v5970_v30  ;;  %v5813_v34 = vcombine.high %v2348_v29, %v2352_v50  ;;  %v5812_v19 = vcombine.low %v2348_v29, %v2352_v50 }
 0x3bb   :  { %4144 = vmatprep.subr.bf16.mxu1 %v5979_v38 }
 0x3bc   :  { %4118 = vmatpush1.bf16.msra.mxu0 %v5906_v28 }
 0x3bd   :  { %4119 = vmatprep.subr.bf16.mxu0 %v5915_v11  ;;  %v2360_v11 = vld [vmem:[%s9167_s3 + $0xe8] sm:$0xff] }
 0x3be   :  { %4145 = vmatpush1.bf16.msra.mxu1 %v5978_v6 }
 0x3bf   :  { %4146 = vmatprep.subr.bf16.mxu1 %v5987_v25 }
 0x3c0   :  { %4120 = vmatpush1.bf16.msra.mxu0 %v5914_v31  ;;  %v2484_v31 = vld [vmem:[%s9167_s3 + $0x4c8] sm:$0xff] }
 0x3c1   :  { %4171 = vmatprep.subr.bf16.mxu0 %v5797_v10  ;;  %v5940_v10 = vcombine.low %v2476_v23, %v2480_v27  ;;  %v2396_v23 = vld [vmem:[%s9167_s3 + $0x208] sm:$0xff] }
 0x3c2   :  { %4147 = vmatpush1.bf16.msra.mxu1 %v5986_v36  ;;  %v2400_v27 = vld [vmem:[%s9167_s3 + $0x228] sm:$0xff] }
 0x3c3   :  { %4148 = vmatprep.subr.bf16.mxu1 %v5995_v5 }
 0x3c6   :  { %4149 = vmatpush1.bf16.msra.mxu1 %v5994_v17 }
 0x3c7   :  { %4150 = vmatprep.subr.bf16.mxu1 %v6003_v18 }
 0x3ca   :  { %4151 = vmatpush1.bf16.msra.mxu1 %v6002_v24 }
 0x3cb   :  { %4152 = vmatprep.subr.bf16.mxu1 %v6011_v56 }
 0x3ce   :  { %4153 = vmatpush1.bf16.msra.mxu1 %v6010_v7 }
 0x3cf   :  { %4154 = vmatprep.subr.bf16.mxu1 %v6019_v42 }
 0x3d2   :  { %4155 = vmatpush1.bf16.msra.mxu1 %v6018_v59  ;;  %v2344_v59 = vld [vmem:[%s9167_s3 + $0x68] sm:$0xff] }
 0x3d3   :  { %4156 = vmatprep.subr.bf16.mxu1 %v6027_v20  ;;  %v5805_v54 = vcombine.high %v2340_v60, %v2344_v59  ;;  %v5804_v28 = vcombine.low %v2340_v60, %v2344_v59 }
 0x3d6   :  { %4157 = vmatpush1.bf16.msra.mxu1 %v6026_v49 }
 0x3d7   :  { %4158 = vmatprep.subr.bf16.mxu1 %v6035_v39  ;;  %v5932_v39 = vcombine.low %v2468_v63, %v2472_v47  ;;  %v2516_v63 = vld [vmem:[%s9167_s3 + $0x5c8] sm:$0xff] }
 0x3d8   :  { %v2520_v47 = vld [vmem:[%s9167_s3 + $0x5e8] sm:$0xff] }
 0x3da   :  { %4159 = vmatpush1.bf16.msra.mxu1 %v6034_v55  ;;  %v2356_v55 = vld [vmem:[%s9167_s3 + $0xc8] sm:$0xff] }
 0x3db   :  { %4160 = vmatprep.subr.bf16.mxu1 %v6043_v21  ;;  %v5821_v41 = vcombine.high %v2356_v55, %v2360_v11 }
 0x3de   :  { %4161 = vmatpush1.bf16.msra.mxu1 %v6042_v33  ;;  %v2488_v33 = vld [vmem:[%s9167_s3 + $0x4e8] sm:$0xff] }
 0x3df   :  { %4212 = vmatprep.subr.bf16.mxu1 %v5925_v40  ;;  %v2364_v40 = vld [vmem:[%s9167_s3 + $0x108] sm:$0xff] }
 0x454   :  { %v6383_v16 = vpop.f32.mrb[28].mxu1 }
 0x455   :  { %v6384_v30 = vpop.f32.mrb[29].mxu1  ;;  %v6405_v13 = vpop.f32.mrb[44].mxu0 }
 0x456   :  { %v6385_v38 = vadd.f32 %v6384_v30, %v6383_v16  ;;  %v6386_v4 = vpop.f32.mrb[30].mxu1  ;;  %v6406_v6 = vpop.f32.mrb[45].mxu0  ;;  %v2368_v16 = vld [vmem:[%s9167_s3 + $0x128] sm:$0xff] }
 0x457   :  { %v6387_v25 = vpop.f32.mrb[31].mxu1  ;;  %v6407_v35 = vadd.f32 %v6406_v6, %v6405_v13  ;;  %v6408_v26 = vpop.f32.mrb[46].mxu0  ;;  %v2492_v30 = vld [vmem:[%s9167_s3 + $0x508] sm:$0xff]  ;;  %v5820_v13 = vcombine.low %v2356_v55, %v2360_v11  ;;  %v5948_v4 = vcombine.low %v2484_v31, %v2488_v33  ;;  %v5829_v6 = vcombine.high %v2364_v40, %v2368_v16 }
 0x458   :  { %v6409_v36 = vpop.f32.mrb[47].mxu0  ;;  %v2372_v26 = vld [vmem:[%s9167_s3 + $0x148] sm:$0xff]  ;;  %v5861_v55 = vcombine.high %v2396_v23, %v2400_v27 }
 0x459   :  { %v2298_v5 = vadd.f32 %v6407_v35, %v6385_v38  ;;  %v2496_v38 = vld [vmem:[%s9167_s3 + $0x528] sm:$0xff] }
 0x45a   :  { %v5957_v35 = vcombine.high %v2492_v30, %v2496_v38  ;;  %v2376_v36 = vld [vmem:[%s9167_s3 + $0x168] sm:$0xff] }
 0x45b   :  { %vm2303_vm11 = vcmp.ge.f32.partialorder %v2298_v5, 0.0  ;;  %v2304_v12 = vmul.f32 0.2, %v2298_v5 }
 0x45c   :  { %v8226_v58 = vpop.f32.mrb[32].mxu1 }
 0x45d   :  { %v2305_v15 = vsel %vm2303_vm11, %v2298_v5, %v2304_v12  ;;  %v8229_v2 = vpop.f32.mrb[33].mxu1  ;;  %v2500_v12 = vld [vmem:[%s9167_s3 + $0x548] sm:$0xff] }
 0x45e   :  { %2306 = vst [vmem:[#allocation5] sm:$0xff] %v2305_v15  ;;  %v2683_v42 = vpop.f32.mrb[34].mxu1  ;;  %v2504_v15 = vld [vmem:[%s9167_s3 + $0x568] sm:$0xff] }
 0x45f   :  { %v2684_v51 = vpop.f32.mrb[35].mxu1  ;;  %v2388_v42 = vld [vmem:[%s9167_s3 + $0x1c8] sm:$0xff] }
 0x464   :  { %v8278_v21 = vpop.f32.mrb[36].mxu1 }
 0x465   :  { %v2312_v17 = vld [vmem:[#allocation5 + $0x5] sm:$0x1]  ;;  %v2314_v24 = vld [vmem:[#allocation5 + $0x7] sm:$0x1]  ;;  %v2308_v52 = vld [vmem:[#allocation5 + $0x1] sm:$0x1] }
 0x466   :  { %v2320_v18 = vrot.slane %v2312_v17, 7  ;;  %v2322_v3 = vrot.slane %v2314_v24, 7  ;;  %v2311_v0 = vld [vmem:[#allocation5 + $0x4] sm:$0x1]  ;;  %v2310_v45 = vld [vmem:[#allocation5 + $0x3] sm:$0x1] }
 0x467   :  { %v2319_v7 = vrot.slane %v2311_v0, 7  ;;  %v2313_v56 = vld [vmem:[#allocation5 + $0x6] sm:$0x1]  ;;  %v2307_v53 = vld [vmem:[#allocation5] sm:$0x1]  ;;  %v8286_v8 = vpop.f32.mrb[37].mxu1  ;;  %v5965_v0 = vcombine.high %v2500_v12, %v2504_v15 }
 0x468   :  { %v2328_v57 = vsel %vm40_vm1, %v2308_v52, %v2320_v18  ;;  %v2330_v22 = vsel %vm40_vm1, %v2310_v45, %v2322_v3  ;;  %v2321_v61 = vrot.slane %v2313_v56, 7  ;;  %v2309_v32 = vld [vmem:[#allocation5 + $0x2] sm:$0x1]  ;;  %v2724_v43 = vpop.f32.mrb[38].mxu1  ;;  %v5828_v18 = vcombine.low %v2364_v40, %v2368_v16  ;;  %v2384_v45 = vld [vmem:[%s9167_s3 + $0x1a8] sm:$0xff] }
 0x469   :  { %v8231_v9 = vpack.c.bf16 %v2328_v57, %v2328_v57  ;;  %v8240_v48 = vpack.c.bf16 %v2330_v22, %v2330_v22  ;;  %v2327_v62 = vsel %vm40_vm1, %v2307_v53, %v2319_v7  ;;  %v5956_v52 = vcombine.low %v2492_v30, %v2496_v38  ;;  %v2380_v57 = vld [vmem:[%s9167_s3 + $0x188] sm:$0xff] }
 0x46a   :  { %v8250_v49 = vpack.c.bf16 %v2327_v62, %v2327_v62  ;;  %v2329_v20 = vsel %vm40_vm1, %v2309_v32, %v2321_v61  ;;  %v5837_v3 = vcombine.high %v2372_v26, %v2376_v36  ;;  %v2508_v7 = vld [vmem:[%s9167_s3 + $0x588] sm:$0xff]  ;;  %v5836_v22 = vcombine.low %v2372_v26, %v2376_v36 }
 0x46b   :  { %4121 = vmatprep.mubr.bf16.mxu0 %v8231_v9  ;;  %4162 = vmatprep.mubr.bf16.mxu1 %v8240_v48  ;;  %v8254_v1 = vpack.c.bf16 %v2329_v20, %v2329_v20  ;;  %v2512_v56 = vld [vmem:[%s9167_s3 + $0x5a8] sm:$0xff]  ;;  %v5964_v53 = vcombine.low %v2500_v12, %v2504_v15  ;;  %v5845_v61 = vcombine.high %v2380_v57, %v2384_v45 }
 0x46c   :  { %4122 = vmatmul.mubr.bf16.vlgmr.msra.gmra.mrb[48].mxu0 %v8250_v49  ;;  %v5973_v59 = vcombine.high %v2508_v7, %v2512_v56  ;;  %v2392_v62 = vld [vmem:[%s9167_s3 + $0x1e8] sm:$0xff]  ;;  %v5844_v20 = vcombine.low %v2380_v57, %v2384_v45  ;;  %v5972_v29 = vcombine.low %v2508_v7, %v2512_v56 }
 0x46d   :  { %4163 = vmatmul.mubr.bf16.vlgmr.msra.gmra.mrb[48].mxu1 %v8254_v1  ;;  %4172 = vmatpush1.bf16.msra.mxu0 %v5796_v44  ;;  %v2725_v44 = vpop.f32.mrb[39].mxu1  ;;  %v5853_v50 = vcombine.high %v2388_v42, %v2392_v62  ;;  %v2536_v43 = vld [vmem:[%s9167_s3 + $0x668] sm:$0xff] }
 0x46e   :  { %4213 = vmatpush1.bf16.msra.mxu1 %v5924_v46  ;;  %4203 = vmatprep.mubr.bf16.mxu0 %v8231_v9  ;;  %v5949_v46 = vcombine.high %v2484_v31, %v2488_v33  ;;  %v8300_v25 = vpop.f32.mrb[40].mxu1  ;;  %v2404_v31 = vld [vmem:[%s9167_s3 + $0x248] sm:$0xff] }
 0x46f   :  { %4244 = vmatprep.mubr.bf16.mxu1 %v8240_v48  ;;  %4173 = vmatprep.subr.bf16.mxu0 %v5805_v54  ;;  %v8308_v5 = vpop.f32.mrb[41].mxu1  ;;  %v2408_v33 = vld [vmem:[%s9167_s3 + $0x268] sm:$0xff] }
 0x470   :  { %4214 = vmatprep.subr.bf16.mxu1 %v5933_v14  ;;  %v2765_v17 = vpop.f32.mrb[42].mxu1  ;;  %v5981_v14 = vcombine.high %v2516_v63, %v2520_v47  ;;  %v5869_v44 = vcombine.high %v2404_v31, %v2408_v33  ;;  %v2412_v40 = vld [vmem:[%s9167_s3 + $0x288] sm:$0xff] }
 0x471   :  { %4174 = vmatpush1.bf16.msra.mxu0 %v5804_v28  ;;  %v2766_v24 = vpop.f32.mrb[43].mxu1  ;;  %v2524_v28 = vld [vmem:[%s9167_s3 + $0x608] sm:$0xff] }
 0x472   :  { %4215 = vmatpush1.bf16.msra.mxu1 %v5932_v39  ;;  %4175 = vmatprep.subr.bf16.mxu0 %v5813_v34  ;;  %v2528_v39 = vld [vmem:[%s9167_s3 + $0x628] sm:$0xff]  ;;  %v5852_v34 = vcombine.low %v2388_v42, %v2392_v62 }
 0x473   :  { %4216 = vmatprep.subr.bf16.mxu1 %v5941_v37  ;;  %v5980_v37 = vcombine.low %v2516_v63, %v2520_v47  ;;  %v5989_v11 = vcombine.high %v2524_v28, %v2528_v39  ;;  %v2416_v16 = vld [vmem:[%s9167_s3 + $0x2a8] sm:$0xff] }
 0x474   :  { %v8328_v60 = vpop.f32.mrb[44].mxu1  ;;  %v2540_v30 = vld [vmem:[%s9167_s3 + $0x688] sm:$0xff]  ;;  %v5876_v17 = vcombine.low %v2412_v40, %v2416_v16 }
 0x475   :  { %4176 = vmatpush1.bf16.msra.mxu0 %v5812_v19  ;;  %v8336_v32 = vpop.f32.mrb[45].mxu1  ;;  %v2532_v19 = vld [vmem:[%s9167_s3 + $0x648] sm:$0xff] }
 0x476   :  { %4217 = vmatpush1.bf16.msra.mxu1 %v5940_v10  ;;  %4177 = vmatprep.subr.bf16.mxu0 %v5821_v41  ;;  %v2806_v51 = vpop.f32.mrb[46].mxu1  ;;  %v5860_v10 = vcombine.low %v2396_v23, %v2400_v27  ;;  %v5988_v41 = vcombine.low %v2524_v28, %v2528_v39  ;;  %v2544_v38 = vld [vmem:[%s9167_s3 + $0x6a8] sm:$0xff] }
 0x477   :  { %4218 = vmatprep.subr.bf16.mxu1 %v5949_v46  ;;  %v2807_v54 = vpop.f32.mrb[47].mxu1  ;;  %v5997_v46 = vcombine.high %v2532_v19, %v2536_v43  ;;  %v2420_v26 = vld [vmem:[%s9167_s3 + $0x2c8] sm:$0xff] }
 0x478   :  { %v2424_v36 = vld [vmem:[%s9167_s3 + $0x2e8] sm:$0xff] }
 0x479   :  { %4178 = vmatpush1.bf16.msra.mxu0 %v5820_v13  ;;  %v5868_v13 = vcombine.low %v2404_v31, %v2408_v33  ;;  %v2548_v12 = vld [vmem:[%s9167_s3 + $0x6c8] sm:$0xff]  ;;  %v5885_v24 = vcombine.high %v2420_v26, %v2424_v36  ;;  %v5884_v7 = vcombine.low %v2420_v26, %v2424_v36  ;;  %v2473_v26 = vld [vmem:[%s9167_s3 + $0x470] sm:$0xff] }
 0x47a   :  { %4219 = vmatpush1.bf16.msra.mxu1 %v5948_v4  ;;  %4179 = vmatprep.subr.bf16.mxu0 %v5829_v6  ;;  %v5996_v4 = vcombine.low %v2532_v19, %v2536_v43  ;;  %v5877_v6 = vcombine.high %v2412_v40, %v2416_v16  ;;  %v2552_v15 = vld [vmem:[%s9167_s3 + $0x6e8] sm:$0xff] }
 0x47b   :  { %4220 = vmatprep.subr.bf16.mxu1 %v5957_v35  ;;  %v6005_v35 = vcombine.high %v2540_v30, %v2544_v38  ;;  %v2556_v57 = vld [vmem:[%s9167_s3 + $0x708] sm:$0xff]  ;;  %v6012_v56 = vcombine.low %v2548_v12, %v2552_v15 }
 0x47c   :  { %v2560_v45 = vld [vmem:[%s9167_s3 + $0x728] sm:$0xff] }
 0x47d   :  { %4180 = vmatpush1.bf16.msra.mxu0 %v5828_v18  ;;  %v6004_v18 = vcombine.low %v2540_v30, %v2544_v38  ;;  %v2564_v42 = vld [vmem:[%s9167_s3 + $0x748] sm:$0xff]  ;;  %v6020_v47 = vcombine.low %v2556_v57, %v2560_v45 }
 0x47e   :  { %4221 = vmatpush1.bf16.msra.mxu1 %v5956_v52  ;;  %4181 = vmatprep.subr.bf16.mxu0 %v5837_v3  ;;  %v6013_v52 = vcombine.high %v2548_v12, %v2552_v15  ;;  %v2428_v3 = vld [vmem:[%s9167_s3 + $0x308] sm:$0xff]  ;;  %v2349_v15 = vld [vmem:[%s9167_s3 + $0x90] sm:$0xff] }
 0x47f   :  { %4222 = vmatprep.subr.bf16.mxu1 %v5965_v0  ;;  %v2432_v0 = vld [vmem:[%s9167_s3 + $0x328] sm:$0xff] }
 0x480   :  { %v2568_v62 = vld [vmem:[%s9167_s3 + $0x768] sm:$0xff]  ;;  %v5892_v63 = vcombine.low %v2428_v3, %v2432_v0 }
 0x481   :  { %4182 = vmatpush1.bf16.msra.mxu0 %v5836_v22  ;;  %v5893_v22 = vcombine.high %v2428_v3, %v2432_v0  ;;  %v2444_v54 = vld [vmem:[%s9167_s3 + $0x388] sm:$0xff]  ;;  %v6028_v27 = vcombine.low %v2564_v42, %v2568_v62 }
 0x482   :  { %4223 = vmatpush1.bf16.msra.mxu1 %v5964_v53  ;;  %4183 = vmatprep.subr.bf16.mxu0 %v5845_v61  ;;  %v6021_v53 = vcombine.high %v2556_v57, %v2560_v45  ;;  %v2436_v61 = vld [vmem:[%s9167_s3 + $0x348] sm:$0xff] }
 0x483   :  { %4224 = vmatprep.subr.bf16.mxu1 %v5973_v59  ;;  %v2440_v59 = vld [vmem:[%s9167_s3 + $0x368] sm:$0xff] }
 0x484   :  { %v5901_v51 = vcombine.high %v2436_v61, %v2440_v59  ;;  %v5900_v23 = vcombine.low %v2436_v61, %v2440_v59 }
 0x485   :  { %4184 = vmatpush1.bf16.msra.mxu0 %v5844_v20  ;;  %v6029_v20 = vcombine.high %v2564_v42, %v2568_v62 }
 0x486   :  { %4225 = vmatpush1.bf16.msra.mxu1 %v5972_v29  ;;  %4185 = vmatprep.subr.bf16.mxu0 %v5853_v50  ;;  %v2448_v29 = vld [vmem:[%s9167_s3 + $0x3a8] sm:$0xff] }
 0x487   :  { %4226 = vmatprep.subr.bf16.mxu1 %v5981_v14  ;;  %v2572_v50 = vld [vmem:[%s9167_s3 + $0x788] sm:$0xff]  ;;  %v5909_v28 = vcombine.high %v2444_v54, %v2448_v29  ;;  %v5908_v31 = vcombine.low %v2444_v54, %v2448_v29 }
 0x488   :  { %v2576_v14 = vld [vmem:[%s9167_s3 + $0x7a8] sm:$0xff] }
 0x489   :  { %4186 = vmatpush1.bf16.msra.mxu0 %v5852_v34  ;;  %v6037_v39 = vcombine.high %v2572_v50, %v2576_v14  ;;  %v2452_v34 = vld [vmem:[%s9167_s3 + $0x3c8] sm:$0xff]  ;;  %v6036_v33 = vcombine.low %v2572_v50, %v2576_v14 }
 0x48a   :  { %4227 = vmatpush1.bf16.msra.mxu1 %v5980_v37  ;;  %4187 = vmatprep.subr.bf16.mxu0 %v5861_v55  ;;  %v2456_v37 = vld [vmem:[%s9167_s3 + $0x3e8] sm:$0xff] }
 0x48b   :  { %4228 = vmatprep.subr.bf16.mxu1 %v5989_v11  ;;  %v2580_v55 = vld [vmem:[%s9167_s3 + $0x7c8] sm:$0xff]  ;;  %v5917_v19 = vcombine.high %v2452_v34, %v2456_v37  ;;  %v5916_v40 = vcombine.low %v2452_v34, %v2456_v37 }
 0x48c   :  { %v2584_v11 = vld [vmem:[%s9167_s3 + $0x7e8] sm:$0xff] }
 0x48d   :  { %4188 = vmatpush1.bf16.msra.mxu0 %v5860_v10  ;;  %v6045_v43 = vcombine.high %v2580_v55, %v2584_v11  ;;  %v2333_v10 = vld [vmem:[%s9167_s3 + $0x10] sm:$0xff]  ;;  %v6044_v16 = vcombine.low %v2580_v55, %v2584_v11 }
 0x48e   :  { %4229 = vmatpush1.bf16.msra.mxu1 %v5988_v41  ;;  %4189 = vmatprep.subr.bf16.mxu0 %v5869_v44  ;;  %v2337_v41 = vld [vmem:[%s9167_s3 + $0x30] sm:$0xff] }
 0x48f   :  { %4230 = vmatprep.subr.bf16.mxu1 %v5997_v46  ;;  %v2461_v44 = vld [vmem:[%s9167_s3 + $0x410] sm:$0xff]  ;;  %v5799_v30 = vcombine.high %v2333_v10, %v2337_v41 }
 0x490   :  { %v2465_v46 = vld [vmem:[%s9167_s3 + $0x430] sm:$0xff] }
 0x491   :  { %4190 = vmatpush1.bf16.msra.mxu0 %v5868_v13  ;;  %v5927_v38 = vcombine.high %v2461_v44, %v2465_v46  ;;  %v2341_v13 = vld [vmem:[%s9167_s3 + $0x50] sm:$0xff]  ;;  %v5926_v36 = vcombine.low %v2461_v44, %v2465_v46 }
 0x492   :  { %4231 = vmatpush1.bf16.msra.mxu1 %v5996_v4  ;;  %4191 = vmatprep.subr.bf16.mxu0 %v5877_v6  ;;  %v2345_v4 = vld [vmem:[%s9167_s3 + $0x70] sm:$0xff]  ;;  %v5798_v6 = vcombine.low %v2333_v10, %v2337_v41 }
 0x493   :  { %4232 = vmatprep.subr.bf16.mxu1 %v6005_v35  ;;  %v2469_v35 = vld [vmem:[%s9167_s3 + $0x450] sm:$0xff]  ;;  %v5807_v12 = vcombine.high %v2341_v13, %v2345_v4  ;;  %v5806_v3 = vcombine.low %v2341_v13, %v2345_v4 }
 0x494   :  { %v5934_v0 = vcombine.low %v2469_v35, %v2473_v26 }
 0x495   :  { %4192 = vmatpush1.bf16.msra.mxu0 %v5876_v17  ;;  %v2353_v17 = vld [vmem:[%s9167_s3 + $0xb0] sm:$0xff] }
 0x496   :  { %4233 = vmatpush1.bf16.msra.mxu1 %v6004_v18  ;;  %4193 = vmatprep.subr.bf16.mxu0 %v5885_v24  ;;  %v5935_v18 = vcombine.high %v2469_v35, %v2473_v26  ;;  %v2477_v24 = vld [vmem:[%s9167_s3 + $0x490] sm:$0xff]  ;;  %v5815_v57 = vcombine.high %v2349_v15, %v2353_v17  ;;  %v5814_v61 = vcombine.low %v2349_v15, %v2353_v17 }
 0x497   :  { %4234 = vmatprep.subr.bf16.mxu1 %v6013_v52  ;;  %v2481_v52 = vld [vmem:[%s9167_s3 + $0x4b0] sm:$0xff] }
 0x498   :  { %v5943_v45 = vcombine.high %v2477_v24, %v2481_v52  ;;  %v5942_v59 = vcombine.low %v2477_v24, %v2481_v52  ;;  %v2397_v26 = vld [vmem:[%s9167_s3 + $0x210] sm:$0xff] }
 0x499   :  { %4194 = vmatpush1.bf16.msra.mxu0 %v5884_v7  ;;  %v2357_v7 = vld [vmem:[%s9167_s3 + $0xd0] sm:$0xff] }
 0x49a   :  { %4235 = vmatpush1.bf16.msra.mxu1 %v6012_v56  ;;  %4195 = vmatprep.subr.bf16.mxu0 %v5893_v22  ;;  %v2361_v56 = vld [vmem:[%s9167_s3 + $0xf0] sm:$0xff] }
 0x49b   :  { %4236 = vmatprep.subr.bf16.mxu1 %v6021_v53  ;;  %v2485_v22 = vld [vmem:[%s9167_s3 + $0x4d0] sm:$0xff]  ;;  %v5823_v42 = vcombine.high %v2357_v7, %v2361_v56  ;;  %v5822_v54 = vcombine.low %v2357_v7, %v2361_v56 }
 0x49c   :  { %v2489_v53 = vld [vmem:[%s9167_s3 + $0x4f0] sm:$0xff] }
 0x49d   :  { %4196 = vmatpush1.bf16.msra.mxu0 %v5892_v63  ;;  %v5951_v62 = vcombine.high %v2485_v22, %v2489_v53  ;;  %v2365_v63 = vld [vmem:[%s9167_s3 + $0x110] sm:$0xff]  ;;  %v5950_v29 = vcombine.low %v2485_v22, %v2489_v53 }
 0x49e   :  { %4237 = vmatpush1.bf16.msra.mxu1 %v6020_v47  ;;  %4197 = vmatprep.subr.bf16.mxu0 %v5901_v51  ;;  %v2369_v47 = vld [vmem:[%s9167_s3 + $0x130] sm:$0xff] }
 0x49f   :  { %4238 = vmatprep.subr.bf16.mxu1 %v6029_v20  ;;  %v2493_v51 = vld [vmem:[%s9167_s3 + $0x510] sm:$0xff]  ;;  %v5831_v50 = vcombine.high %v2365_v63, %v2369_v47  ;;  %v5830_v34 = vcombine.low %v2365_v63, %v2369_v47 }
 0x4a0   :  { %v2497_v20 = vld [vmem:[%s9167_s3 + $0x530] sm:$0xff] }
 0x4a1   :  { %4198 = vmatpush1.bf16.msra.mxu0 %v5900_v23  ;;  %v5959_v14 = vcombine.high %v2493_v51, %v2497_v20  ;;  %v2373_v23 = vld [vmem:[%s9167_s3 + $0x150] sm:$0xff]  ;;  %v5958_v37 = vcombine.low %v2493_v51, %v2497_v20 }
 0x4a2   :  { %4239 = vmatpush1.bf16.msra.mxu1 %v6028_v27  ;;  %4199 = vmatprep.subr.bf16.mxu0 %v5909_v28  ;;  %v2377_v27 = vld [vmem:[%s9167_s3 + $0x170] sm:$0xff] }
 0x4a3   :  { %4240 = vmatprep.subr.bf16.mxu1 %v6037_v39  ;;  %v2501_v28 = vld [vmem:[%s9167_s3 + $0x550] sm:$0xff]  ;;  %v5839_v55 = vcombine.high %v2373_v23, %v2377_v27  ;;  %v5838_v10 = vcombine.low %v2373_v23, %v2377_v27 }
 0x4a4   :  { %v2505_v39 = vld [vmem:[%s9167_s3 + $0x570] sm:$0xff] }
 0x4a5   :  { %4200 = vmatpush1.bf16.msra.mxu0 %v5908_v31  ;;  %v5967_v11 = vcombine.high %v2501_v28, %v2505_v39  ;;  %v2381_v31 = vld [vmem:[%s9167_s3 + $0x190] sm:$0xff]  ;;  %v5966_v41 = vcombine.low %v2501_v28, %v2505_v39 }
 0x4a6   :  { %4241 = vmatpush1.bf16.msra.mxu1 %v6036_v33  ;;  %4201 = vmatprep.subr.bf16.mxu0 %v5917_v19  ;;  %v2385_v33 = vld [vmem:[%s9167_s3 + $0x1b0] sm:$0xff] }
 0x4a7   :  { %4242 = vmatprep.subr.bf16.mxu1 %v6045_v43  ;;  %v2509_v19 = vld [vmem:[%s9167_s3 + $0x590] sm:$0xff]  ;;  %v5847_v44 = vcombine.high %v2381_v31, %v2385_v33  ;;  %v5846_v13 = vcombine.low %v2381_v31, %v2385_v33 }
 0x4a8   :  { %v2513_v43 = vld [vmem:[%s9167_s3 + $0x5b0] sm:$0xff] }
 0x4a9   :  { %4202 = vmatpush1.bf16.msra.mxu0 %v5916_v40  ;;  %v5975_v46 = vcombine.high %v2509_v19, %v2513_v43  ;;  %v2389_v40 = vld [vmem:[%s9167_s3 + $0x1d0] sm:$0xff]  ;;  %v5974_v4 = vcombine.low %v2509_v19, %v2513_v43 }
 0x4aa   :  { %4243 = vmatpush1.bf16.msra.mxu1 %v6044_v16  ;;  %4253 = vmatprep.subr.bf16.mxu0 %v5799_v30  ;;  %v2393_v16 = vld [vmem:[%s9167_s3 + $0x1f0] sm:$0xff] }
 0x4ab   :  { %4294 = vmatprep.subr.bf16.mxu1 %v5927_v38  ;;  %v2517_v30 = vld [vmem:[%s9167_s3 + $0x5d0] sm:$0xff]  ;;  %v5854_v17 = vcombine.low %v2389_v40, %v2393_v16 }
 0x4ac   :  { %4204 = vmatmul.mubr.bf16.vlgmr.msra.gmra.mrb[52].mxu0 %v8250_v49  ;;  %v2521_v38 = vld [vmem:[%s9167_s3 + $0x5f0] sm:$0xff] }
 0x4ad   :  { %4245 = vmatmul.mubr.bf16.vlgmr.msra.gmra.mrb[52].mxu1 %v8254_v1  ;;  %4254 = vmatpush1.bf16.msra.mxu0 %v5798_v6  ;;  %v5855_v6 = vcombine.high %v2389_v40, %v2393_v16  ;;  %v5983_v35 = vcombine.high %v2517_v30, %v2521_v38  ;;  %v2529_v15 = vld [vmem:[%s9167_s3 + $0x630] sm:$0xff] }
 0x4ae   :  { %4285 = vmatprep.mubr.bf16.mxu0 %v8231_v9  ;;  %4295 = vmatpush1.bf16.msra.mxu1 %v5926_v36  ;;  %v2401_v36 = vld [vmem:[%s9167_s3 + $0x230] sm:$0xff] }
 0x4af   :  { %4326 = vmatprep.mubr.bf16.mxu1 %v8240_v48  ;;  %4255 = vmatprep.subr.bf16.mxu0 %v5807_v12  ;;  %v2525_v12 = vld [vmem:[%s9167_s3 + $0x610] sm:$0xff]  ;;  %v5863_v24 = vcombine.high %v2397_v26, %v2401_v36  ;;  %v5862_v7 = vcombine.low %v2397_v26, %v2401_v36 }
 0x4b0   :  { %4296 = vmatprep.subr.bf16.mxu1 %v5935_v18  ;;  %v5982_v18 = vcombine.low %v2517_v30, %v2521_v38  ;;  %v5991_v52 = vcombine.high %v2525_v12, %v2529_v15  ;;  %v5990_v56 = vcombine.low %v2525_v12, %v2529_v15 }
 0x4b1   :  { %4256 = vmatpush1.bf16.msra.mxu0 %v5806_v3  ;;  %v2405_v3 = vld [vmem:[%s9167_s3 + $0x250] sm:$0xff] }
 0x4b2   :  { %4297 = vmatpush1.bf16.msra.mxu1 %v5934_v0  ;;  %4257 = vmatprep.subr.bf16.mxu0 %v5815_v57  ;;  %v2409_v0 = vld [vmem:[%s9167_s3 + $0x270] sm:$0xff] }
 0x4b3   :  { %4298 = vmatprep.subr.bf16.mxu1 %v5943_v45  ;;  %v2533_v57 = vld [vmem:[%s9167_s3 + $0x650] sm:$0xff]  ;;  %v5871_v22 = vcombine.high %v2405_v3, %v2409_v0  ;;  %v5870_v63 = vcombine.low %v2405_v3, %v2409_v0 }
 0x4b4   :  { %v2537_v45 = vld [vmem:[%s9167_s3 + $0x670] sm:$0xff] }
 0x4b5   :  { %4258 = vmatpush1.bf16.msra.mxu0 %v5814_v61  ;;  %v5999_v53 = vcombine.high %v2533_v57, %v2537_v45  ;;  %v2413_v61 = vld [vmem:[%s9167_s3 + $0x290] sm:$0xff]  ;;  %v5998_v47 = vcombine.low %v2533_v57, %v2537_v45 }
 0x4b6   :  { %4299 = vmatpush1.bf16.msra.mxu1 %v5942_v59  ;;  %4259 = vmatprep.subr.bf16.mxu0 %v5823_v42  ;;  %v2417_v59 = vld [vmem:[%s9167_s3 + $0x2b0] sm:$0xff] }
 0x4b7   :  { %4300 = vmatprep.subr.bf16.mxu1 %v5951_v62  ;;  %v2541_v42 = vld [vmem:[%s9167_s3 + $0x690] sm:$0xff]  ;;  %v5879_v51 = vcombine.high %v2413_v61, %v2417_v59  ;;  %v5878_v23 = vcombine.low %v2413_v61, %v2417_v59 }
 0x4b8   :  { %v2545_v62 = vld [vmem:[%s9167_s3 + $0x6b0] sm:$0xff] }
 0x4b9   :  { %4260 = vmatpush1.bf16.msra.mxu0 %v5822_v54  ;;  %v6007_v20 = vcombine.high %v2541_v42, %v2545_v62  ;;  %v2421_v54 = vld [vmem:[%s9167_s3 + $0x2d0] sm:$0xff]  ;;  %v6006_v27 = vcombine.low %v2541_v42, %v2545_v62 }
 0x4ba   :  { %4301 = vmatpush1.bf16.msra.mxu1 %v5950_v29  ;;  %4261 = vmatprep.subr.bf16.mxu0 %v5831_v50  ;;  %v2425_v29 = vld [vmem:[%s9167_s3 + $0x2f0] sm:$0xff] }
 0x4bb   :  { %4302 = vmatprep.subr.bf16.mxu1 %v5959_v14  ;;  %v2549_v50 = vld [vmem:[%s9167_s3 + $0x6d0] sm:$0xff]  ;;  %v5887_v28 = vcombine.high %v2421_v54, %v2425_v29  ;;  %v5886_v31 = vcombine.low %v2421_v54, %v2425_v29  ;;  %v2474_v54 = vld [vmem:[%s9167_s3 + $0x478] sm:$0xff] }
 0x4bc   :  { %v2553_v14 = vld [vmem:[%s9167_s3 + $0x6f0] sm:$0xff] }
 0x4bd   :  { %4262 = vmatpush1.bf16.msra.mxu0 %v5830_v34  ;;  %v6015_v39 = vcombine.high %v2549_v50, %v2553_v14  ;;  %v2429_v34 = vld [vmem:[%s9167_s3 + $0x310] sm:$0xff]  ;;  %v6014_v33 = vcombine.low %v2549_v50, %v2553_v14  ;;  %v2350_v14 = vld [vmem:[%s9167_s3 + $0x98] sm:$0xff] }
 0x4be   :  { %4303 = vmatpush1.bf16.msra.mxu1 %v5958_v37  ;;  %4263 = vmatprep.subr.bf16.mxu0 %v5839_v55  ;;  %v2433_v37 = vld [vmem:[%s9167_s3 + $0x330] sm:$0xff] }
 0x4bf   :  { %4304 = vmatprep.subr.bf16.mxu1 %v5967_v11  ;;  %v2557_v55 = vld [vmem:[%s9167_s3 + $0x710] sm:$0xff]  ;;  %v5895_v19 = vcombine.high %v2429_v34, %v2433_v37  ;;  %v5894_v40 = vcombine.low %v2429_v34, %v2433_v37 }
 0x4c0   :  { %v2561_v11 = vld [vmem:[%s9167_s3 + $0x730] sm:$0xff] }
 0x4c1   :  { %4264 = vmatpush1.bf16.msra.mxu0 %v5838_v10  ;;  %v6023_v43 = vcombine.high %v2557_v55, %v2561_v11  ;;  %v2437_v10 = vld [vmem:[%s9167_s3 + $0x350] sm:$0xff]  ;;  %v6022_v16 = vcombine.low %v2557_v55, %v2561_v11 }
 0x4c2   :  { %4305 = vmatpush1.bf16.msra.mxu1 %v5966_v41  ;;  %4265 = vmatprep.subr.bf16.mxu0 %v5847_v44  ;;  %v2441_v41 = vld [vmem:[%s9167_s3 + $0x370] sm:$0xff] }
 0x4c3   :  { %4306 = vmatprep.subr.bf16.mxu1 %v5975_v46  ;;  %v2565_v44 = vld [vmem:[%s9167_s3 + $0x750] sm:$0xff]  ;;  %v5903_v30 = vcombine.high %v2437_v10, %v2441_v41  ;;  %v5902_v26 = vcombine.low %v2437_v10, %v2441_v41 }
 0x4c4   :  { %v2569_v46 = vld [vmem:[%s9167_s3 + $0x770] sm:$0xff] }
 0x4c5   :  { %4266 = vmatpush1.bf16.msra.mxu0 %v5846_v13  ;;  %v6031_v38 = vcombine.high %v2565_v44, %v2569_v46  ;;  %v2445_v13 = vld [vmem:[%s9167_s3 + $0x390] sm:$0xff]  ;;  %v6030_v36 = vcombine.low %v2565_v44, %v2569_v46 }
 0x4c6   :  { %4307 = vmatpush1.bf16.msra.mxu1 %v5974_v4  ;;  %4267 = vmatprep.subr.bf16.mxu0 %v5855_v6  ;;  %v2449_v4 = vld [vmem:[%s9167_s3 + $0x3b0] sm:$0xff] }
 0x4c7   :  { %4308 = vmatprep.subr.bf16.mxu1 %v5983_v35  ;;  %v2573_v6 = vld [vmem:[%s9167_s3 + $0x790] sm:$0xff]  ;;  %v5911_v12 = vcombine.high %v2445_v13, %v2449_v4  ;;  %v5910_v3 = vcombine.low %v2445_v13, %v2449_v4 }
 0x4c8   :  { %v2577_v35 = vld [vmem:[%s9167_s3 + $0x7b0] sm:$0xff] }
 0x4c9   :  { %4268 = vmatpush1.bf16.msra.mxu0 %v5854_v17  ;;  %v6039_v15 = vcombine.high %v2573_v6, %v2577_v35  ;;  %v2453_v17 = vld [vmem:[%s9167_s3 + $0x3d0] sm:$0xff]  ;;  %v6038_v0 = vcombine.low %v2573_v6, %v2577_v35 }
 0x4ca   :  { %4309 = vmatpush1.bf16.msra.mxu1 %v5982_v18  ;;  %4269 = vmatprep.subr.bf16.mxu0 %v5863_v24  ;;  %v2457_v18 = vld [vmem:[%s9167_s3 + $0x3f0] sm:$0xff] }
 0x4cb   :  { %4310 = vmatprep.subr.bf16.mxu1 %v5991_v52  ;;  %v2581_v24 = vld [vmem:[%s9167_s3 + $0x7d0] sm:$0xff]  ;;  %v5919_v57 = vcombine.high %v2453_v17, %v2457_v18  ;;  %v5918_v61 = vcombine.low %v2453_v17, %v2457_v18 }
 0x4cc   :  { %v2585_v52 = vld [vmem:[%s9167_s3 + $0x7f0] sm:$0xff] }
 0x4cd   :  { %4270 = vmatpush1.bf16.msra.mxu0 %v5862_v7  ;;  %v6047_v45 = vcombine.high %v2581_v24, %v2585_v52  ;;  %v2334_v7 = vld [vmem:[%s9167_s3 + $0x18] sm:$0xff]  ;;  %v6046_v59 = vcombine.low %v2581_v24, %v2585_v52 }
 0x4ce   :  { %4311 = vmatpush1.bf16.msra.mxu1 %v5990_v56  ;;  %4271 = vmatprep.subr.bf16.mxu0 %v5871_v22  ;;  %v2338_v56 = vld [vmem:[%s9167_s3 + $0x38] sm:$0xff] }
 0x4cf   :  { %4312 = vmatprep.subr.bf16.mxu1 %v5999_v53  ;;  %v2462_v22 = vld [vmem:[%s9167_s3 + $0x418] sm:$0xff]  ;;  %v5801_v42 = vcombine.high %v2334_v7, %v2338_v56 }
 0x4d0   :  { %v2466_v53 = vld [vmem:[%s9167_s3 + $0x438] sm:$0xff] }
 0x4d1   :  { %4272 = vmatpush1.bf16.msra.mxu0 %v5870_v63  ;;  %v5929_v62 = vcombine.high %v2462_v22, %v2466_v53  ;;  %v2342_v63 = vld [vmem:[%s9167_s3 + $0x58] sm:$0xff]  ;;  %v5928_v29 = vcombine.low %v2462_v22, %v2466_v53 }
 0x4d2   :  { %4313 = vmatpush1.bf16.msra.mxu1 %v5998_v47  ;;  %4273 = vmatprep.subr.bf16.mxu0 %v5879_v51  ;;  %v2346_v47 = vld [vmem:[%s9167_s3 + $0x78] sm:$0xff]  ;;  %v5800_v51 = vcombine.low %v2334_v7, %v2338_v56 }
 0x4d3   :  { %4314 = vmatprep.subr.bf16.mxu1 %v6007_v20  ;;  %v2470_v20 = vld [vmem:[%s9167_s3 + $0x458] sm:$0xff]  ;;  %v5809_v50 = vcombine.high %v2342_v63, %v2346_v47  ;;  %v5808_v34 = vcombine.low %v2342_v63, %v2346_v47 }
 0x4d4   :  { %v5936_v37 = vcombine.low %v2470_v20, %v2474_v54 }
 0x4d5   :  { %4274 = vmatpush1.bf16.msra.mxu0 %v5878_v23  ;;  %v2354_v23 = vld [vmem:[%s9167_s3 + $0xb8] sm:$0xff] }
 0x4d6   :  { %4315 = vmatpush1.bf16.msra.mxu1 %v6006_v27  ;;  %4275 = vmatprep.subr.bf16.mxu0 %v5887_v28  ;;  %v5937_v27 = vcombine.high %v2470_v20, %v2474_v54  ;;  %v2478_v28 = vld [vmem:[%s9167_s3 + $0x498] sm:$0xff]  ;;  %v5817_v55 = vcombine.high %v2350_v14, %v2354_v23  ;;  %v5816_v10 = vcombine.low %v2350_v14, %v2354_v23 }
 0x4d7   :  { %4316 = vmatprep.subr.bf16.mxu1 %v6015_v39  ;;  %v2482_v39 = vld [vmem:[%s9167_s3 + $0x4b8] sm:$0xff] }
 0x4d8   :  { %v5945_v11 = vcombine.high %v2478_v28, %v2482_v39  ;;  %v5944_v41 = vcombine.low %v2478_v28, %v2482_v39  ;;  %v2398_v54 = vld [vmem:[%s9167_s3 + $0x218] sm:$0xff] }
 0x4d9   :  { %4276 = vmatpush1.bf16.msra.mxu0 %v5886_v31  ;;  %v2358_v31 = vld [vmem:[%s9167_s3 + $0xd8] sm:$0xff] }
 0x4da   :  { %4317 = vmatpush1.bf16.msra.mxu1 %v6014_v33  ;;  %4277 = vmatprep.subr.bf16.mxu0 %v5895_v19  ;;  %v2362_v33 = vld [vmem:[%s9167_s3 + $0xf8] sm:$0xff] }
 0x4db   :  { %4318 = vmatprep.subr.bf16.mxu1 %v6023_v43  ;;  %v2486_v19 = vld [vmem:[%s9167_s3 + $0x4d8] sm:$0xff]  ;;  %v5825_v44 = vcombine.high %v2358_v31, %v2362_v33  ;;  %v5824_v13 = vcombine.low %v2358_v31, %v2362_v33 }
 0x4dc   :  { %v2490_v43 = vld [vmem:[%s9167_s3 + $0x4f8] sm:$0xff] }
 0x4dd   :  { %4278 = vmatpush1.bf16.msra.mxu0 %v5894_v40  ;;  %v5953_v46 = vcombine.high %v2486_v19, %v2490_v43  ;;  %v2366_v40 = vld [vmem:[%s9167_s3 + $0x118] sm:$0xff]  ;;  %v5952_v4 = vcombine.low %v2486_v19, %v2490_v43 }
 0x4de   :  { %4319 = vmatpush1.bf16.msra.mxu1 %v6022_v16  ;;  %4279 = vmatprep.subr.bf16.mxu0 %v5903_v30  ;;  %v2370_v16 = vld [vmem:[%s9167_s3 + $0x138] sm:$0xff] }
 0x4df   :  { %4320 = vmatprep.subr.bf16.mxu1 %v6031_v38  ;;  %v2494_v30 = vld [vmem:[%s9167_s3 + $0x518] sm:$0xff]  ;;  %v5833_v6 = vcombine.high %v2366_v40, %v2370_v16  ;;  %v5832_v17 = vcombine.low %v2366_v40, %v2370_v16 }
 0x4e0   :  { %v2498_v38 = vld [vmem:[%s9167_s3 + $0x538] sm:$0xff] }
 0x4e1   :  { %4280 = vmatpush1.bf16.msra.mxu0 %v5902_v26  ;;  %v5961_v35 = vcombine.high %v2494_v30, %v2498_v38  ;;  %v2374_v26 = vld [vmem:[%s9167_s3 + $0x158] sm:$0xff]  ;;  %v5960_v18 = vcombine.low %v2494_v30, %v2498_v38 }
 0x4e2   :  { %4321 = vmatpush1.bf16.msra.mxu1 %v6030_v36  ;;  %4281 = vmatprep.subr.bf16.mxu0 %v5911_v12  ;;  %v2378_v36 = vld [vmem:[%s9167_s3 + $0x178] sm:$0xff] }
 0x4e3   :  { %4322 = vmatprep.subr.bf16.mxu1 %v6039_v15  ;;  %v2502_v12 = vld [vmem:[%s9167_s3 + $0x558] sm:$0xff]  ;;  %v5841_v24 = vcombine.high %v2374_v26, %v2378_v36  ;;  %v5840_v7 = vcombine.low %v2374_v26, %v2378_v36 }
 0x4e4   :  { %v2506_v15 = vld [vmem:[%s9167_s3 + $0x578] sm:$0xff] }
 0x4e5   :  { %4282 = vmatpush1.bf16.msra.mxu0 %v5910_v3  ;;  %v5969_v52 = vcombine.high %v2502_v12, %v2506_v15  ;;  %v2382_v3 = vld [vmem:[%s9167_s3 + $0x198] sm:$0xff]  ;;  %v5968_v56 = vcombine.low %v2502_v12, %v2506_v15 }
 0x4e6   :  { %4323 = vmatpush1.bf16.msra.mxu1 %v6038_v0  ;;  %4283 = vmatprep.subr.bf16.mxu0 %v5919_v57  ;;  %v2386_v0 = vld [vmem:[%s9167_s3 + $0x1b8] sm:$0xff] }
 0x4e7   :  { %4324 = vmatprep.subr.bf16.mxu1 %v6047_v45  ;;  %v2510_v57 = vld [vmem:[%s9167_s3 + $0x598] sm:$0xff]  ;;  %v5849_v22 = vcombine.high %v2382_v3, %v2386_v0  ;;  %v5848_v63 = vcombine.low %v2382_v3, %v2386_v0 }
 0x4e8   :  { %v2514_v45 = vld [vmem:[%s9167_s3 + $0x5b8] sm:$0xff] }
 0x4e9   :  { %4284 = vmatpush1.bf16.msra.mxu0 %v5918_v61  ;;  %v5977_v53 = vcombine.high %v2510_v57, %v2514_v45  ;;  %v2390_v61 = vld [vmem:[%s9167_s3 + $0x1d8] sm:$0xff]  ;;  %v5976_v47 = vcombine.low %v2510_v57, %v2514_v45 }
 0x4ea   :  { %4325 = vmatpush1.bf16.msra.mxu1 %v6046_v59  ;;  %4335 = vmatprep.subr.bf16.mxu0 %v5801_v42  ;;  %v2394_v59 = vld [vmem:[%s9167_s3 + $0x1f8] sm:$0xff] }
 0x4eb   :  { %4376 = vmatprep.subr.bf16.mxu1 %v5929_v62  ;;  %v2518_v42 = vld [vmem:[%s9167_s3 + $0x5d8] sm:$0xff]  ;;  %v5856_v23 = vcombine.low %v2390_v61, %v2394_v59 }
 0x4ec   :  { %4286 = vmatmul.mubr.bf16.vlgmr.msra.gmra.mrb[56].mxu0 %v8250_v49  ;;  %v2522_v62 = vld [vmem:[%s9167_s3 + $0x5f8] sm:$0xff] }
 0x4ed   :  { %4327 = vmatmul.mubr.bf16.vlgmr.msra.gmra.mrb[56].mxu1 %v8254_v1  ;;  %4336 = vmatpush1.bf16.msra.mxu0 %v5800_v51  ;;  %v5857_v51 = vcombine.high %v2390_v61, %v2394_v59  ;;  %v5985_v20 = vcombine.high %v2518_v42, %v2522_v62  ;;  %v2530_v14 = vld [vmem:[%s9167_s3 + $0x638] sm:$0xff] }
 0x4ee   :  { %4367 = vmatprep.mubr.bf16.mxu0 %v8231_v9  ;;  %4377 = vmatpush1.bf16.msra.mxu1 %v5928_v29  ;;  %v2402_v29 = vld [vmem:[%s9167_s3 + $0x238] sm:$0xff] }
 0x4ef   :  { %4408 = vmatprep.mubr.bf16.mxu1 %v8240_v48  ;;  %4337 = vmatprep.subr.bf16.mxu0 %v5809_v50  ;;  %v2526_v50 = vld [vmem:[%s9167_s3 + $0x618] sm:$0xff]  ;;  %v5865_v28 = vcombine.high %v2398_v54, %v2402_v29  ;;  %v5864_v31 = vcombine.low %v2398_v54, %v2402_v29 }
 0x4f0   :  { %4378 = vmatprep.subr.bf16.mxu1 %v5937_v27  ;;  %v5984_v27 = vcombine.low %v2518_v42, %v2522_v62  ;;  %v5993_v39 = vcombine.high %v2526_v50, %v2530_v14  ;;  %v5992_v33 = vcombine.low %v2526_v50, %v2530_v14 }
 0x4f1   :  { %4338 = vmatpush1.bf16.msra.mxu0 %v5808_v34  ;;  %v2406_v34 = vld [vmem:[%s9167_s3 + $0x258] sm:$0xff] }
 0x4f2   :  { %4379 = vmatpush1.bf16.msra.mxu1 %v5936_v37  ;;  %4339 = vmatprep.subr.bf16.mxu0 %v5817_v55  ;;  %v2410_v37 = vld [vmem:[%s9167_s3 + $0x278] sm:$0xff] }
 0x4f3   :  { %4380 = vmatprep.subr.bf16.mxu1 %v5945_v11  ;;  %v2534_v55 = vld [vmem:[%s9167_s3 + $0x658] sm:$0xff]  ;;  %v5873_v19 = vcombine.high %v2406_v34, %v2410_v37  ;;  %v5872_v40 = vcombine.low %v2406_v34, %v2410_v37 }
 0x4f4   :  { %v2538_v11 = vld [vmem:[%s9167_s3 + $0x678] sm:$0xff] }
 0x4f5   :  { %4340 = vmatpush1.bf16.msra.mxu0 %v5816_v10  ;;  %v6001_v43 = vcombine.high %v2534_v55, %v2538_v11  ;;  %v2414_v10 = vld [vmem:[%s9167_s3 + $0x298] sm:$0xff]  ;;  %v6000_v16 = vcombine.low %v2534_v55, %v2538_v11 }
 0x4f6   :  { %4381 = vmatpush1.bf16.msra.mxu1 %v5944_v41  ;;  %4341 = vmatprep.subr.bf16.mxu0 %v5825_v44  ;;  %v2418_v41 = vld [vmem:[%s9167_s3 + $0x2b8] sm:$0xff] }
 0x4f7   :  { %4382 = vmatprep.subr.bf16.mxu1 %v5953_v46  ;;  %v2542_v44 = vld [vmem:[%s9167_s3 + $0x698] sm:$0xff]  ;;  %v5881_v30 = vcombine.high %v2414_v10, %v2418_v41  ;;  %v5880_v26 = vcombine.low %v2414_v10, %v2418_v41  ;;  %v6811_v10 = vld [vmem:[%s9166_s2 + $0x480] sm:$0xff]   ;;  %v6812_v41 = vld [vmem:[%s9166_s2 + $0x4c8] sm:$0xff]  }
 0x4f8   :  { %v2546_v46 = vld [vmem:[%s9167_s3 + $0x6b8] sm:$0xff] }
 0x4f9   :  { %4342 = vmatpush1.bf16.msra.mxu0 %v5824_v13  ;;  %v6009_v38 = vcombine.high %v2542_v44, %v2546_v46  ;;  %v2422_v13 = vld [vmem:[%s9167_s3 + $0x2d8] sm:$0xff]  ;;  %v6008_v36 = vcombine.low %v2542_v44, %v2546_v46  ;;  %v6827_v44 = vld [vmem:[%s9166_s2 + $0x500] sm:$0xff]   ;;  %v6828_v46 = vld [vmem:[%s9166_s2 + $0x548] sm:$0xff]  }
 0x4fa   :  { %4383 = vmatpush1.bf16.msra.mxu1 %v5952_v4  ;;  %4343 = vmatprep.subr.bf16.mxu0 %v5833_v6  ;;  %v2426_v4 = vld [vmem:[%s9167_s3 + $0x2f8] sm:$0xff] }
 0x4fb   :  { %4384 = vmatprep.subr.bf16.mxu1 %v5961_v35  ;;  %v2550_v6 = vld [vmem:[%s9167_s3 + $0x6d8] sm:$0xff]  ;;  %v5889_v12 = vcombine.high %v2422_v13, %v2426_v4  ;;  %v5888_v3 = vcombine.low %v2422_v13, %v2426_v4  ;;  %v6815_v13 = vld [vmem:[%s9166_s2 + $0x490] sm:$0xff]  }
 0x4fc   :  { %v2554_v35 = vld [vmem:[%s9167_s3 + $0x6f8] sm:$0xff] }
 0x4fd   :  { %4344 = vmatpush1.bf16.msra.mxu0 %v5832_v17  ;;  %v6017_v15 = vcombine.high %v2550_v6, %v2554_v35  ;;  %v2430_v17 = vld [vmem:[%s9167_s3 + $0x318] sm:$0xff]  ;;  %v6016_v0 = vcombine.low %v2550_v6, %v2554_v35  ;;  %v6831_v6 = vld [vmem:[%s9166_s2 + $0x510] sm:$0xff]  }
 0x4fe   :  { %4385 = vmatpush1.bf16.msra.mxu1 %v5960_v18  ;;  %4345 = vmatprep.subr.bf16.mxu0 %v5841_v24  ;;  %v2434_v18 = vld [vmem:[%s9167_s3 + $0x338] sm:$0xff] }
 0x4ff   :  { %4386 = vmatprep.subr.bf16.mxu1 %v5969_v52  ;;  %v2558_v24 = vld [vmem:[%s9167_s3 + $0x718] sm:$0xff]  ;;  %v5897_v57 = vcombine.high %v2430_v17, %v2434_v18  ;;  %v5896_v61 = vcombine.low %v2430_v17, %v2434_v18  ;;  %v6834_v17 = vld [vmem:[%s9166_s2 + $0x560] sm:$0xff]  }
 0x500   :  { %v2562_v52 = vld [vmem:[%s9167_s3 + $0x738] sm:$0xff] }
 0x501   :  { %4346 = vmatpush1.bf16.msra.mxu0 %v5840_v7  ;;  %v6025_v45 = vcombine.high %v2558_v24, %v2562_v52  ;;  %v2438_v7 = vld [vmem:[%s9167_s3 + $0x358] sm:$0xff]  ;;  %v6024_v59 = vcombine.low %v2558_v24, %v2562_v52  ;;  %v6819_v24 = vld [vmem:[%s9166_s2 + $0x4a0] sm:$0xff]   ;;  %v6820_v52 = vld [vmem:[%s9166_s2 + $0x4e8] sm:$0xff]  }
 0x502   :  { %4387 = vmatpush1.bf16.msra.mxu1 %v5968_v56  ;;  %4347 = vmatprep.subr.bf16.mxu0 %v5849_v22  ;;  %v2442_v56 = vld [vmem:[%s9167_s3 + $0x378] sm:$0xff] }
 0x503   :  { %4388 = vmatprep.subr.bf16.mxu1 %v5977_v53  ;;  %v2566_v22 = vld [vmem:[%s9167_s3 + $0x758] sm:$0xff]  ;;  %v5905_v42 = vcombine.high %v2438_v7, %v2442_v56  ;;  %v5904_v54 = vcombine.low %v2438_v7, %v2442_v56  ;;  %v6821_v56 = vld [vmem:[%s9166_s2 + $0x4a8] sm:$0xff]  }
 0x504   :  { %v2570_v53 = vld [vmem:[%s9167_s3 + $0x778] sm:$0xff] }
 0x505   :  { %4348 = vmatpush1.bf16.msra.mxu0 %v5848_v63  ;;  %v6033_v62 = vcombine.high %v2566_v22, %v2570_v53  ;;  %v2446_v63 = vld [vmem:[%s9167_s3 + $0x398] sm:$0xff]  ;;  %v6032_v29 = vcombine.low %v2566_v22, %v2570_v53  ;;  %v6822_v22 = vld [vmem:[%s9166_s2 + $0x4f0] sm:$0xff]   ;;  %v6837_v53 = vld [vmem:[%s9166_s2 + $0x528] sm:$0xff]  }
 0x506   :  { %4389 = vmatpush1.bf16.msra.mxu1 %v5976_v47  ;;  %4349 = vmatprep.subr.bf16.mxu0 %v5857_v51  ;;  %v2450_v47 = vld [vmem:[%s9167_s3 + $0x3b8] sm:$0xff] }
 0x507   :  { %4390 = vmatprep.subr.bf16.mxu1 %v5985_v20  ;;  %v2574_v51 = vld [vmem:[%s9167_s3 + $0x798] sm:$0xff]  ;;  %v5913_v50 = vcombine.high %v2446_v63, %v2450_v47  ;;  %v5912_v34 = vcombine.low %v2446_v63, %v2450_v47 }
 0x508   :  { %v2578_v20 = vld [vmem:[%s9167_s3 + $0x7b8] sm:$0xff] }
 0x509   :  { %4350 = vmatpush1.bf16.msra.mxu0 %v5856_v23  ;;  %v6041_v14 = vcombine.high %v2574_v51, %v2578_v20  ;;  %v2454_v23 = vld [vmem:[%s9167_s3 + $0x3d8] sm:$0xff]  ;;  %v6040_v37 = vcombine.low %v2574_v51, %v2578_v20 }
 0x50a   :  { %4391 = vmatpush1.bf16.msra.mxu1 %v5984_v27  ;;  %4351 = vmatprep.subr.bf16.mxu0 %v5865_v28  ;;  %v2458_v27 = vld [vmem:[%s9167_s3 + $0x3f8] sm:$0xff] }
 0x50b   :  { %4392 = vmatprep.subr.bf16.mxu1 %v5993_v39  ;;  %v2582_v28 = vld [vmem:[%s9167_s3 + $0x7d8] sm:$0xff]  ;;  %v5921_v55 = vcombine.high %v2454_v23, %v2458_v27 }
 0x50c   :  { %v2586_v39 = vld [vmem:[%s9167_s3 + $0x7f8] sm:$0xff] }
 0x50d   :  { %4352 = vmatpush1.bf16.msra.mxu0 %v5864_v31  ;;  %v6049_v11 = vcombine.high %v2582_v28, %v2586_v39  ;;  %v5920_v31 = vcombine.low %v2454_v23, %v2458_v27  ;;  %v6816_v4 = vld [vmem:[%s9166_s2 + $0x4d8] sm:$0xff]  }
 0x50e   :  { %4393 = vmatpush1.bf16.msra.mxu1 %v5992_v33  ;;  %4353 = vmatprep.subr.bf16.mxu0 %v5873_v19  ;;  %v6048_v33 = vcombine.low %v2582_v28, %v2586_v39  ;;  %v6810_v19 = vld [vmem:[%s9166_s2 + $0x4c0] sm:$0xff]   ;;  %v6832_v35 = vld [vmem:[%s9166_s2 + $0x558] sm:$0xff]  }
 0x50f   :  { %4394 = vmatprep.subr.bf16.mxu1 %v6001_v43  ;;  %v6826_v43 = vld [vmem:[%s9166_s2 + $0x540] sm:$0xff]  }
 0x511   :  { %4354 = vmatpush1.bf16.msra.mxu0 %v5872_v40  ;;  %v6813_v40 = vld [vmem:[%s9166_s2 + $0x488] sm:$0xff]  }
 0x512   :  { %4395 = vmatpush1.bf16.msra.mxu1 %v6000_v16  ;;  %4355 = vmatprep.subr.bf16.mxu0 %v5881_v30  ;;  %v6814_v16 = vld [vmem:[%s9166_s2 + $0x4d0] sm:$0xff]   ;;  %v6829_v30 = vld [vmem:[%s9166_s2 + $0x508] sm:$0xff]  }
 0x513   :  { %4396 = vmatprep.subr.bf16.mxu1 %v6009_v38  ;;  %v6830_v38 = vld [vmem:[%s9166_s2 + $0x550] sm:$0xff]  }
 0x515   :  { %4356 = vmatpush1.bf16.msra.mxu0 %v5880_v26  ;;  %v4419_v26 = vlaneseq }
 0x516   :  { %4397 = vmatpush1.bf16.msra.mxu1 %v6008_v36  ;;  %4357 = vmatprep.subr.bf16.mxu0 %v5889_v12  ;;  %v6817_v36 = vld [vmem:[%s9166_s2 + $0x498] sm:$0xff]   ;;  %v6818_v12 = vld [vmem:[%s9166_s2 + $0x4e0] sm:$0xff]  }
 0x517   :  { %4398 = vmatprep.subr.bf16.mxu1 %v6017_v15  ;;  %v6833_v15 = vld [vmem:[%s9166_s2 + $0x518] sm:$0xff]   ;;  %v8889_v18 = vshrl.u32 %v4419_v26, 7 }
 0x519   :  { %4358 = vmatpush1.bf16.msra.mxu0 %v5888_v3  ;;  %v6835_v3 = vld [vmem:[%s9166_s2 + $0x520] sm:$0xff]   ;;  %v4425_v7 = vsub.s32 1, %v8889_v18 }
 0x51a   :  { %4399 = vmatpush1.bf16.msra.mxu1 %v6016_v0  ;;  %4359 = vmatprep.subr.bf16.mxu0 %v5897_v57  ;;  %v6836_v0 = vld [vmem:[%s9166_s2 + $0x568] sm:$0xff]   ;;  %v4421_v57 = vsub.s32 0, %v8889_v18 }
 0x51b   :  { %4400 = vmatprep.subr.bf16.mxu1 %v6025_v45  ;;  %v8907_v45 = vld [vmem:[%s9169_s4] ss:$2 sm:$0xff] }
 0x51c   :  { %v4422_v63 = vrot.slane %v8907_v45, %v4421_v57  ;;  %v4429_v57 = vsub.s32 2, %v8889_v18 }
 0x51d   :  { %4360 = vmatpush1.bf16.msra.mxu0 %v5896_v61 }
 0x51e   :  { %4401 = vmatpush1.bf16.msra.mxu1 %v6024_v59  ;;  %4361 = vmatprep.subr.bf16.mxu0 %v5905_v42  ;;  %v6838_v59 = vld [vmem:[%s9166_s2 + $0x570] sm:$0xff]  }
 0x51f   :  { %4402 = vmatprep.subr.bf16.mxu1 %v6033_v62 }
 0x521   :  { %4362 = vmatpush1.bf16.msra.mxu0 %v5904_v54  ;;  %v4426_v54 = vrot.slane %v8907_v45, %v4425_v7  ;;  %v4433_v7 = vsub.s32 3, %v8889_v18 }
 0x522   :  { %4403 = vmatpush1.bf16.msra.mxu1 %v6032_v29  ;;  %4363 = vmatprep.subr.bf16.mxu0 %v5913_v50  ;;  %v6823_v50 = vld [vmem:[%s9166_s2 + $0x4b0] sm:$0xff]  }
 0x523   :  { %4404 = vmatprep.subr.bf16.mxu1 %v6041_v14 }
 0x525   :  { %4364 = vmatpush1.bf16.msra.mxu0 %v5912_v34  ;;  %v6840_v34 = vld [vmem:[%s9166_s2 + $0x578] sm:$0xff]  }
 0x526   :  { %4405 = vmatpush1.bf16.msra.mxu1 %v6040_v37  ;;  %4365 = vmatprep.subr.bf16.mxu0 %v5921_v55 }
 0x527   :  { %4406 = vmatprep.subr.bf16.mxu1 %v6049_v11  ;;  %v6825_v11 = vld [vmem:[%s9166_s2 + $0x4b8] sm:$0xff]  }
 0x529   :  { %4366 = vmatpush1.bf16.msra.mxu0 %v5920_v31 }
 0x52a   :  { %4407 = vmatpush1.bf16.msra.mxu1 %v6048_v33  ;;  %6411 = vmatprep.subr.bf16.mxu0 %v6810_v19  ;;  %v6841_v33 = vld [vmem:[%s9166_s2 + $0x538] sm:$0xff]  }
 0x52b   :  { %6433 = vmatprep.subr.bf16.mxu1 %v6826_v43 }
 0x52c   :  { %4368 = vmatmul.mubr.bf16.vlgmr.msra.gmra.mrb[60].mxu0 %v8250_v49 }
 0x52d   :  { %4409 = vmatmul.mubr.bf16.vlgmr.msra.gmra.mrb[60].mxu1 %v8254_v1  ;;  %6412 = vmatpush3.bf16.msra.mxu0 %v6811_v10 }
 0x52e   :  { %6413 = vmatprep.subr.bf16.mxu0 %v6812_v41  ;;  %6434 = vmatpush3.bf16.msra.mxu1 %v6827_v44 }
 0x52f   :  { %6435 = vmatprep.subr.bf16.mxu1 %v6828_v46  ;;  %v6842_v46 = vld [vmem:[%s9166_s2 + $0x5c0] sm:$0xff]  }
 0x531   :  { %6414 = vmatpush3.bf16.msra.mxu0 %v6813_v40  ;;  %v6843_v40 = vld [vmem:[%s9166_s2 + $0x580] sm:$0xff]  }
 0x532   :  { %6415 = vmatprep.subr.bf16.mxu0 %v6814_v16  ;;  %6436 = vmatpush3.bf16.msra.mxu1 %v6829_v30  ;;  %v6844_v16 = vld [vmem:[%s9166_s2 + $0x5c8] sm:$0xff]  }
 0x533   :  { %6437 = vmatprep.subr.bf16.mxu1 %v6830_v38  ;;  %v6845_v30 = vld [vmem:[%s9166_s2 + $0x588] sm:$0xff]   ;;  %v6846_v38 = vld [vmem:[%s9166_s2 + $0x5d0] sm:$0xff]  }
 0x535   :  { %6416 = vmatpush3.bf16.msra.mxu0 %v6815_v13  ;;  %v6847_v13 = vld [vmem:[%s9166_s2 + $0x590] sm:$0xff]  }
 0x536   :  { %6417 = vmatprep.subr.bf16.mxu0 %v6816_v4  ;;  %6438 = vmatpush3.bf16.msra.mxu1 %v6831_v6  ;;  %v6848_v4 = vld [vmem:[%s9166_s2 + $0x5d8] sm:$0xff]  }
 0x537   :  { %6439 = vmatprep.subr.bf16.mxu1 %v6832_v35  ;;  %v6849_v6 = vld [vmem:[%s9166_s2 + $0x598] sm:$0xff]   ;;  %v6850_v35 = vld [vmem:[%s9166_s2 + $0x5e0] sm:$0xff]  }
 0x539   :  { %6418 = vmatpush3.bf16.msra.mxu0 %v6817_v36  ;;  %v6851_v36 = vld [vmem:[%s9166_s2 + $0x5a0] sm:$0xff]  }
 0x53a   :  { %6419 = vmatprep.subr.bf16.mxu0 %v6818_v12  ;;  %6440 = vmatpush3.bf16.msra.mxu1 %v6833_v15  ;;  %v6852_v12 = vld [vmem:[%s9166_s2 + $0x5e8] sm:$0xff]  }
 0x53b   :  { %6441 = vmatprep.subr.bf16.mxu1 %v6834_v17  ;;  %v6853_v15 = vld [vmem:[%s9166_s2 + $0x5a8] sm:$0xff]   ;;  %v6854_v17 = vld [vmem:[%s9166_s2 + $0x5f0] sm:$0xff]  }
 0x53d   :  { %6420 = vmatpush3.bf16.msra.mxu0 %v6819_v24  ;;  %v6855_v24 = vld [vmem:[%s9166_s2 + $0x5b0] sm:$0xff]  }
 0x53e   :  { %6421 = vmatprep.subr.bf16.mxu0 %v6820_v52  ;;  %6442 = vmatpush3.bf16.msra.mxu1 %v6835_v3  ;;  %v6856_v52 = vld [vmem:[%s9166_s2 + $0x5f8] sm:$0xff]  }
 0x53f   :  { %v4123_v61 = vpop.f32.mrb[48].mxu0  ;;  %6443 = vmatprep.subr.bf16.mxu1 %v6836_v0  ;;  %v6857_v3 = vld [vmem:[%s9166_s2 + $0x5b8] sm:$0xff]   ;;  %v6858_v0 = vld [vmem:[%s9166_s2 + $0x6c0] sm:$0xff]  }
 0x540   :  { %v4124_v42 = vadd.f32 %v4123_v61, %v8226_v58  ;;  %v4164_v62 = vpop.f32.mrb[48].mxu1  ;;  %v4125_v47 = vpop.f32.mrb[49].mxu0  ;;  %v6824_v58 = vld [vmem:[%s9166_s2 + $0x4f8] sm:$0xff]   ;;  %v4430_v61 = vrot.slane %v8907_v45, %v4429_v57 }
 0x541   :  { %v4126_v51 = vadd.f32 %v4125_v47, %v8229_v2  ;;  %v4166_v20 = vpop.f32.mrb[49].mxu1  ;;  %v4127_v29 = vpop.f32.mrb[50].mxu0  ;;  %6422 = vmatpush3.bf16.msra.mxu0 %v6821_v56  ;;  %v6839_v2 = vld [vmem:[%s9166_s2 + $0x530] sm:$0xff]  }
 0x542   :  { %v4165_v14 = vadd.f32 %v4164_v62, %v4124_v42  ;;  %v4168_v23 = vpop.f32.mrb[50].mxu1  ;;  %v4128_v27 = vpop.f32.mrb[51].mxu0  ;;  %6423 = vmatprep.subr.bf16.mxu0 %v6822_v22  ;;  %6444 = vmatpush3.bf16.msra.mxu1 %v6837_v53 }
 0x543   :  { %v4167_v28 = vadd.f32 %v4166_v20, %v4126_v51  ;;  %v4169_v39 = vpop.f32.mrb[51].mxu1  ;;  %6445 = vmatprep.subr.bf16.mxu1 %v6838_v59 }
 0x544   :  { %v4459_v37 = vadd.f32 %v4422_v63, %v4165_v14  ;;  %v4434_v63 = vrot.slane %v8907_v45, %v4433_v7 }
 0x545   :  { %v4460_v55 = vadd.f32 %v4426_v54, %v4167_v28  ;;  %6424 = vmatpush3.bf16.msra.mxu0 %v6823_v50 }
 0x546   :  { %vm4467_vm1 = vcmp.ge.f32.partialorder %v4459_v37, 0.0  ;;  %v4471_v31 = vmul.f32 0.2, %v4459_v37  ;;  %6425 = vmatprep.subr.bf16.mxu0 %v6824_v58  ;;  %6446 = vmatpush3.bf16.msra.mxu1 %v6839_v2 }
 0x547   :  { %v4472_v19 = vmul.f32 0.2, %v4460_v55  ;;  %vm4468_vm12 = vcmp.ge.f32.partialorder %v4460_v55, 0.0  ;;  %6447 = vmatprep.subr.bf16.mxu1 %v6840_v34  ;;  %v6875_v34 = vld [vmem:[%s9166_s2 + $0x600] sm:$0xff]  }
 0x548   :  { %v4475_v43 = vsel %vm4467_vm1, %v4459_v37, %v4471_v31  ;;  %v6876_v37 = vld [vmem:[%s9166_s2 + $0x648] sm:$0xff]   ;;  %v6879_v31 = vld [vmem:[%s9166_s2 + $0x610] sm:$0xff]  }
 0x549   :  { %6426 = vmatpush3.bf16.msra.mxu0 %v6825_v11  ;;  %v4476_v10 = vsel %vm4468_vm12, %v4460_v55, %v4472_v19  ;;  %v4715_v44 = vpack.c.bf16 %v4475_v43, %v4475_v43  ;;  %v6877_v55 = vld [vmem:[%s9166_s2 + $0x608] sm:$0xff]   ;;  %v6878_v11 = vld [vmem:[%s9166_s2 + $0x650] sm:$0xff]   ;;  %v6881_v19 = vld [vmem:[%s9166_s2 + $0x618] sm:$0xff]  }
 0x54a   :  { %v4716_v41 = vpack.c.bf16 %v4476_v10, %v4476_v10  ;;  %6448 = vmatpush3.bf16.msra.mxu1 %v6841_v33  ;;  %6455 = vmatprep.subr.bf16.mxu0 %v6842_v46  ;;  %v6880_v33 = vld [vmem:[%s9166_s2 + $0x658] sm:$0xff]   ;;  %v6882_v43 = vld [vmem:[%s9166_s2 + $0x660] sm:$0xff]   ;;  %v6886_v46 = vld [vmem:[%s9166_s2 + $0x670] sm:$0xff]  }
 0x54b   :  { %v6883_v10 = vld [vmem:[%s9166_s2 + $0x620] sm:$0xff]  }
 0x54c   :  { %5336 = vmatprep.mubr.bf16.mxu0 %v4716_v41  ;;  %v6884_v41 = vld [vmem:[%s9166_s2 + $0x668] sm:$0xff]  }
 0x54d   :  { %5337 = vmatmul.mubr.bf16.vlgmr.msra.gmra.mrb[64].mxu0 %v4715_v44  ;;  %v6885_v44 = vld [vmem:[%s9166_s2 + $0x628] sm:$0xff]  }
 0x54e   :  { %6456 = vmatpush3.bf16.msra.mxu0 %v6843_v40  ;;  %v6887_v40 = vld [vmem:[%s9166_s2 + $0x630] sm:$0xff]  }
 0x54f   :  { %6457 = vmatprep.subr.bf16.mxu0 %v6844_v16  ;;  %v6888_v16 = vld [vmem:[%s9166_s2 + $0x678] sm:$0xff]  }
 0x552   :  { %6458 = vmatpush3.bf16.msra.mxu0 %v6845_v30  ;;  %v6889_v30 = vld [vmem:[%s9166_s2 + $0x638] sm:$0xff]  }
 0x553   :  { %6459 = vmatprep.subr.bf16.mxu0 %v6846_v38  ;;  %v6890_v38 = vld [vmem:[%s9166_s2 + $0x740] sm:$0xff]  }
 0x556   :  { %6460 = vmatpush3.bf16.msra.mxu0 %v6847_v13  ;;  %v4437_v13 = vsub.s32 4, %v8889_v18 }
 0x557   :  { %6461 = vmatprep.subr.bf16.mxu0 %v6848_v4  ;;  %v4441_v4 = vsub.s32 5, %v8889_v18 }
 0x55a   :  { %6462 = vmatpush3.bf16.msra.mxu0 %v6849_v6 }
 0x55b   :  { %6463 = vmatprep.subr.bf16.mxu0 %v6850_v35 }
 0x55e   :  { %6464 = vmatpush3.bf16.msra.mxu0 %v6851_v36 }
 0x55f   :  { %6465 = vmatprep.subr.bf16.mxu0 %v6852_v12  ;;  %v4438_v12 = vrot.slane %v8907_v45, %v4437_v13 }
 0x562   :  { %6466 = vmatpush3.bf16.msra.mxu0 %v6853_v15 }
 0x563   :  { %6467 = vmatprep.subr.bf16.mxu0 %v6854_v17 }
 0x566   :  { %6468 = vmatpush3.bf16.msra.mxu0 %v6855_v24 }
 0x567   :  { %6469 = vmatprep.subr.bf16.mxu0 %v6856_v52  ;;  %v4442_v52 = vrot.slane %v8907_v45, %v4441_v4 }
 0x56a   :  { %6470 = vmatpush3.bf16.msra.mxu0 %v6857_v3 }
 0x56b   :  { %6499 = vmatprep.subr.bf16.mxu0 %v6858_v0 }
 0x57f   :  { %v4205_v56 = vpop.f32.mrb[52].mxu0 }
 0x580   :  { %v4206_v22 = vadd.f32 %v4205_v56, %v8278_v21  ;;  %v4246_v53 = vpop.f32.mrb[52].mxu1  ;;  %v4207_v59 = vpop.f32.mrb[53].mxu0 }
 0x581   :  { %v4208_v42 = vadd.f32 %v4207_v59, %v8286_v8  ;;  %v4248_v62 = vpop.f32.mrb[53].mxu1  ;;  %v4209_v47 = vpop.f32.mrb[54].mxu0  ;;  %v6874_v8 = vld [vmem:[%s9166_s2 + $0x640] sm:$0xff]  }
 0x582   :  { %v4247_v51 = vadd.f32 %v4246_v53, %v4206_v22  ;;  %v4250_v20 = vpop.f32.mrb[54].mxu1  ;;  %v4210_v54 = vpop.f32.mrb[55].mxu0  ;;  %6477 = vmatprep.subr.bf16.mxu1 %v6874_v8 }
 0x583   :  { %v4249_v29 = vadd.f32 %v4248_v62, %v4208_v42  ;;  %v4251_v50 = vpop.f32.mrb[55].mxu1 }
 0x584   :  { %v4461_v14 = vadd.f32 %v4430_v61, %v4247_v51 }
 0x585   :  { %v4462_v23 = vadd.f32 %v4434_v63, %v4249_v29 }
 0x586   :  { %vm4469_vm13 = vcmp.ge.f32.partialorder %v4461_v14, 0.0  ;;  %v4473_v27 = vmul.f32 0.2, %v4461_v14 }
 0x587   :  { %v4474_v21 = vmul.f32 0.2, %v4462_v23  ;;  %vm4470_vm14 = vcmp.ge.f32.partialorder %v4462_v23, 0.0 }
 0x588   :  { %v4477_v58 = vsel %vm4469_vm13, %v4461_v14, %v4473_v27 }
 0x589   :  { %v4478_v2 = vsel %vm4470_vm14, %v4462_v23, %v4474_v21  ;;  %v4717_v39 = vpack.c.bf16 %v4477_v58, %v4477_v58 }
 0x58a   :  { %v4718_v28 = vpack.c.bf16 %v4478_v2, %v4478_v2 }
 0x58c   :  { %5376 = vmatprep.mubr.bf16.mxu1 %v4718_v28 }
 0x58d   :  { %5377 = vmatmul.mubr.bf16.vlgmr.msra.gmra.mrb[64].mxu1 %v4717_v39  ;;  %v6859_v39 = vld [vmem:[%s9166_s2 + $0x680] sm:$0xff]  }
 0x58e   :  { %6478 = vmatpush3.bf16.msra.mxu1 %v6875_v34  ;;  %v6860_v34 = vld [vmem:[%s9166_s2 + $0x6c8] sm:$0xff]  }
 0x58f   :  { %6479 = vmatprep.subr.bf16.mxu1 %v6876_v37  ;;  %v6861_v37 = vld [vmem:[%s9166_s2 + $0x688] sm:$0xff]  }
 0x592   :  { %6480 = vmatpush3.bf16.msra.mxu1 %v6877_v55  ;;  %v6862_v55 = vld [vmem:[%s9166_s2 + $0x6d0] sm:$0xff]  }
 0x593   :  { %6481 = vmatprep.subr.bf16.mxu1 %v6878_v11  ;;  %v6863_v11 = vld [vmem:[%s9166_s2 + $0x690] sm:$0xff]  }
 0x596   :  { %6482 = vmatpush3.bf16.msra.mxu1 %v6879_v31  ;;  %v6864_v31 = vld [vmem:[%s9166_s2 + $0x6d8] sm:$0xff]  }
 0x597   :  { %6483 = vmatprep.subr.bf16.mxu1 %v6880_v33  ;;  %v6866_v33 = vld [vmem:[%s9166_s2 + $0x6e0] sm:$0xff]  }
 0x59a   :  { %6484 = vmatpush3.bf16.msra.mxu1 %v6881_v19  ;;  %v6867_v19 = vld [vmem:[%s9166_s2 + $0x6a0] sm:$0xff]  }
 0x59b   :  { %6485 = vmatprep.subr.bf16.mxu1 %v6882_v43  ;;  %v6868_v43 = vld [vmem:[%s9166_s2 + $0x6e8] sm:$0xff]  }
 0x59e   :  { %6486 = vmatpush3.bf16.msra.mxu1 %v6883_v10  ;;  %v4445_v10 = vsub.s32 6, %v8889_v18 }
 0x59f   :  { %6487 = vmatprep.subr.bf16.mxu1 %v6884_v41  ;;  %v4449_v41 = vsub.s32 7, %v8889_v18 }
 0x5a2   :  { %6488 = vmatpush3.bf16.msra.mxu1 %v6885_v44  ;;  %v6869_v44 = vld [vmem:[%s9166_s2 + $0x6a8] sm:$0xff]  }
 0x5a3   :  { %6489 = vmatprep.subr.bf16.mxu1 %v6886_v46 }
 0x5a6   :  { %6490 = vmatpush3.bf16.msra.mxu1 %v6887_v40  ;;  %v6870_v40 = vld [vmem:[%s9166_s2 + $0x6f0] sm:$0xff]  }
 0x5a7   :  { %6491 = vmatprep.subr.bf16.mxu1 %v6888_v16 }
 0x5aa   :  { %6492 = vmatpush3.bf16.msra.mxu1 %v6889_v30 }
 0x5ab   :  { %6521 = vmatprep.subr.bf16.mxu1 %v6890_v38  ;;  %v4446_v38 = vrot.slane %v8907_v45, %v4445_v10  ;;  %v6905_v10 = vld [vmem:[%s9166_s2 + $0x738] sm:$0xff]  }
 0x5bf   :  { %v4287_v6 = vpop.f32.mrb[56].mxu0 }
 0x5c0   :  { %v4288_v35 = vadd.f32 %v4287_v6, %v8300_v25  ;;  %v4328_v36 = vpop.f32.mrb[56].mxu1  ;;  %v4289_v15 = vpop.f32.mrb[57].mxu0  ;;  %v4450_v6 = vrot.slane %v8907_v45, %v4449_v41  ;;  %v6873_v45 = vld [vmem:[%s9166_s2 + $0x6b8] sm:$0xff]   ;;  %v6050_v41 = vld [vmem:[%s9169_s4 + $0x1] ss:$0 sm:$0xff] }
 0x5c1   :  { %v4290_v17 = vadd.f32 %v4289_v15, %v8308_v5  ;;  %v4330_v24 = vpop.f32.mrb[57].mxu1  ;;  %v4291_v3 = vpop.f32.mrb[58].mxu0 }
 0x5c2   :  { %v4329_v0 = vadd.f32 %v4328_v36, %v4288_v35  ;;  %v4332_v57 = vpop.f32.mrb[58].mxu1  ;;  %v4292_v7 = vpop.f32.mrb[59].mxu0 }
 0x5c3   :  { %v4331_v56 = vadd.f32 %v4330_v24, %v4290_v17  ;;  %v4333_v22 = vpop.f32.mrb[59].mxu1  ;;  %v6871_v17 = vld [vmem:[%s9166_s2 + $0x6b0] sm:$0xff]  }
 0x5c4   :  { %v4463_v53 = vadd.f32 %v4438_v12, %v4329_v0 }
 0x5c5   :  { %v4464_v61 = vadd.f32 %v4442_v52, %v4331_v56  ;;  %v6872_v52 = vld [vmem:[%s9166_s2 + $0x6f8] sm:$0xff]  }
 0x5c6   :  { %v4479_v59 = vand.u32 2147483647, %v4463_v53  ;;  %vm4495_vm15 = vcmp.ge.f32.partialorder %v4463_v53, 0.0 }
 0x5c7   :  { %v4480_v42 = vand.u32 2147483647, %v4464_v61  ;;  %vm4496_vm2 = vcmp.ge.f32.partialorder %v4464_v61, 0.0 }
 0x5c8   :  { %v4483_v25 = vsub.f32 0.0, %v4479_v59 }
 0x5c9   :  { %v4484_v62 = vsub.f32 0.0, %v4480_v42 }
 0x5ca   :  { %v4487_v63 = vmul.f32 1.442695, %v4483_v25 }
 0x5cb   :  { %v4489_v47 = vmul.f32 1.442695, %v4484_v62 }
 0x5cc   :  { %6906 = vpow2.f32 %v4487_v63 }
 0x5cd   :  { %6908 = vpow2.f32 %v4489_v47 }
 0x5d6   :  { %v6907_v5 = vpop.eup %6906 }
 0x5d7   :  { %v6909_v51 = vpop.eup %6908  ;;  %v4499_v20 = vadd.f32 1.0, %v6907_v5 }
 0x5d8   :  { %v4500_v54 = vadd.f32 1.0, %v6909_v51 }
 0x5d9   :  { %6910 = vrcp.f32 %v4499_v20 }
 0x5da   :  { %6912 = vrcp.f32 %v4500_v54 }
 0x5e3   :  { %v6911_v29 = vpop.eup %6910 }
 0x5e4   :  { %v6913_v50 = vpop.eup %6912  ;;  %v4511_v14 = vmul.f32 %v6911_v29, %v6907_v5 }
 0x5e5   :  { %v4512_v23 = vmul.f32 %v6913_v50, %v6909_v51 }
 0x5e6   :  { %v4515_v27 = vsel %vm4495_vm15, %v6911_v29, %v4511_v14 }
 0x5e7   :  { %v4519_v21 = vmul.f32 %v4515_v27, %v4463_v53  ;;  %v4516_v58 = vsel %vm4496_vm2, %v6913_v50, %v4512_v23 }
 0x5e8   :  { %v4520_v2 = vmul.f32 %v4516_v58, %v4464_v61  ;;  %v6891_v58 = vld [vmem:[%s9166_s2 + $0x700] sm:$0xff]  }
 0x5e9   :  { %v4719_v8 = vpack.c.bf16 %v4519_v21, %v4519_v21 }
 0x5ea   :  { %v4720_v28 = vpack.c.bf16 %v4520_v2, %v4520_v2 }
 0x5ec   :  { %5416 = vmatprep.mubr.bf16.mxu0 %v4720_v28  ;;  %v6892_v28 = vld [vmem:[%s9166_s2 + $0x748] sm:$0xff]  }
 0x5ed   :  { %5417 = vmatmul.mubr.bf16.vlgmr.msra.gmra.mrb[68].mxu0 %v4719_v8  ;;  %v6894_v8 = vld [vmem:[%s9166_s2 + $0x750] sm:$0xff]  }
 0x5ee   :  { %6500 = vmatpush3.bf16.msra.mxu0 %v6859_v39  ;;  %5496 = vmatprep.mubr.bf16.mxu0 %v8231_v9  ;;  %v6865_v9 = vld [vmem:[%s9166_s2 + $0x698] sm:$0xff]   ;;  %v6893_v39 = vld [vmem:[%s9166_s2 + $0x708] sm:$0xff]  }
 0x5ef   :  { %6501 = vmatprep.subr.bf16.mxu0 %v6860_v34  ;;  %v6895_v34 = vld [vmem:[%s9166_s2 + $0x710] sm:$0xff]  }
 0x5f2   :  { %6502 = vmatpush3.bf16.msra.mxu0 %v6861_v37  ;;  %v6896_v37 = vld [vmem:[%s9166_s2 + $0x758] sm:$0xff]  }
 0x5f3   :  { %6503 = vmatprep.subr.bf16.mxu0 %v6862_v55  ;;  %v6898_v55 = vld [vmem:[%s9166_s2 + $0x760] sm:$0xff]  }
 0x5f6   :  { %6504 = vmatpush3.bf16.msra.mxu0 %v6863_v11  ;;  %v6899_v11 = vld [vmem:[%s9166_s2 + $0x720] sm:$0xff]  }
 0x5f7   :  { %6505 = vmatprep.subr.bf16.mxu0 %v6864_v31  ;;  %v6900_v31 = vld [vmem:[%s9166_s2 + $0x768] sm:$0xff]  }
 0x5fa   :  { %6506 = vmatpush3.bf16.msra.mxu0 %v6865_v9  ;;  %v6901_v9 = vld [vmem:[%s9166_s2 + $0x728] sm:$0xff]  }
 0x5fb   :  { %6507 = vmatprep.subr.bf16.mxu0 %v6866_v33  ;;  %v6902_v33 = vld [vmem:[%s9166_s2 + $0x770] sm:$0xff]  }
 0x5fe   :  { %6508 = vmatpush3.bf16.msra.mxu0 %v6867_v19  ;;  %v6903_v19 = vld [vmem:[%s9166_s2 + $0x730] sm:$0xff]  }
 0x5ff   :  { %v4369_v46 = vpop.f32.mrb[60].mxu0  ;;  %6509 = vmatprep.subr.bf16.mxu0 %v6868_v43  ;;  %v6904_v43 = vld [vmem:[%s9166_s2 + $0x778] sm:$0xff]  }
 0x600   :  { %v4370_v16 = vadd.f32 %v4369_v46, %v8328_v60  ;;  %v4410_v30 = vpop.f32.mrb[60].mxu1  ;;  %v4371_v13 = vpop.f32.mrb[61].mxu0 }
 0x601   :  { %v4372_v4 = vadd.f32 %v4371_v13, %v8336_v32  ;;  %v4412_v18 = vpop.f32.mrb[61].mxu1  ;;  %v4373_v35 = vpop.f32.mrb[62].mxu0 }
 0x602   :  { %v4411_v36 = vadd.f32 %v4410_v30, %v4370_v16  ;;  %v4414_v12 = vpop.f32.mrb[62].mxu1  ;;  %6510 = vmatpush3.bf16.msra.mxu0 %v6869_v44  ;;  %v4374_v15 = vpop.f32.mrb[63].mxu0 }
 0x603   :  { %v4413_v24 = vadd.f32 %v4412_v18, %v4372_v4  ;;  %v4415_v60 = vpop.f32.mrb[63].mxu1  ;;  %6511 = vmatprep.subr.bf16.mxu0 %v6870_v40 }
 0x604   :  { %v4465_v32 = vadd.f32 %v4446_v38, %v4411_v36 }
 0x605   :  { %v4466_v3 = vadd.f32 %v4450_v6, %v4413_v24 }
 0x606   :  { %v4481_v0 = vand.u32 2147483647, %v4465_v32  ;;  %6512 = vmatpush3.bf16.msra.mxu0 %v6871_v17  ;;  %vm4497_vm3 = vcmp.ge.f32.partialorder %v4465_v32, 0.0 }
 0x607   :  { %v4482_v57 = vand.u32 2147483647, %v4466_v3  ;;  %6513 = vmatprep.subr.bf16.mxu0 %v6872_v52  ;;  %vm4498_vm4 = vcmp.ge.f32.partialorder %v4466_v3, 0.0 }
 0x608   :  { %v4485_v7 = vsub.f32 0.0, %v4481_v0 }
 0x609   :  { %v4486_v56 = vsub.f32 0.0, %v4482_v57 }
 0x60a   :  { %v4491_v22 = vmul.f32 1.442695, %v4485_v7  ;;  %6514 = vmatpush3.bf16.msra.mxu0 %v6873_v45 }
 0x60b   :  { %v4493_v53 = vmul.f32 1.442695, %v4486_v56 }
 0x60c   :  { %6914 = vpow2.f32 %v4491_v22 }
 0x60d   :  { %6916 = vpow2.f32 %v4493_v53  ;;  %5497 = vmatmul.mubr.bf16.vlgmr.msra.gmra.mrb[72].mxu0 %v8250_v49 }
 0x616   :  { %v6915_v61 = vpop.eup %6914 }
 0x617   :  { %v6917_v59 = vpop.eup %6916  ;;  %v4501_v42 = vadd.f32 1.0, %v6915_v61 }
 0x618   :  { %v4502_v25 = vadd.f32 1.0, %v6917_v59 }
 0x619   :  { %6918 = vrcp.f32 %v4501_v42 }
 0x61a   :  { %6920 = vrcp.f32 %v4502_v25 }
 0x620   :  { %v6427_v62 = vpop.f32.mrb[64].mxu0 }
 0x621   :  { %v6428_v63 = vpop.f32.mrb[65].mxu0 }
 0x622   :  { %v6429_v47 = vadd.f32 %v6428_v63, %v6427_v62  ;;  %v6430_v5 = vpop.f32.mrb[66].mxu0 }
 0x623   :  { %v6919_v51 = vpop.eup %6918  ;;  %v6431_v20 = vpop.f32.mrb[67].mxu0 }
 0x624   :  { %v6921_v54 = vpop.eup %6920  ;;  %v4513_v29 = vmul.f32 %v6919_v51, %v6915_v61  ;;  %v5339_v40 = vadd.f32 %v6429_v47, %v6050_v41 }
 0x625   :  { %v4514_v50 = vmul.f32 %v6921_v54, %v6917_v59 }
 0x626   :  { %v4517_v14 = vsel %vm4497_vm3, %v6919_v51, %v4513_v29  ;;  %v5545_v51 = vand.u32 127, %v4419_v26 }
 0x627   :  { %v4521_v23 = vmul.f32 %v4517_v14, %v4465_v32  ;;  %v4518_v49 = vsel %vm4498_vm4, %v6921_v54, %v4514_v50 }
 0x628   :  { %v4522_v27 = vmul.f32 %v4518_v49, %v4466_v3  ;;  %vm5549_vm5 = vcmp.ge.s32.totalorder %v5545_v51, 33  ;;  %vm5550_vm6 = vcmp.lt.s32.totalorder %v5545_v51, 34  ;;  %vm5547_vm0 = vcmp.lt.s32.totalorder %v5545_v51, 1 }
 0x629   :  { %v4721_v2 = vpack.c.bf16 %v4521_v23, %v4521_v23  ;;  %vm5551_vm7 = vmand %vm5549_vm5, %vm5550_vm6 }
 0x62a   :  { %v4722_v21 = vpack.c.bf16 %v4522_v27, %v4522_v27  ;;  %vm5552_vm8 = vmor %vm5547_vm0, %vm5551_vm7 }
 0x62c   :  { %5456 = vmatprep.mubr.bf16.mxu1 %v4722_v21 }
 0x62d   :  { %5457 = vmatmul.mubr.bf16.vlgmr.msra.gmra.mrb[68].mxu1 %v4721_v2 }
 0x62e   :  { %6522 = vmatpush3.bf16.msra.mxu1 %v6891_v58  ;;  %5536 = vmatprep.mubr.bf16.mxu1 %v8240_v48  ;;  %v6897_v48 = vld [vmem:[%s9166_s2 + $0x718] sm:$0xff]  }
 0x62f   :  { %6523 = vmatprep.subr.bf16.mxu1 %v6892_v28 }
 0x632   :  { %6524 = vmatpush3.bf16.msra.mxu1 %v6893_v39 }
 0x633   :  { %6525 = vmatprep.subr.bf16.mxu1 %v6894_v8 }
 0x636   :  { %6526 = vmatpush3.bf16.msra.mxu1 %v6895_v34 }
 0x637   :  { %6527 = vmatprep.subr.bf16.mxu1 %v6896_v37 }
 0x63a   :  { %6528 = vmatpush3.bf16.msra.mxu1 %v6897_v48 }
 0x63b   :  { %6529 = vmatprep.subr.bf16.mxu1 %v6898_v55 }
 0x63e   :  { %6530 = vmatpush3.bf16.msra.mxu1 %v6899_v11 }
 0x63f   :  { %6531 = vmatprep.subr.bf16.mxu1 %v6900_v31 }
 0x642   :  { %6532 = vmatpush3.bf16.msra.mxu1 %v6901_v9 }
 0x643   :  { %6533 = vmatprep.subr.bf16.mxu1 %v6902_v33 }
 0x646   :  { %6534 = vmatpush3.bf16.msra.mxu1 %v6903_v19 }
 0x647   :  { %6535 = vmatprep.subr.bf16.mxu1 %v6904_v43 }
 0x64a   :  { %6536 = vmatpush3.bf16.msra.mxu1 %v6905_v10 }
 0x64d   :  { %5537 = vmatmul.mubr.bf16.vlgmr.msra.gmra.mrb[72].mxu1 %v8254_v1 }
 0x660   :  { %v6449_v44 = vpop.f32.mrb[64].mxu1 }
 0x661   :  { %v6450_v46 = vpop.f32.mrb[65].mxu1 }
 0x662   :  { %v6451_v16 = vadd.f32 %v6450_v46, %v6449_v44  ;;  %v6452_v30 = vpop.f32.mrb[66].mxu1 }
 0x663   :  { %v6453_v38 = vpop.f32.mrb[67].mxu1 }
 0x664   :  { %v5379_v13 = vadd.f32 %v6451_v16, %v5339_v40 }
 0x6c0   :  { %v6471_v4 = vpop.f32.mrb[68].mxu0 }
 0x6c1   :  { %v6472_v18 = vpop.f32.mrb[69].mxu0 }
 0x6c2   :  { %v6473_v6 = vadd.f32 %v6472_v18, %v6471_v4  ;;  %v6474_v35 = vpop.f32.mrb[70].mxu0 }
 0x6c3   :  { %v6475_v36 = vpop.f32.mrb[71].mxu0 }
 0x6c4   :  { %v5419_v12 = vadd.f32 %v6473_v6, %v5379_v13 }
 0x6e0   :  { %v6515_v15 = vpop.f32.mrb[72].mxu0 }
 0x6e1   :  { %v6516_v17 = vpop.f32.mrb[73].mxu0 }
 0x6e2   :  { %v6517_v1 = vadd.f32 %v6516_v17, %v6515_v15  ;;  %v6518_v24 = vpop.f32.mrb[74].mxu0 }
 0x6e3   :  { %v6519_v60 = vpop.f32.mrb[75].mxu0 }
 0x700   :  { %v6493_v52 = vpop.f32.mrb[68].mxu1 }
 0x701   :  { %v6494_v32 = vpop.f32.mrb[69].mxu1 }
 0x702   :  { %v6495_v3 = vadd.f32 %v6494_v32, %v6493_v52  ;;  %v6496_v0 = vpop.f32.mrb[70].mxu1 }
 0x703   :  { %v6497_v45 = vpop.f32.mrb[71].mxu1 }
 0x704   :  { %v5459_v57 = vadd.f32 %v6495_v3, %v5419_v12 }
 0x706   :  { %v5499_v7 = vadd.f32 %v6517_v1, %v5459_v57 }
 0x720   :  { %v6537_v56 = vpop.f32.mrb[72].mxu1 }
 0x721   :  { %v6538_v22 = vpop.f32.mrb[73].mxu1 }
 0x722   :  { %v6539_v53 = vadd.f32 %v6538_v22, %v6537_v56  ;;  %v6540_v61 = vpop.f32.mrb[74].mxu1 }
 0x723   :  { %v6541_v59 = vpop.f32.mrb[75].mxu1 }
 0x724   :  { %v5539_v42 = vadd.f32 %v6539_v53, %v5499_v7 }
 0x726   :  { %v5553_v25 = vand.u32 2147483647, %v5539_v42  ;;  %vm5557_vm9 = vcmp.ge.f32.partialorder %v5539_v42, 0.0 }
 0x728   :  { %v5554_v62 = vsub.f32 0.0, %v5553_v25 }
 0x72a   :  { %v5555_v63 = vmul.f32 1.442695, %v5554_v62 }
 0x72c   :  { %6922 = vpow2.f32 %v5555_v63 }
 0x736   :  { %v6923_v47 = vpop.eup %6922 }
 0x737   :  { %v5558_v5 = vadd.f32 1.0, %v6923_v47 }
 0x739   :  { %6924 = vrcp.f32 %v5558_v5 }
 0x743   :  { %v6925_v20 = vpop.eup %6924 }
 0x744   :  { %v5561_v54 = vmul.f32 %v6925_v20, %v6923_v47 }
 0x746   :  { %v5562_v29 = vsel %vm5557_vm9, %v6925_v20, %v5561_v54 }
 0x747   :  { %v5563_v50 = vsel %vm5552_vm8, %v5562_v29, %v5539_v42 }
 0x748   :  { %5564 = vst [vmem:[%s9170_s5] sm:$0x3] %v5563_v50 }

</bundles_post_ra>
